<compile_context>
chip_gen: v7x
topology: tpu7x:2x2x1
jax: 0.10.0
libtpu: 0.0.40
codegen_flags: <defaults>
</compile_context>

<pallas_src>
import jax
import jax.numpy as jnp
from jax.experimental import pallas as pl
from jax.experimental.pallas import tpu as pltpu


# ---------------------------------------------------------------------------
# Fused kernel body: gc1 + 6x residual GCN + gc8 + flatten/mask + fc + softmax
# ---------------------------------------------------------------------------
def _resgcn8_body(x_ref, adj_ref, mask_ref,
                  w1_ref, b1_ref, wres_ref, bres_ref, w8_ref, b8_ref,
                  fcw_ref, fcb_ref, o_ref):
    # x_ref    : [bb, N, F0]  bf16   post-embedding node features
    # adj_ref  : [bb, N, N]   bf16
    # mask_ref : [bb, N, 1]   f32    (or None when the module's mask is None)
    # w1_ref   : [F0, H] bf16   b1_ref: [1, H] f32
    # wres_ref : [R, H, H] bf16 bres_ref: [R, 1, H] f32
    # w8_ref   : [H, 1] bf16    b8_ref: [1, 1] f32
    # fcw_ref  : [N, C] f32     fcb_ref: [1, C] f32
    # o_ref    : [bb, 1, C] f32
    bb = x_ref.shape[0]
    n_res = wres_ref.shape[0]

    adj = adj_ref[...]                                   # [bb, N, N] bf16
    x = x_ref[...]                                       # [bb, N, F0] bf16

    def bcast(w):                                        # tiny bf16 weight -> batch
        return jnp.broadcast_to(w, (bb,) + w.shape)

    def gconv(h_bf16, w_bf16, b_f32):
        # adj @ (h @ W) + b : bf16 MXU operands, f32 accumulation & epilogue.
        s = jnp.einsum('bnf,bfh->bnh', h_bf16, bcast(w_bf16),
                       preferred_element_type=jnp.float32)
        t = jnp.einsum('bij,bjh->bih', adj, s.astype(jnp.bfloat16),
                       preferred_element_type=jnp.float32)
        return t + b_f32                                 # one bias add per layer

    # gc1: relu(adj @ (x @ W1) + b1)
    h = jnp.maximum(gconv(x, w1_ref[...], b1_ref[...]), 0.0)        # [bb, N, H] f32

    # gc2..gc7: residual graph convolutions, relu(adj @ (h @ Wk) + bk + h)
    for k in range(n_res):                       # static unroll, weights VMEM-resident
        h = jnp.maximum(
            gconv(h.astype(jnp.bfloat16), wres_ref[k], bres_ref[k]) + h, 0.0)

    # gc8 (no relu): [bb, N, 1]
    z = gconv(h.astype(jnp.bfloat16), w8_ref[...], b8_ref[...])

    if mask_ref is not None:
        z = z * mask_ref[...]                                        # [bb, N, 1]

    # flatten + fc(N, C) + softmax, all in-VMEM and f32.
    # logits[b, c] = sum_n z[b,n,0] * fcw[n,c]  (broadcast-mul + sublane reduce,
    # no [N,1]->[1,N] transpose, no [bb,N] reshape)
    logits = jnp.sum(z * fcw_ref[...], axis=1, keepdims=True) + fcb_ref[...]  # [bb,1,C]
    m = jnp.max(logits, axis=-1, keepdims=True)
    e = jnp.exp(logits - m)
    denom = jnp.sum(e, axis=-1, keepdims=True)
    o_ref[...] = (e / denom).astype(o_ref.dtype)     # exact reciprocal: C=2, ~free


def _kernel_with_mask(x_ref, adj_ref, mask_ref, *rest):
    _resgcn8_body(x_ref, adj_ref, mask_ref, *rest)


def _kernel_no_mask(x_ref, adj_ref, *rest):
    _resgcn8_body(x_ref, adj_ref, None, *rest)


# ---------------------------------------------------------------------------
# Wrappers
# ---------------------------------------------------------------------------
def _embed_concat(params, element, hcount, charge, aromatic):
    feats = [
        jnp.take(params["em_element"], element, axis=0),
        jnp.take(params["em_hcount"], hcount, axis=0),
        jnp.take(params["em_charge"], charge, axis=0),
    ]
    if aromatic is not None:
        feats.append(jnp.take(params["em_aromatic"], aromatic, axis=0))
    return jnp.concatenate(feats, axis=2).astype(jnp.float32)


def resgcn8_forward(params, element, hcount, charge, adj, aromatic=None,
                    mask=None, *, graphs_per_block=None,
                    vmem_budget_bytes=8 << 20):
    """Fused Pallas forward. gc1 expects 4*64=256 features, so pass `aromatic`."""
    x = _embed_concat(params, element, hcount, charge, aromatic)     # [B, N, F0] f32
    B, N, F0 = x.shape
    H = params["gc1_w"].shape[1]
    R = params["w_res"].shape[0]
    C = params["fc_w"].shape[1]

    # bf16 MXU operands (f32 accumulation inside the kernel).
    x = x.astype(jnp.bfloat16)
    adj = adj.astype(jnp.bfloat16)

    has_mask = mask is not None
    if has_mask:
        mask3 = mask.reshape(B, N, 1).astype(jnp.float32)

    # graphs_per_block selection: prefer >=2 grid steps (pipelined input DMA and
    # v7x 2-TC batch split) while keeping the double-buffered per-step block under
    # a VMEM budget (v7x has only 64 MiB physical VMEM).
    if graphs_per_block is None:
        per_graph = 2 * 2 * (N * F0 + N * N)       # bf16 x + adj, double-buffered
        if has_mask:
            per_graph += 2 * 4 * N                 # f32 mask, double-buffered
        bb = max(1, min(max(B // 2, 1), vmem_budget_bytes // max(per_graph, 1)))
        while B % bb:
            bb -= 1
    else:
        bb = graphs_per_block
    assert B % bb == 0, "batch must be divisible by graphs_per_block"
    grid = (B // bb,)

    # NOTE: if xprof shows exposed input DMA at grid>1, add
    # pipeline_mode=pl.Buffered(3) to the x/adj BlockSpecs below.
    in_specs = [
        pl.BlockSpec((bb, N, F0), lambda i: (i, 0, 0)),   # x
        pl.BlockSpec((bb, N, N), lambda i: (i, 0, 0)),    # adj
    ]
    operands = [x, adj]
    if has_mask:
        in_specs.append(pl.BlockSpec((bb, N, 1), lambda i: (i, 0, 0)))
        operands.append(mask3)
    in_specs += [
        pl.BlockSpec((F0, H), lambda i: (0, 0)),          # gc1_w (bf16)
        pl.BlockSpec((1, H), lambda i: (0, 0)),           # gc1_b (f32)
        pl.BlockSpec((R, H, H), lambda i: (0, 0, 0)),     # w_res stacked (bf16)
        pl.BlockSpec((R, 1, H), lambda i: (0, 0, 0)),     # b_res stacked (f32)
        pl.BlockSpec((H, 1), lambda i: (0, 0)),           # gc8_w (bf16)
        pl.BlockSpec((1, 1), lambda i: (0, 0)),           # gc8_b (f32)
        pl.BlockSpec((N, C), lambda i: (0, 0)),           # fc_w (f32)
        pl.BlockSpec((1, C), lambda i: (0, 0)),           # fc_b (f32)
    ]
    operands += [
        params["gc1_w"].astype(jnp.bfloat16), params["gc1_b"].astype(jnp.float32),
        params["w_res"].astype(jnp.bfloat16), params["b_res"].astype(jnp.float32),
        params["gc8_w"].astype(jnp.bfloat16), params["gc8_b"].astype(jnp.float32),
        params["fc_w"].astype(jnp.float32), params["fc_b"].astype(jnp.float32),
    ]

    kernel = _kernel_with_mask if has_mask else _kernel_no_mask

    out = pl.pallas_call(
        kernel,
        out_shape=jax.ShapeDtypeStruct((B, 1, C), jnp.float32),
        grid_spec=pltpu.PrefetchScalarGridSpec(
            num_scalar_prefetch=0,
            grid=grid,
            in_specs=in_specs,
            out_specs=pl.BlockSpec((bb, 1, C), lambda i: (i, 0, 0)),
        ),
        compiler_params=pltpu.CompilerParams(
            dimension_semantics=("parallel",),
            vmem_limit_bytes=32 << 20),
    )(*operands)
    return out.reshape(B, C)


def resgcn8_reference(params, element, hcount, charge, adj, aromatic=None, mask=None):
    """Pure-JAX f32 reference mirroring the PyTorch forward (eval mode)."""
    x = _embed_concat(params, element, hcount, charge, aromatic)
    B = x.shape[0]
    adj = adj.astype(jnp.float32)

    def gcn(h, w, b):
        s = jnp.einsum("bnf,fh->bnh", h, w)
        return jnp.einsum("bij,bjh->bih", adj, s) + b

    h = jax.nn.relu(gcn(x, params["gc1_w"], params["gc1_b"]))
    for k in range(params["w_res"].shape[0]):
        h = jax.nn.relu(gcn(h, params["w_res"][k], params["b_res"][k]) + h)
    z = gcn(h, params["gc8_w"], params["gc8_b"])      # [B, N, 1]
    xf = z.reshape(B, -1)                             # [B, N]
    if mask is not None:
        xf = xf * mask
    logits = xf @ params["fc_w"] + params["fc_b"]
    return jax.nn.softmax(logits, axis=1)


def resgcn8_reference_bf16(params, element, hcount, charge, adj, aromatic=None,
                           mask=None):
    """Pure-JAX reference with the same bf16-operand / f32-accumulate convention
    as the Pallas kernel (for tight validation of the bf16 kernel path)."""
    x = _embed_concat(params, element, hcount, charge, aromatic).astype(jnp.bfloat16)
    B = x.shape[0]
    adj_bf = adj.astype(jnp.bfloat16)

    def gcn(h, w, b):
        s = jnp.einsum("bnf,fh->bnh", h.astype(jnp.bfloat16), w.astype(jnp.bfloat16),
                       preferred_element_type=jnp.float32)
        t = jnp.einsum("bij,bjh->bih", adj_bf, s.astype(jnp.bfloat16),
                       preferred_element_type=jnp.float32)
        return t + b.astype(jnp.float32)

    h = jax.nn.relu(gcn(x, params["gc1_w"], params["gc1_b"]))
    for k in range(params["w_res"].shape[0]):
        h = jax.nn.relu(gcn(h, params["w_res"][k], params["b_res"][k]) + h)
    z = gcn(h, params["gc8_w"], params["gc8_b"])
    xf = z.reshape(B, -1).astype(jnp.float32)
    if mask is not None:
        xf = xf * mask
    logits = xf @ params["fc_w"] + params["fc_b"]
    return jax.nn.softmax(logits, axis=1)


# ---------------------------------------------------------------------------
# Deterministic parameter construction + demo
# ---------------------------------------------------------------------------
def make_params(key, *, n_nodes=132, emb_dim=64, hidden=16, n_res=6, n_classes=2):
    ks = jax.random.split(key, 12)

    def nrm(k, shape, scale):
        return (scale * jax.random.normal(k, shape)).astype(jnp.float32)

    nfeat = 4 * emb_dim
    return {
        "em_element":  nrm(ks[0], (54, emb_dim), 1.0),
        "em_hcount":   nrm(ks[1], (6, emb_dim), 1.0),
        "em_charge":   nrm(ks[2], (7, emb_dim), 1.0),
        "em_aromatic": nrm(ks[3], (3, emb_dim), 1.0),
        "gc1_w": nrm(ks[4], (nfeat, hidden), 0.05),
        "gc1_b": nrm(ks[5], (1, hidden), 0.05),
        "w_res": nrm(ks[6], (n_res, hidden, hidden), 0.1),   # gc2..gc7 stacked
        "b_res": nrm(ks[7], (n_res, 1, hidden), 0.1),
        "gc8_w": nrm(ks[8], (hidden, 1), 0.1),
        "gc8_b": nrm(ks[9], (1, 1), 0.1),
        "fc_w":  nrm(ks[10], (n_nodes, n_classes), 0.1),     # Linear(132, 2)
        "fc_b":  nrm(ks[11], (1, n_classes), 0.1),
    }


if __name__ == "__main__":
    # Shapes implied by the module: gc8 outputs 1 feature/node and fc=Linear(132,2),
    # so N = 132 nodes per graph; embeddings are 64-d and gc1 takes 4*64=256 features.
    B = 2
    N = 132

    key = jax.random.PRNGKey(0)
    kp, k1, k2, k3, k4, k5, k6 = jax.random.split(key, 7)
    params = make_params(kp)

    element = jax.random.randint(k1, (B, N), 0, 54, dtype=jnp.int32)
    hcount = jax.random.randint(k2, (B, N), 0, 6, dtype=jnp.int32)
    charge = jax.random.randint(k3, (B, N), 0, 7, dtype=jnp.int32)
    aromatic = jax.random.randint(k4, (B, N), 0, 3, dtype=jnp.int32)

    # Simple symmetric, row-normalized adjacency (deterministic demo data).
    a = jax.random.uniform(k5, (B, N, N), dtype=jnp.float32)
    adj = (a + jnp.swapaxes(a, 1, 2)) * 0.5
    adj = adj / jnp.sum(adj, axis=2, keepdims=True)

    # --- mask-free path (specialized kernel variant) ---
    out = resgcn8_forward(params, element, hcount, charge, adj,
                          aromatic=aromatic, mask=None)
    out = jax.block_until_ready(out)

    ref32 = resgcn8_reference(params, element, hcount, charge, adj,
                              aromatic=aromatic, mask=None)
    refbf = resgcn8_reference_bf16(params, element, hcount, charge, adj,
                                   aromatic=aromatic, mask=None)

    assert out.shape == (B, 2)
    assert bool(jnp.all(jnp.isfinite(out)))
    # exact-reciprocal softmax: rows sum to 1
    assert bool(jnp.allclose(jnp.sum(out, axis=1), 1.0, atol=1e-5))
    # tight vs the bf16-operand / f32-accumulate reference (kernel math)
    assert bool(jnp.allclose(out, refbf, atol=2e-2, rtol=2e-2))
    # loose vs the full-f32 PyTorch-equivalent reference (bf16 rounding budget)
    assert bool(jnp.allclose(out, ref32, atol=6e-2, rtol=6e-2))

    # --- masked path (separate specialized kernel variant) ---
    mask = jax.random.bernoulli(k6, 0.9, (B, N)).astype(jnp.float32)
    out_m = jax.block_until_ready(
        resgcn8_forward(params, element, hcount, charge, adj,
                        aromatic=aromatic, mask=mask))
    ref_m = resgcn8_reference(params, element, hcount, charge, adj,
                              aromatic=aromatic, mask=mask)
    assert out_m.shape == (B, 2)
    assert bool(jnp.allclose(jnp.sum(out_m, axis=1), 1.0, atol=1e-5))
    assert bool(jnp.allclose(out_m, ref_m, atol=6e-2, rtol=6e-2))

    print("KERNEL_OK")
</pallas_src>

<mosaic_0001>
module attributes {stable_mosaic.version = 11 : i64} {
  func.func @_kernel_no_mask(%arg0: i32, %arg1: memref<1x132x256xbf16, #tpu.memory_space<vmem>>, %arg2: memref<1x132x132xbf16, #tpu.memory_space<vmem>>, %arg3: memref<256x16xbf16, #tpu.memory_space<vmem>>, %arg4: memref<1x16xf32, #tpu.memory_space<vmem>>, %arg5: memref<6x16x16xbf16, #tpu.memory_space<vmem>>, %arg6: memref<6x1x16xf32, #tpu.memory_space<vmem>>, %arg7: memref<16x1xbf16, #tpu.memory_space<vmem>>, %arg8: memref<1x1xf32, #tpu.memory_space<vmem>>, %arg9: memref<132x2xf32, #tpu.memory_space<vmem>>, %arg10: memref<1x2xf32, #tpu.memory_space<vmem>>, %arg11: memref<1x1x2xf32, #tpu.memory_space<vmem>>) attributes {dimension_semantics = [#tpu.dimension_semantics<parallel>], iteration_bounds = array<i64: 2>, scalar_prefetch = 0 : i64, scratch_operands = 0 : i64, tpu.core_type = #tpu.core_type<tc>, window_params = [{transform_indices = @transform_0, window_bounds = array<i64: 1, 132, 256>}, {transform_indices = @transform_1, window_bounds = array<i64: 1, 132, 132>}, {pipeline_mode = #tpu.pipeline_mode<synchronous>, transform_indices = @transform_2, window_bounds = array<i64: 256, 16>}, {pipeline_mode = #tpu.pipeline_mode<synchronous>, transform_indices = @transform_3, window_bounds = array<i64: 1, 16>}, {pipeline_mode = #tpu.pipeline_mode<synchronous>, transform_indices = @transform_4, window_bounds = array<i64: 6, 16, 16>}, {pipeline_mode = #tpu.pipeline_mode<synchronous>, transform_indices = @transform_5, window_bounds = array<i64: 6, 1, 16>}, {pipeline_mode = #tpu.pipeline_mode<synchronous>, transform_indices = @transform_6, window_bounds = array<i64: 16, 1>}, {pipeline_mode = #tpu.pipeline_mode<synchronous>, transform_indices = @transform_7, window_bounds = array<i64: 1, 1>}, {pipeline_mode = #tpu.pipeline_mode<synchronous>, transform_indices = @transform_8, window_bounds = array<i64: 132, 2>}, {pipeline_mode = #tpu.pipeline_mode<synchronous>, transform_indices = @transform_9, window_bounds = array<i64: 1, 2>}, {transform_indices = @transform_10, window_bounds = array<i64: 1, 1, 2>}]} {
    %c0 = arith.constant 0 : index
    %c0_0 = arith.constant 0 : index
    %c0_1 = arith.constant 0 : index
    %0 = vector.load %arg2[%c0, %c0_0, %c0_1] : memref<1x132x132xbf16, #tpu.memory_space<vmem>>, vector<1x132x132xbf16>
    %c0_2 = arith.constant 0 : index
    %c0_3 = arith.constant 0 : index
    %c0_4 = arith.constant 0 : index
    %1 = vector.load %arg1[%c0_2, %c0_3, %c0_4] : memref<1x132x256xbf16, #tpu.memory_space<vmem>>, vector<1x132x256xbf16>
    %c0_5 = arith.constant 0 : index
    %c0_6 = arith.constant 0 : index
    %2 = vector.load %arg3[%c0_5, %c0_6] : memref<256x16xbf16, #tpu.memory_space<vmem>>, vector<256x16xbf16>
    %c0_7 = arith.constant 0 : index
    %c0_8 = arith.constant 0 : index
    %3 = vector.load %arg4[%c0_7, %c0_8] : memref<1x16xf32, #tpu.memory_space<vmem>>, vector<1x16xf32>
    %4 = vector.shape_cast %2 : vector<256x16xbf16> to vector<1x256x16xbf16>
    "tpu.trace_start"() <{level = 10 : i32, message = "bnf,bfh->bnh"}> : () -> ()
    %cst = arith.constant dense<0.000000e+00> : vector<1x132x16xf32>
    %5 = tpu.matmul %1, %4, %cst {dimension_numbers = #tpu.dot_dimension_numbers<[2], [1], [1], [2], [0, 0, 0, 1, 1, 2], [0], [0]>} : vector<1x132x256xbf16>, vector<1x256x16xbf16>, vector<1x132x16xf32> -> vector<1x132x16xf32>
    "tpu.trace_stop"() : () -> ()
    %6 = arith.truncf %5 : vector<1x132x16xf32> to vector<1x132x16xbf16>
    "tpu.trace_start"() <{level = 10 : i32, message = "bij,bjh->bih"}> : () -> ()
    %cst_9 = arith.constant dense<0.000000e+00> : vector<1x132x16xf32>
    %7 = tpu.matmul %0, %6, %cst_9 {dimension_numbers = #tpu.dot_dimension_numbers<[2], [1], [1], [2], [0, 0, 0, 1, 1, 2], [0], [0]>} : vector<1x132x132xbf16>, vector<1x132x16xbf16>, vector<1x132x16xf32> -> vector<1x132x16xf32>
    "tpu.trace_stop"() : () -> ()
    %8 = vector.shape_cast %3 : vector<1x16xf32> to vector<1x1x16xf32>
    %9 = vector.broadcast %8 : vector<1x1x16xf32> to vector<1x132x16xf32>
    %10 = arith.addf %7, %9 : vector<1x132x16xf32>
    %cst_10 = arith.constant 0.000000e+00 : f32
    %11 = vector.broadcast %cst_10 : f32 to vector<1x132x16xf32>
    %12 = arith.maximumf %10, %11 : vector<1x132x16xf32>
    %13 = arith.truncf %12 : vector<1x132x16xf32> to vector<1x132x16xbf16>
    %c0_11 = arith.constant 0 : index
    %c0_12 = arith.constant 0 : index
    %c0_13 = arith.constant 0 : index
    %14 = vector.load %arg5[%c0_11, %c0_12, %c0_13] : memref<6x16x16xbf16, #tpu.memory_space<vmem>>, vector<1x16x16xbf16>
    %15 = vector.shape_cast %14 : vector<1x16x16xbf16> to vector<16x16xbf16>
    %c0_14 = arith.constant 0 : index
    %c0_15 = arith.constant 0 : index
    %c0_16 = arith.constant 0 : index
    %16 = vector.load %arg6[%c0_14, %c0_15, %c0_16] : memref<6x1x16xf32, #tpu.memory_space<vmem>>, vector<1x1x16xf32>
    %17 = vector.shape_cast %16 : vector<1x1x16xf32> to vector<1x16xf32>
    %18 = vector.shape_cast %15 : vector<16x16xbf16> to vector<1x16x16xbf16>
    "tpu.trace_start"() <{level = 10 : i32, message = "bnf,bfh->bnh"}> : () -> ()
    %cst_17 = arith.constant dense<0.000000e+00> : vector<1x132x16xf32>
    %19 = tpu.matmul %13, %18, %cst_17 {dimension_numbers = #tpu.dot_dimension_numbers<[2], [1], [1], [2], [0, 0, 0, 1, 1, 2], [0], [0]>} : vector<1x132x16xbf16>, vector<1x16x16xbf16>, vector<1x132x16xf32> -> vector<1x132x16xf32>
    "tpu.trace_stop"() : () -> ()
    %20 = arith.truncf %19 : vector<1x132x16xf32> to vector<1x132x16xbf16>
    "tpu.trace_start"() <{level = 10 : i32, message = "bij,bjh->bih"}> : () -> ()
    %cst_18 = arith.constant dense<0.000000e+00> : vector<1x132x16xf32>
    %21 = tpu.matmul %0, %20, %cst_18 {dimension_numbers = #tpu.dot_dimension_numbers<[2], [1], [1], [2], [0, 0, 0, 1, 1, 2], [0], [0]>} : vector<1x132x132xbf16>, vector<1x132x16xbf16>, vector<1x132x16xf32> -> vector<1x132x16xf32>
    "tpu.trace_stop"() : () -> ()
    %22 = vector.shape_cast %17 : vector<1x16xf32> to vector<1x1x16xf32>
    %23 = vector.broadcast %22 : vector<1x1x16xf32> to vector<1x132x16xf32>
    %24 = arith.addf %21, %23 : vector<1x132x16xf32>
    %25 = arith.addf %24, %12 : vector<1x132x16xf32>
    %cst_19 = arith.constant 0.000000e+00 : f32
    %26 = vector.broadcast %cst_19 : f32 to vector<1x132x16xf32>
    %27 = arith.maximumf %25, %26 : vector<1x132x16xf32>
    %28 = arith.truncf %27 : vector<1x132x16xf32> to vector<1x132x16xbf16>
    %c1 = arith.constant 1 : index
    %c0_20 = arith.constant 0 : index
    %c0_21 = arith.constant 0 : index
    %29 = vector.load %arg5[%c1, %c0_20, %c0_21] : memref<6x16x16xbf16, #tpu.memory_space<vmem>>, vector<1x16x16xbf16>
    %30 = vector.shape_cast %29 : vector<1x16x16xbf16> to vector<16x16xbf16>
    %c1_22 = arith.constant 1 : index
    %c0_23 = arith.constant 0 : index
    %c0_24 = arith.constant 0 : index
    %31 = vector.load %arg6[%c1_22, %c0_23, %c0_24] : memref<6x1x16xf32, #tpu.memory_space<vmem>>, vector<1x1x16xf32>
    %32 = vector.shape_cast %31 : vector<1x1x16xf32> to vector<1x16xf32>
    %33 = vector.shape_cast %30 : vector<16x16xbf16> to vector<1x16x16xbf16>
    "tpu.trace_start"() <{level = 10 : i32, message = "bnf,bfh->bnh"}> : () -> ()
    %cst_25 = arith.constant dense<0.000000e+00> : vector<1x132x16xf32>
    %34 = tpu.matmul %28, %33, %cst_25 {dimension_numbers = #tpu.dot_dimension_numbers<[2], [1], [1], [2], [0, 0, 0, 1, 1, 2], [0], [0]>} : vector<1x132x16xbf16>, vector<1x16x16xbf16>, vector<1x132x16xf32> -> vector<1x132x16xf32>
    "tpu.trace_stop"() : () -> ()
    %35 = arith.truncf %34 : vector<1x132x16xf32> to vector<1x132x16xbf16>
    "tpu.trace_start"() <{level = 10 : i32, message = "bij,bjh->bih"}> : () -> ()
    %cst_26 = arith.constant dense<0.000000e+00> : vector<1x132x16xf32>
    %36 = tpu.matmul %0, %35, %cst_26 {dimension_numbers = #tpu.dot_dimension_numbers<[2], [1], [1], [2], [0, 0, 0, 1, 1, 2], [0], [0]>} : vector<1x132x132xbf16>, vector<1x132x16xbf16>, vector<1x132x16xf32> -> vector<1x132x16xf32>
    "tpu.trace_stop"() : () -> ()
    %37 = vector.shape_cast %32 : vector<1x16xf32> to vector<1x1x16xf32>
    %38 = vector.broadcast %37 : vector<1x1x16xf32> to vector<1x132x16xf32>
    %39 = arith.addf %36, %38 : vector<1x132x16xf32>
    %40 = arith.addf %39, %27 : vector<1x132x16xf32>
    %cst_27 = arith.constant 0.000000e+00 : f32
    %41 = vector.broadcast %cst_27 : f32 to vector<1x132x16xf32>
    %42 = arith.maximumf %40, %41 : vector<1x132x16xf32>
    %43 = arith.truncf %42 : vector<1x132x16xf32> to vector<1x132x16xbf16>
    %c2 = arith.constant 2 : index
    %c0_28 = arith.constant 0 : index
    %c0_29 = arith.constant 0 : index
    %44 = vector.load %arg5[%c2, %c0_28, %c0_29] : memref<6x16x16xbf16, #tpu.memory_space<vmem>>, vector<1x16x16xbf16>
    %45 = vector.shape_cast %44 : vector<1x16x16xbf16> to vector<16x16xbf16>
    %c2_30 = arith.constant 2 : index
    %c0_31 = arith.constant 0 : index
    %c0_32 = arith.constant 0 : index
    %46 = vector.load %arg6[%c2_30, %c0_31, %c0_32] : memref<6x1x16xf32, #tpu.memory_space<vmem>>, vector<1x1x16xf32>
    %47 = vector.shape_cast %46 : vector<1x1x16xf32> to vector<1x16xf32>
    %48 = vector.shape_cast %45 : vector<16x16xbf16> to vector<1x16x16xbf16>
    "tpu.trace_start"() <{level = 10 : i32, message = "bnf,bfh->bnh"}> : () -> ()
    %cst_33 = arith.constant dense<0.000000e+00> : vector<1x132x16xf32>
    %49 = tpu.matmul %43, %48, %cst_33 {dimension_numbers = #tpu.dot_dimension_numbers<[2], [1], [1], [2], [0, 0, 0, 1, 1, 2], [0], [0]>} : vector<1x132x16xbf16>, vector<1x16x16xbf16>, vector<1x132x16xf32> -> vector<1x132x16xf32>
    "tpu.trace_stop"() : () -> ()
    %50 = arith.truncf %49 : vector<1x132x16xf32> to vector<1x132x16xbf16>
    "tpu.trace_start"() <{level = 10 : i32, message = "bij,bjh->bih"}> : () -> ()
    %cst_34 = arith.constant dense<0.000000e+00> : vector<1x132x16xf32>
    %51 = tpu.matmul %0, %50, %cst_34 {dimension_numbers = #tpu.dot_dimension_numbers<[2], [1], [1], [2], [0, 0, 0, 1, 1, 2], [0], [0]>} : vector<1x132x132xbf16>, vector<1x132x16xbf16>, vector<1x132x16xf32> -> vector<1x132x16xf32>
    "tpu.trace_stop"() : () -> ()
    %52 = vector.shape_cast %47 : vector<1x16xf32> to vector<1x1x16xf32>
    %53 = vector.broadcast %52 : vector<1x1x16xf32> to vector<1x132x16xf32>
    %54 = arith.addf %51, %53 : vector<1x132x16xf32>
    %55 = arith.addf %54, %42 : vector<1x132x16xf32>
    %cst_35 = arith.constant 0.000000e+00 : f32
    %56 = vector.broadcast %cst_35 : f32 to vector<1x132x16xf32>
    %57 = arith.maximumf %55, %56 : vector<1x132x16xf32>
    %58 = arith.truncf %57 : vector<1x132x16xf32> to vector<1x132x16xbf16>
    %c3 = arith.constant 3 : index
    %c0_36 = arith.constant 0 : index
    %c0_37 = arith.constant 0 : index
    %59 = vector.load %arg5[%c3, %c0_36, %c0_37] : memref<6x16x16xbf16, #tpu.memory_space<vmem>>, vector<1x16x16xbf16>
    %60 = vector.shape_cast %59 : vector<1x16x16xbf16> to vector<16x16xbf16>
    %c3_38 = arith.constant 3 : index
    %c0_39 = arith.constant 0 : index
    %c0_40 = arith.constant 0 : index
    %61 = vector.load %arg6[%c3_38, %c0_39, %c0_40] : memref<6x1x16xf32, #tpu.memory_space<vmem>>, vector<1x1x16xf32>
    %62 = vector.shape_cast %61 : vector<1x1x16xf32> to vector<1x16xf32>
    %63 = vector.shape_cast %60 : vector<16x16xbf16> to vector<1x16x16xbf16>
    "tpu.trace_start"() <{level = 10 : i32, message = "bnf,bfh->bnh"}> : () -> ()
    %cst_41 = arith.constant dense<0.000000e+00> : vector<1x132x16xf32>
    %64 = tpu.matmul %58, %63, %cst_41 {dimension_numbers = #tpu.dot_dimension_numbers<[2], [1], [1], [2], [0, 0, 0, 1, 1, 2], [0], [0]>} : vector<1x132x16xbf16>, vector<1x16x16xbf16>, vector<1x132x16xf32> -> vector<1x132x16xf32>
    "tpu.trace_stop"() : () -> ()
    %65 = arith.truncf %64 : vector<1x132x16xf32> to vector<1x132x16xbf16>
    "tpu.trace_start"() <{level = 10 : i32, message = "bij,bjh->bih"}> : () -> ()
    %cst_42 = arith.constant dense<0.000000e+00> : vector<1x132x16xf32>
    %66 = tpu.matmul %0, %65, %cst_42 {dimension_numbers = #tpu.dot_dimension_numbers<[2], [1], [1], [2], [0, 0, 0, 1, 1, 2], [0], [0]>} : vector<1x132x132xbf16>, vector<1x132x16xbf16>, vector<1x132x16xf32> -> vector<1x132x16xf32>
    "tpu.trace_stop"() : () -> ()
    %67 = vector.shape_cast %62 : vector<1x16xf32> to vector<1x1x16xf32>
    %68 = vector.broadcast %67 : vector<1x1x16xf32> to vector<1x132x16xf32>
    %69 = arith.addf %66, %68 : vector<1x132x16xf32>
    %70 = arith.addf %69, %57 : vector<1x132x16xf32>
    %cst_43 = arith.constant 0.000000e+00 : f32
    %71 = vector.broadcast %cst_43 : f32 to vector<1x132x16xf32>
    %72 = arith.maximumf %70, %71 : vector<1x132x16xf32>
    %73 = arith.truncf %72 : vector<1x132x16xf32> to vector<1x132x16xbf16>
    %c4 = arith.constant 4 : index
    %c0_44 = arith.constant 0 : index
    %c0_45 = arith.constant 0 : index
    %74 = vector.load %arg5[%c4, %c0_44, %c0_45] : memref<6x16x16xbf16, #tpu.memory_space<vmem>>, vector<1x16x16xbf16>
    %75 = vector.shape_cast %74 : vector<1x16x16xbf16> to vector<16x16xbf16>
    %c4_46 = arith.constant 4 : index
    %c0_47 = arith.constant 0 : index
    %c0_48 = arith.constant 0 : index
    %76 = vector.load %arg6[%c4_46, %c0_47, %c0_48] : memref<6x1x16xf32, #tpu.memory_space<vmem>>, vector<1x1x16xf32>
    %77 = vector.shape_cast %76 : vector<1x1x16xf32> to vector<1x16xf32>
    %78 = vector.shape_cast %75 : vector<16x16xbf16> to vector<1x16x16xbf16>
    "tpu.trace_start"() <{level = 10 : i32, message = "bnf,bfh->bnh"}> : () -> ()
    %cst_49 = arith.constant dense<0.000000e+00> : vector<1x132x16xf32>
    %79 = tpu.matmul %73, %78, %cst_49 {dimension_numbers = #tpu.dot_dimension_numbers<[2], [1], [1], [2], [0, 0, 0, 1, 1, 2], [0], [0]>} : vector<1x132x16xbf16>, vector<1x16x16xbf16>, vector<1x132x16xf32> -> vector<1x132x16xf32>
    "tpu.trace_stop"() : () -> ()
    %80 = arith.truncf %79 : vector<1x132x16xf32> to vector<1x132x16xbf16>
    "tpu.trace_start"() <{level = 10 : i32, message = "bij,bjh->bih"}> : () -> ()
    %cst_50 = arith.constant dense<0.000000e+00> : vector<1x132x16xf32>
    %81 = tpu.matmul %0, %80, %cst_50 {dimension_numbers = #tpu.dot_dimension_numbers<[2], [1], [1], [2], [0, 0, 0, 1, 1, 2], [0], [0]>} : vector<1x132x132xbf16>, vector<1x132x16xbf16>, vector<1x132x16xf32> -> vector<1x132x16xf32>
    "tpu.trace_stop"() : () -> ()
    %82 = vector.shape_cast %77 : vector<1x16xf32> to vector<1x1x16xf32>
    %83 = vector.broadcast %82 : vector<1x1x16xf32> to vector<1x132x16xf32>
    %84 = arith.addf %81, %83 : vector<1x132x16xf32>
    %85 = arith.addf %84, %72 : vector<1x132x16xf32>
    %cst_51 = arith.constant 0.000000e+00 : f32
    %86 = vector.broadcast %cst_51 : f32 to vector<1x132x16xf32>
    %87 = arith.maximumf %85, %86 : vector<1x132x16xf32>
    %88 = arith.truncf %87 : vector<1x132x16xf32> to vector<1x132x16xbf16>
    %c5 = arith.constant 5 : index
    %c0_52 = arith.constant 0 : index
    %c0_53 = arith.constant 0 : index
    %89 = vector.load %arg5[%c5, %c0_52, %c0_53] : memref<6x16x16xbf16, #tpu.memory_space<vmem>>, vector<1x16x16xbf16>
    %90 = vector.shape_cast %89 : vector<1x16x16xbf16> to vector<16x16xbf16>
    %c5_54 = arith.constant 5 : index
    %c0_55 = arith.constant 0 : index
    %c0_56 = arith.constant 0 : index
    %91 = vector.load %arg6[%c5_54, %c0_55, %c0_56] : memref<6x1x16xf32, #tpu.memory_space<vmem>>, vector<1x1x16xf32>
    %92 = vector.shape_cast %91 : vector<1x1x16xf32> to vector<1x16xf32>
    %93 = vector.shape_cast %90 : vector<16x16xbf16> to vector<1x16x16xbf16>
    "tpu.trace_start"() <{level = 10 : i32, message = "bnf,bfh->bnh"}> : () -> ()
    %cst_57 = arith.constant dense<0.000000e+00> : vector<1x132x16xf32>
    %94 = tpu.matmul %88, %93, %cst_57 {dimension_numbers = #tpu.dot_dimension_numbers<[2], [1], [1], [2], [0, 0, 0, 1, 1, 2], [0], [0]>} : vector<1x132x16xbf16>, vector<1x16x16xbf16>, vector<1x132x16xf32> -> vector<1x132x16xf32>
    "tpu.trace_stop"() : () -> ()
    %95 = arith.truncf %94 : vector<1x132x16xf32> to vector<1x132x16xbf16>
    "tpu.trace_start"() <{level = 10 : i32, message = "bij,bjh->bih"}> : () -> ()
    %cst_58 = arith.constant dense<0.000000e+00> : vector<1x132x16xf32>
    %96 = tpu.matmul %0, %95, %cst_58 {dimension_numbers = #tpu.dot_dimension_numbers<[2], [1], [1], [2], [0, 0, 0, 1, 1, 2], [0], [0]>} : vector<1x132x132xbf16>, vector<1x132x16xbf16>, vector<1x132x16xf32> -> vector<1x132x16xf32>
    "tpu.trace_stop"() : () -> ()
    %97 = vector.shape_cast %92 : vector<1x16xf32> to vector<1x1x16xf32>
    %98 = vector.broadcast %97 : vector<1x1x16xf32> to vector<1x132x16xf32>
    %99 = arith.addf %96, %98 : vector<1x132x16xf32>
    %100 = arith.addf %99, %87 : vector<1x132x16xf32>
    %cst_59 = arith.constant 0.000000e+00 : f32
    %101 = vector.broadcast %cst_59 : f32 to vector<1x132x16xf32>
    %102 = arith.maximumf %100, %101 : vector<1x132x16xf32>
    %103 = arith.truncf %102 : vector<1x132x16xf32> to vector<1x132x16xbf16>
    %c0_60 = arith.constant 0 : index
    %c0_61 = arith.constant 0 : index
    %104 = vector.load %arg7[%c0_60, %c0_61] : memref<16x1xbf16, #tpu.memory_space<vmem>>, vector<16x1xbf16>
    %c0_62 = arith.constant 0 : index
    %c0_63 = arith.constant 0 : index
    %105 = vector.load %arg8[%c0_62, %c0_63] : memref<1x1xf32, #tpu.memory_space<vmem>>, vector<1x1xf32>
    %106 = vector.shape_cast %104 : vector<16x1xbf16> to vector<1x16x1xbf16>
    "tpu.trace_start"() <{level = 10 : i32, message = "bnf,bfh->bnh"}> : () -> ()
    %cst_64 = arith.constant dense<0.000000e+00> : vector<1x132x1xf32>
    %107 = tpu.matmul %103, %106, %cst_64 {dimension_numbers = #tpu.dot_dimension_numbers<[2], [1], [1], [2], [0, 0, 0, 1, 1, 2], [0], [0]>} : vector<1x132x16xbf16>, vector<1x16x1xbf16>, vector<1x132x1xf32> -> vector<1x132x1xf32>
    "tpu.trace_stop"() : () -> ()
    %108 = arith.truncf %107 : vector<1x132x1xf32> to vector<1x132x1xbf16>
    "tpu.trace_start"() <{level = 10 : i32, message = "bij,bjh->bih"}> : () -> ()
    %cst_65 = arith.constant dense<0.000000e+00> : vector<1x132x1xf32>
    %109 = tpu.matmul %0, %108, %cst_65 {dimension_numbers = #tpu.dot_dimension_numbers<[2], [1], [1], [2], [0, 0, 0, 1, 1, 2], [0], [0]>} : vector<1x132x132xbf16>, vector<1x132x1xbf16>, vector<1x132x1xf32> -> vector<1x132x1xf32>
    "tpu.trace_stop"() : () -> ()
    %110 = vector.shape_cast %105 : vector<1x1xf32> to vector<1x1x1xf32>
    %111 = vector.broadcast %110 : vector<1x1x1xf32> to vector<1x132x1xf32>
    %112 = arith.addf %109, %111 : vector<1x132x1xf32>
    %c0_66 = arith.constant 0 : index
    %c0_67 = arith.constant 0 : index
    %113 = vector.load %arg9[%c0_66, %c0_67] : memref<132x2xf32, #tpu.memory_space<vmem>>, vector<132x2xf32>
    %114 = vector.shape_cast %113 : vector<132x2xf32> to vector<1x132x2xf32>
    %115 = vector.broadcast %112 : vector<1x132x1xf32> to vector<1x132x2xf32>
    %116 = arith.mulf %115, %114 : vector<1x132x2xf32>
    %cst_68 = arith.constant dense<0.000000e+00> : vector<1x2xf32>
    %117 = vector.multi_reduction <add>, %116, %cst_68 [1] : vector<1x132x2xf32> to vector<1x2xf32>
    %118 = vector.shape_cast %117 : vector<1x2xf32> to vector<1x1x2xf32>
    %c0_69 = arith.constant 0 : index
    %c0_70 = arith.constant 0 : index
    %119 = vector.load %arg10[%c0_69, %c0_70] : memref<1x2xf32, #tpu.memory_space<vmem>>, vector<1x2xf32>
    %120 = vector.shape_cast %119 : vector<1x2xf32> to vector<1x1x2xf32>
    %121 = arith.addf %118, %120 : vector<1x1x2xf32>
    %cst_71 = arith.constant dense<0xFF800000> : vector<1x1xf32>
    %122 = vector.multi_reduction <maximumf>, %121, %cst_71 [2] : vector<1x1x2xf32> to vector<1x1xf32>
    %123 = vector.shape_cast %122 : vector<1x1xf32> to vector<1x1x1xf32>
    %124 = vector.broadcast %123 : vector<1x1x1xf32> to vector<1x1x2xf32>
    %125 = arith.subf %121, %124 : vector<1x1x2xf32>
    %126 = math.exp %125 : vector<1x1x2xf32>
    %cst_72 = arith.constant dense<0.000000e+00> : vector<1x1xf32>
    %127 = vector.multi_reduction <add>, %126, %cst_72 [2] : vector<1x1x2xf32> to vector<1x1xf32>
    %128 = vector.shape_cast %127 : vector<1x1xf32> to vector<1x1x1xf32>
    %129 = vector.broadcast %128 : vector<1x1x1xf32> to vector<1x1x2xf32>
    %130 = arith.divf %126, %129 : vector<1x1x2xf32>
    %c0_73 = arith.constant 0 : index
    %c0_74 = arith.constant 0 : index
    %c0_75 = arith.constant 0 : index
    %131 = vector.load %arg11[%c0_73, %c0_74, %c0_75] : memref<1x1x2xf32, #tpu.memory_space<vmem>>, vector<1x1x2xf32>
    tpu.vector_store %arg11[%c0_73, %c0_74, %c0_75], %130 {strides = array<i32>} : memref<1x1x2xf32, #tpu.memory_space<vmem>>, vector<1x1x2xf32>,
    return
  }
  func.func @transform_0(%arg0: i32) -> (i32, i32, i32) {
    %c0_i32 = arith.constant 0 : i32
    %c0_i32_0 = arith.constant 0 : i32
    %c0_i32_1 = arith.constant 0 : i32
    return %arg0, %c0_i32, %c0_i32_0 : i32, i32, i32
  }
  func.func @transform_1(%arg0: i32) -> (i32, i32, i32) {
    %c0_i32 = arith.constant 0 : i32
    %c0_i32_0 = arith.constant 0 : i32
    %c0_i32_1 = arith.constant 0 : i32
    return %arg0, %c0_i32, %c0_i32_0 : i32, i32, i32
  }
  func.func @transform_2(%arg0: i32) -> (i32, i32) {
    %c0_i32 = arith.constant 0 : i32
    %c0_i32_0 = arith.constant 0 : i32
    %c0_i32_1 = arith.constant 0 : i32
    return %c0_i32, %c0_i32_0 : i32, i32
  }
  func.func @transform_3(%arg0: i32) -> (i32, i32) {
    %c0_i32 = arith.constant 0 : i32
    %c0_i32_0 = arith.constant 0 : i32
    %c0_i32_1 = arith.constant 0 : i32
    return %c0_i32, %c0_i32_0 : i32, i32
  }
  func.func @transform_4(%arg0: i32) -> (i32, i32, i32) {
    %c0_i32 = arith.constant 0 : i32
    %c0_i32_0 = arith.constant 0 : i32
    %c0_i32_1 = arith.constant 0 : i32
    %c0_i32_2 = arith.constant 0 : i32
    return %c0_i32, %c0_i32_0, %c0_i32_1 : i32, i32, i32
  }
  func.func @transform_5(%arg0: i32) -> (i32, i32, i32) {
    %c0_i32 = arith.constant 0 : i32
    %c0_i32_0 = arith.constant 0 : i32
    %c0_i32_1 = arith.constant 0 : i32
    %c0_i32_2 = arith.constant 0 : i32
    return %c0_i32, %c0_i32_0, %c0_i32_1 : i32, i32, i32
  }
  func.func @transform_6(%arg0: i32) -> (i32, i32) {
    %c0_i32 = arith.constant 0 : i32
    %c0_i32_0 = arith.constant 0 : i32
    %c0_i32_1 = arith.constant 0 : i32
    return %c0_i32, %c0_i32_0 : i32, i32
  }
  func.func @transform_7(%arg0: i32) -> (i32, i32) {
    %c0_i32 = arith.constant 0 : i32
    %c0_i32_0 = arith.constant 0 : i32
    %c0_i32_1 = arith.constant 0 : i32
    return %c0_i32, %c0_i32_0 : i32, i32
  }
  func.func @transform_8(%arg0: i32) -> (i32, i32) {
    %c0_i32 = arith.constant 0 : i32
    %c0_i32_0 = arith.constant 0 : i32
    %c0_i32_1 = arith.constant 0 : i32
    return %c0_i32, %c0_i32_0 : i32, i32
  }
  func.func @transform_9(%arg0: i32) -> (i32, i32) {
    %c0_i32 = arith.constant 0 : i32
    %c0_i32_0 = arith.constant 0 : i32
    %c0_i32_1 = arith.constant 0 : i32
    return %c0_i32, %c0_i32_0 : i32, i32
  }
  func.func @transform_10(%arg0: i32) -> (i32, i32, i32) {
    %c0_i32 = arith.constant 0 : i32
    %c0_i32_0 = arith.constant 0 : i32
    %c0_i32_1 = arith.constant 0 : i32
    return %arg0, %c0_i32, %c0_i32_0 : i32, i32, i32
  }
}

</mosaic_0001>

<bundles_post_ra>
// kernel: tpu_custom_call.1
= control target key start
LH: loop header
LB: loop body
LE: loop exit
PB: predicated region body
PF: predicated region fallthrough
CT: control target
= control target key end

     0   :  { %s6042_s0 = inlined_call_operand.vmem [shape: bf16[2,132,256], index: 0, kind: input, shape index: {}]   ;;  %s6043_s1 = inlined_call_operand.vmem [shape: bf16[2,132,132], index: 1, kind: input, shape index: {}]   ;;  %s6044_s2 = inlined_call_operand.vmem [shape: bf16[256,16], index: 2, kind: input, shape index: {}]   ;;  %s6045_s3 = inlined_call_operand.vmem [shape: f32[1,16], index: 3, kind: input, shape index: {}]   ;;  %s6046_s4 = inlined_call_operand.vmem [shape: bf16[6,16,16], index: 4, kind: input, shape index: {}]   ;;  %s6047_s5 = inlined_call_operand.vmem [shape: f32[6,1,16], index: 5, kind: input, shape index: {}]   ;;  %s6048_s6 = inlined_call_operand.vmem [shape: bf16[16,1], index: 6, kind: input, shape index: {}]   ;;  %s6049_s7 = inlined_call_operand.<no memory space> [shape: f32[1,1], index: 7, kind: input, shape index: {}]   ;;  %s6050_s8 = inlined_call_operand.vmem [shape: f32[132,2], index: 8, kind: input, shape index: {}]   ;;  %s6051_s9 = inlined_call_operand.vmem [shape: f32[1,2], index: 9, kind: input, shape index: {}]   ;;  %s6052_s10 = inlined_call_operand.hbm [shape: f32[2,1,2], index: 10, kind: output, shape index: {}]  }
   0x1   :  { %v15_v0 = vstv %s6049_s7 }
   0x2   :  { %16 = vst [vmem:[#allocation2] sm:$0x1] %v15_v0 }
   0x3   :  { %17 = vsyncpa [#allocation4], 0 }
   0x4   :  { %19 = vsyncpa [#allocation4 + $0x1], 0  ;;  %s4261_s15 = smov 0   ;;  %s4263_s16 = smov 0  }
   0x5   :  { %s4265_s17 = smov 0   ;;  %s4267_s18 = smov 0  }
   0x6 LB: > { %s4282_s7 = sadd.s32 4294967295, %s4197_s18   ;;  %s3347_s19 = sadd.s32 4294967294, %s4197_s18   ;;  %s4197_s18 = sphi %s4267_s18, %s6101_s18   ;;  %s4193_s17 = sphi %s4265_s17, %s6100_s17   ;;  %s4189_s16 = sphi %s4263_s16, %s6099_s16   ;;  %s4185_s15 = sphi %s4261_s15, %s6098_s15  }
   0x7   : > { %s4286_s20 = sadd.s32 1, %s4197_s18   ;;  %s252_s21 = sadd.s32 1, %s4193_s17 }
   0x8   : > { %s249_s22 = ssub.s32 %s4197_s18, %s4286_s20  ;;  %p262_p0 = scmp.ne.s32.totalorder %s4193_s17, %s4189_s16 }
   0x9   : > { %p250_p1 = scmp.eq.s32.totalorder %s249_s22, 0  ;;  %p263_p2 = scmp.eq.s32.totalorder %s4282_s7, 1 }
   0xa   : > { %p268_p3 = scmp.ne.s32.totalorder %s4189_s16, %s4185_s15  ;;  %p269_p4 = scmp.eq.s32.totalorder %s3347_s19, 1 }
   0xb   : > { %s4297_s23 = scalar_select %p250_p1, %s4193_s17, %s252_s21  }
   0xc   : > { %p4299_p5 = por %p263_p2, %p262_p0  ;;  %p4303_p6 = por %p269_p4, %p268_p3 }
   0xd   : > { %p3350_p7 = scmp.ge.s32.totalorder %s4197_s18, 1  ;;  %p327_p8 = scmp.lt.s32.totalorder %s4197_s18, 3 }
   0xf   : > { %p328_p9 = pnand %p3350_p7, %p327_p8 }
  0x10   : > { %v4024_v1 = vld [vmem:[%s6044_s2 + $0x40] sm:$0xff] (!%p328_p9)   ;;  %v4026_v3 = vld [vmem:[%s6044_s2 + $0x48] sm:$0xff] (!%p328_p9)   ;;  %p369_p10 = scmp.lt.s32.totalorder (!%p328_p9), %s4282_s7, 1  ;;  %v4028_v5 = vld [vmem:[%s6044_s2 + $0x50] sm:$0xff] (!%p328_p9)   ;;  %v6061_v36 = vmov (!%p328_p9), 0   ;;  %vm827_vm0 = vcmask (!%p328_p9), 31744  }
  0x11   : > { %331 = sbr.rel (%p328_p9) target bundleno = 4613 (0x1205), region = 60  ;;  %v4025_v2 = vld [vmem:[%s6044_s2] sm:$0xff] (!%p328_p9)   ;;  %3573 = vmatprep.subr.bf16.mxu0 (!%p328_p9), %v4024_v1  ;;  %v4027_v4 = vld [vmem:[%s6044_s2 + $0x8] sm:$0xff] (!%p328_p9)   ;;  %v4029_v6 = vld [vmem:[%s6044_s2 + $0x10] sm:$0xff] (!%p328_p9)   ;;  %859 = vmatprep.subr.bf16.mxu1 (!%p328_p9), %v6061_v36  ;;  %v4200_v51 = vmov (!%p328_p9), 0.0   ;;  %vm855_vm1 = vcmask (!%p328_p9), 1041408  }
  0x12   : > { %3574 = vmatpush3.bf16.msra.mxu0 (!%p328_p9), %v4025_v2  ;;  %v4030_v7 = vld [vmem:[%s6044_s2 + $0x58] sm:$0xff] (!%p328_p9)   ;;  %v4032_v9 = vld [vmem:[%s6044_s2 + $0x60] sm:$0xff] (!%p328_p9)   ;;  %v4034_v11 = vld [vmem:[%s6044_s2 + $0x68] sm:$0xff] (!%p328_p9)   ;;  %4022 = vset.pattern.permute.xlu0 (!%p328_p9), %v6061_v36  ;;  %vm4201_vm2 = vmmov (!%p328_p9), 0   ;;  %vm998_vm3 = vcmask (!%p328_p9), 130048   ;;  %vm3211_vm4 = vcmask (!%p328_p9), 15360  }
  0x13   : > { %3575 = vmatprep.subr.bf16.mxu0 (!%p328_p9), %v4026_v3  ;;  %v4031_v8 = vld [vmem:[%s6044_s2 + $0x18] sm:$0xff] (!%p328_p9)   ;;  %v4033_v10 = vld [vmem:[%s6044_s2 + $0x20] sm:$0xff] (!%p328_p9)   ;;  %v4035_v13 = vld [vmem:[%s6044_s2 + $0x28] sm:$0xff] (!%p328_p9)   ;;  %4023 = vset.pattern.permute.xlu1 (!%p328_p9), %v6061_v36  ;;  %vm3243_vm5 = vcmask (!%p328_p9), 11264   ;;  %vm3254_vm6 = vcmask (!%p328_p9), 8192   ;;  %s3570_s27 = sshll.u32 (!%p328_p9), %s4282_s7, 4 }
  0x14   : > { %v4036_v14 = vld [vmem:[%s6044_s2 + $0x70] sm:$0xff] (!%p328_p9)   ;;  %v4038_v16 = vld [vmem:[%s6044_s2 + $0x78] sm:$0xff] (!%p328_p9)   ;;  %v4092_v49 = vld [vmem:[%s6046_s4] sm:$0xff] (!%p328_p9)  }
  0x15   : > { %v4037_v15 = vld [vmem:[%s6044_s2 + $0x30] sm:$0xff] (!%p328_p9)   ;;  %v4039_v17 = vld [vmem:[%s6044_s2 + $0x38] sm:$0xff] (!%p328_p9)  }
  0x16   : > { %3576 = vmatpush3.bf16.msra.mxu0 (!%p328_p9), %v4027_v4 }
  0x17   : > { %3577 = vmatprep.subr.bf16.mxu0 (!%p328_p9), %v4028_v5 }
  0x18   : > { %s370_s21 = scalar_select %p369_p10, %s4282_s7, 1 }
  0x19   : > { %s4202_s7 = smov [#allocation3]  }
  0x1a   : > { %s3979_s29 = smul.u32 136, %s370_s21  ;;  %3578 = vmatpush3.bf16.msra.mxu0 %v4029_v6  ;;  %s4139_s14 = sshll.u32 %s4202_s7, 4  ;;  %s4140_s14 = int_to_ptr.vmem [resolvable:$false] %s4139_s14 }
  0x1b   : > { %3579 = vmatprep.subr.bf16.mxu0 %v4030_v7  ;;  %s4141_s19 = scalar_lea.vmem %s4140_s14, 32 }
  0x1c   : > { %s4341_s22 = scalar_lea.vmem %s6042_s0, %s3979_s29  ;;  %s4368_s12 = scalar_lea.vmem %s6043_s1, %s3979_s29 }
  0x1d   : > { %v4042_v12 = vld [vmem:[%s4341_s22 + $0x4] ss:$8 sps:$4 sm:$0xff]   ;;  %v4040_v18 = vld [vmem:[%s4341_s22] ss:$8 sps:$4 sm:$0xff]   ;;  %v4043_v19 = vld [vmem:[%s4341_s22 + $0x14] ss:$8 sps:$4 sm:$0xff]   ;;  %s5999_s29 = scalar_lea.hbm %s6052_s10, %s3570_s27 }
  0x1e   : > { %3580 = vmatpush3.bf16.msra.mxu0 %v4031_v8  ;;  %662 = vmatprep.mubr.bf16.mxu0 %v4042_v12  ;;  %v4045_v20 = vld [vmem:[%s4341_s22 + $0x10] ss:$8 sps:$4 sm:$0xff]   ;;  %v4046_v21 = vld [vmem:[%s4341_s22 + $0x24] ss:$8 sps:$4 sm:$0xff]   ;;  %v4048_v22 = vld [vmem:[%s4341_s22 + $0x20] ss:$8 sps:$4 sm:$0xff]  }
  0x1f   : > { %3581 = vmatprep.subr.bf16.mxu0 %v4032_v9  ;;  %v4049_v23 = vld [vmem:[%s4341_s22 + $0x34] ss:$8 sps:$4 sm:$0xff]   ;;  %v4051_v24 = vld [vmem:[%s4341_s22 + $0x30] ss:$8 sps:$4 sm:$0xff]   ;;  %v4052_v25 = vld [vmem:[%s4341_s22 + $0x44] ss:$8 sps:$4 sm:$0xff]  }
  0x20   : > { %v4054_v26 = vld [vmem:[%s4341_s22 + $0x40] ss:$8 sps:$4 sm:$0xff]   ;;  %v4055_v27 = vld [vmem:[%s4341_s22 + $0x54] ss:$8 sps:$4 sm:$0xff]   ;;  %v4057_v28 = vld [vmem:[%s4341_s22 + $0x50] ss:$8 sps:$4 sm:$0xff]  }
  0x21   : > { %v4058_v29 = vld [vmem:[%s4341_s22 + $0x64] ss:$8 sps:$4 sm:$0xff]   ;;  %v4060_v30 = vld [vmem:[%s4341_s22 + $0x60] ss:$8 sps:$4 sm:$0xff]   ;;  %v4061_v31 = vld [vmem:[%s4341_s22 + $0x74] ss:$8 sps:$4 sm:$0xff]  }
  0x22   : > { %3582 = vmatpush3.bf16.msra.mxu0 %v4033_v10  ;;  %v413_v32 = vld [vmem:[%s4341_s22 + $0x80] sm:$0x33]  ;;  %v4063_v33 = vld [vmem:[%s4341_s22 + $0x70] ss:$8 sps:$4 sm:$0xff]  }
  0x23   : > { %3583 = vmatprep.subr.bf16.mxu0 %v4034_v11  ;;  %v3370_v34 = vcombine.high %v413_v32, %v413_v32  ;;  %v3369_v35 = vcombine.low %v413_v32, %v413_v32  ;;  %v4390_v37 = vld [vmem:[%s4368_s12 + $0x4] ss:$8 sps:$4 sm:$0xff]  }
  0x24   : > { %3406 = vmatprep.mubr.msk.bf16.mxu1 %vm827_vm0, %v4390_v37 }
  0x26   : > { %3584 = vmatpush3.bf16.msra.mxu0 %v4035_v13 }
  0x27   : > { %3585 = vmatprep.subr.bf16.mxu0 %v4036_v14 }
  0x2a   : > { %3586 = vmatpush3.bf16.msra.mxu0 %v4037_v15 }
  0x2b   : > { %3587 = vmatprep.subr.bf16.mxu0 %v4038_v16 }
  0x2e   : > { %3588 = vmatpush3.bf16.msra.mxu0 %v4039_v17 }
  0x2f   : > { %3713 = vmatprep.subr.bf16.mxu0 %v4200_v51 }
  0x31   : > { %663 = vmatmul.mubr.bf16.vlgmr.msra.gmra.mrb[0].mxu0 %v4040_v18 }
  0x32   : > { %670 = vmatprep.mubr.bf16.mxu0 %v4043_v19  ;;  %3714 = vmatpush3.bf16.msra.mxu0 %v4092_v49  ;;  %v4446_v49 = vld [vmem:[%s4368_s12 + $0x40] ss:$8 sps:$4 sm:$0xff]  }
  0x33   : > { %3751 = vmatprep.subr.bf16.mxu0 %v4200_v51 }
  0x39   : > { %671 = vmatmul.mubr.bf16.gmra.mrb[4].mxu0 %v4045_v20 }
  0x3a   : > { %678 = vmatprep.mubr.bf16.mxu0 %v4046_v21 }
  0x41   : > { %679 = vmatmul.mubr.bf16.gmra.mrb[8].mxu0 %v4048_v22 }
  0x42   : > { %686 = vmatprep.mubr.bf16.mxu0 %v4049_v23 }
  0x49   : > { %687 = vmatmul.mubr.bf16.gmra.mrb[12].mxu0 %v4051_v24 }
  0x4a   : > { %694 = vmatprep.mubr.bf16.mxu0 %v4052_v25 }
  0x51   : > { %695 = vmatmul.mubr.bf16.gmra.mrb[16].mxu0 %v4054_v26 }
  0x52   : > { %702 = vmatprep.mubr.bf16.mxu0 %v4055_v27 }
  0x59   : > { %703 = vmatmul.mubr.bf16.gmra.mrb[20].mxu0 %v4057_v28 }
  0x5a   : > { %710 = vmatprep.mubr.bf16.mxu0 %v4058_v29 }
  0x61   : > { %711 = vmatmul.mubr.bf16.gmra.mrb[24].mxu0 %v4060_v30 }
  0x62   : > { %718 = vmatprep.mubr.bf16.mxu0 %v4061_v31 }
  0x69   : > { %719 = vmatmul.mubr.bf16.gmra.mrb[28].mxu0 %v4063_v33 }
  0x6a   : > { %726 = vmatprep.mubr.bf16.mxu0 %v3370_v34 }
  0x71   : > { %727 = vmatmul.mubr.bf16.gmra.mrb[32].mxu0 %v3369_v35 }
  0x72   : > { %3715 = vmatprep.mubr.msk.bf16.mxu0 %vm4201_vm2, %v4200_v51 }
 0x104   : > { %v3589_v38 = vpop.f32.mrb[0].mxu0 }
 0x105   : > { %v3590_v39 = vpop.f32.mrb[1].mxu0 }
 0x106   : > { %v3592_v40 = vpop.f32.mrb[2].mxu0  ;;  %v3591_v41 = vadd.f32 %v3590_v39, %v3589_v38 }
 0x107   : > { %v3593_v42 = vpop.f32.mrb[3].mxu0 }
 0x108   : > { %v3594_v43 = vadd.f32 %v3593_v42, %v3592_v40  ;;  %v4412_v42 = vld [vmem:[%s4368_s12 + $0x14] ss:$8 sps:$4 sm:$0xff]  }
 0x10a   : > { %v734_v44 = vpack.c.bf16 %v3594_v43, %v3591_v41  ;;  %v4409_v41 = vld [vmem:[%s4368_s12] ss:$8 sps:$4 sm:$0xff]   ;;  %v4419_v43 = vld [vmem:[%s4368_s12 + $0x10] ss:$8 sps:$4 sm:$0xff]  }
 0x10c   : > { %v3595_v45 = vpop.f32.mrb[4].mxu0  ;;  %860 = vmatpush1.bf16.msra.mxu1 %v734_v44  ;;  %v4422_v44 = vld [vmem:[%s4368_s12 + $0x24] ss:$8 sps:$4 sm:$0xff]  }
 0x10d   : > { %v3596_v46 = vpop.f32.mrb[5].mxu0  ;;  %861 = vmatprep.subr.bf16.mxu1 %v6061_v36 }
 0x10e   : > { %v3597_v47 = vadd.f32 %v3596_v46, %v3595_v45  ;;  %v3598_v48 = vpop.f32.mrb[6].mxu0  ;;  %v4428_v45 = vld [vmem:[%s4368_s12 + $0x20] ss:$8 sps:$4 sm:$0xff]   ;;  %v4431_v46 = vld [vmem:[%s4368_s12 + $0x34] ss:$8 sps:$4 sm:$0xff]  }
 0x10f   : > { %v3599_v50 = vpop.f32.mrb[7].mxu0 }
 0x110   : > { %v3600_v52 = vadd.f32 %v3599_v50, %v3598_v48  ;;  %v4440_v48 = vld [vmem:[%s4368_s12 + $0x44] ss:$8 sps:$4 sm:$0xff]   ;;  %v4449_v50 = vld [vmem:[%s4368_s12 + $0x54] ss:$8 sps:$4 sm:$0xff]  }
 0x112   : > { %v735_v53 = vpack.c.bf16 %v3600_v52, %v3597_v47  ;;  %v4437_v47 = vld [vmem:[%s4368_s12 + $0x30] ss:$8 sps:$4 sm:$0xff]  }
 0x113   : > { %v4455_v52 = vld [vmem:[%s4368_s12 + $0x50] ss:$8 sps:$4 sm:$0xff]  }
 0x114   : > { %v3601_v54 = vpop.f32.mrb[8].mxu0  ;;  %862 = vmatpush1.bf16.msra.mxu1 %v735_v53  ;;  %v4458_v53 = vld [vmem:[%s4368_s12 + $0x64] ss:$8 sps:$4 sm:$0xff]  }
 0x115   : > { %v3602_v55 = vpop.f32.mrb[9].mxu0  ;;  %863 = vmatprep.subr.bf16.mxu1 %v6061_v36 }
 0x116   : > { %v3603_v56 = vadd.f32 %v3602_v55, %v3601_v54  ;;  %v3604_v57 = vpop.f32.mrb[10].mxu0  ;;  %v4464_v54 = vld [vmem:[%s4368_s12 + $0x60] ss:$8 sps:$4 sm:$0xff]   ;;  %v4467_v55 = vld [vmem:[%s4368_s12 + $0x74] ss:$8 sps:$4 sm:$0xff]  }
 0x117   : > { %v3605_v58 = vpop.f32.mrb[11].mxu0 }
 0x118   : > { %v3606_v59 = vadd.f32 %v3605_v58, %v3604_v57  ;;  %v4474_v57 = vld [vmem:[%s4368_s12 + $0x70] ss:$8 sps:$4 sm:$0xff]  }
 0x11a   : > { %v736_v60 = vpack.c.bf16 %v3606_v59, %v3603_v56  ;;  %v396_v56 = vld [vmem:[%s4368_s12 + $0x80] sm:$0x33] }
 0x11b   : > { %v4476_v58 = vcombine.high %v396_v56, %v396_v56  ;;  %v4481_v59 = vcombine.low %v396_v56, %v396_v56 }
 0x11c   : > { %v3607_v61 = vpop.f32.mrb[12].mxu0  ;;  %864 = vmatpush1.bf16.msra.mxu1 %v736_v60  ;;  %v4491_v60 = vld [vmem:[%s6045_s3] ss:$0 sm:$0xff] }
 0x11d   : > { %v3608_v62 = vpop.f32.mrb[13].mxu0  ;;  %865 = vmatprep.subr.bf16.mxu1 %v6061_v36 }
 0x11e   : > { %v3609_v63 = vadd.f32 %v3608_v62, %v3607_v61  ;;  %v3610_v0 = vpop.f32.mrb[14].mxu0 }
 0x11f   : > { %v3611_v1 = vpop.f32.mrb[15].mxu0 }
 0x120   : > { %v3612_v2 = vadd.f32 %v3611_v1, %v3610_v0 }
 0x122   : > { %v737_v3 = vpack.c.bf16 %v3612_v2, %v3609_v63 }
 0x124   : > { %v3613_v4 = vpop.f32.mrb[16].mxu0  ;;  %866 = vmatpush1.bf16.msra.mxu1 %v737_v3 }
 0x125   : > { %v3614_v5 = vpop.f32.mrb[17].mxu0  ;;  %867 = vmatprep.subr.bf16.mxu1 %v6061_v36 }
 0x126   : > { %v3615_v6 = vadd.f32 %v3614_v5, %v3613_v4  ;;  %v3616_v7 = vpop.f32.mrb[18].mxu0 }
 0x127   : > { %v3617_v8 = vpop.f32.mrb[19].mxu0 }
 0x128   : > { %v3618_v9 = vadd.f32 %v3617_v8, %v3616_v7 }
 0x12a   : > { %v738_v10 = vpack.c.bf16 %v3618_v9, %v3615_v6 }
 0x12c   : > { %v3619_v11 = vpop.f32.mrb[20].mxu0  ;;  %868 = vmatpush1.bf16.msra.mxu1 %v738_v10 }
 0x12d   : > { %v3620_v12 = vpop.f32.mrb[21].mxu0  ;;  %869 = vmatprep.subr.bf16.mxu1 %v6061_v36 }
 0x12e   : > { %v3621_v13 = vadd.f32 %v3620_v12, %v3619_v11  ;;  %v3622_v14 = vpop.f32.mrb[22].mxu0 }
 0x12f   : > { %v3623_v15 = vpop.f32.mrb[23].mxu0 }
 0x130   : > { %v3624_v16 = vadd.f32 %v3623_v15, %v3622_v14 }
 0x132   : > { %v739_v17 = vpack.c.bf16 %v3624_v16, %v3621_v13 }
 0x134   : > { %v3625_v18 = vpop.f32.mrb[24].mxu0  ;;  %870 = vmatpush1.bf16.msra.mxu1 %v739_v17 }
 0x135   : > { %v3626_v19 = vpop.f32.mrb[25].mxu0  ;;  %871 = vmatprep.subr.bf16.mxu1 %v6061_v36 }
 0x136   : > { %v3627_v20 = vadd.f32 %v3626_v19, %v3625_v18  ;;  %v3628_v21 = vpop.f32.mrb[26].mxu0 }
 0x137   : > { %v3629_v22 = vpop.f32.mrb[27].mxu0 }
 0x138   : > { %v3630_v23 = vadd.f32 %v3629_v22, %v3628_v21 }
 0x13a   : > { %v740_v24 = vpack.c.bf16 %v3630_v23, %v3627_v20 }
 0x13c   : > { %v3631_v25 = vpop.f32.mrb[28].mxu0  ;;  %872 = vmatpush1.bf16.msra.mxu1 %v740_v24 }
 0x13d   : > { %v3632_v26 = vpop.f32.mrb[29].mxu0  ;;  %873 = vmatprep.subr.bf16.mxu1 %v6061_v36 }
 0x13e   : > { %v3633_v27 = vadd.f32 %v3632_v26, %v3631_v25  ;;  %v3634_v28 = vpop.f32.mrb[30].mxu0 }
 0x13f   : > { %v3635_v29 = vpop.f32.mrb[31].mxu0 }
 0x140   : > { %v3636_v30 = vadd.f32 %v3635_v29, %v3634_v28 }
 0x142   : > { %v741_v31 = vpack.c.bf16 %v3636_v30, %v3633_v27 }
 0x144   : > { %v3637_v32 = vpop.f32.mrb[32].mxu0  ;;  %874 = vmatpush1.bf16.msra.mxu1 %v741_v31 }
 0x145   : > { %v3638_v33 = vpop.f32.mrb[33].mxu0  ;;  %875 = vmatprep.subr.bf16.mxu1 %v6061_v36 }
 0x146   : > { %v3639_v34 = vadd.f32 %v3638_v33, %v3637_v32  ;;  %v3640_v35 = vpop.f32.mrb[34].mxu0 }
 0x147   : > { %v3641_v38 = vpop.f32.mrb[35].mxu0 }
 0x148   : > { %v742_v39 = vpack.c.bf16 %v3639_v34, %v3639_v34 }
 0x14a   : > { %v857_v40 = vsel %vm855_vm1, %v742_v39, 0 }
 0x14b   : > { %876 = vmatpush1.bf16.msra.mxu1 %v857_v40 }
 0x14c   : > { %1148 = vmatprep.subr.bf16.mxu1 %v6061_v36 }
 0x14e   : > { %892 = vmatmul.mubr.bf16.vlgmr.msra.gmra.mrb[0].mxu1 %v4409_v41 }
 0x14f   : > { %3407 = vmatprep.mubr.msk.bf16.mxu1 %vm827_vm0, %v4412_v42 }
 0x156   : > { %900 = vmatmul.mubr.bf16.gmra.mrb[4].mxu1 %v4419_v43 }
 0x157   : > { %3408 = vmatprep.mubr.msk.bf16.mxu1 %vm827_vm0, %v4422_v44 }
 0x15e   : > { %908 = vmatmul.mubr.bf16.gmra.mrb[8].mxu1 %v4428_v45 }
 0x15f   : > { %3409 = vmatprep.mubr.msk.bf16.mxu1 %vm827_vm0, %v4431_v46 }
 0x166   : > { %916 = vmatmul.mubr.bf16.gmra.mrb[12].mxu1 %v4437_v47 }
 0x167   : > { %3410 = vmatprep.mubr.msk.bf16.mxu1 %vm827_vm0, %v4440_v48 }
 0x16e   : > { %924 = vmatmul.mubr.bf16.gmra.mrb[16].mxu1 %v4446_v49 }
 0x16f   : > { %3411 = vmatprep.mubr.msk.bf16.mxu1 %vm827_vm0, %v4449_v50 }
 0x176   : > { %932 = vmatmul.mubr.bf16.gmra.mrb[20].mxu1 %v4455_v52 }
 0x177   : > { %3412 = vmatprep.mubr.msk.bf16.mxu1 %vm827_vm0, %v4458_v53 }
 0x17e   : > { %940 = vmatmul.mubr.bf16.gmra.mrb[24].mxu1 %v4464_v54 }
 0x17f   : > { %3413 = vmatprep.mubr.msk.bf16.mxu1 %vm827_vm0, %v4467_v55 }
 0x186   : > { %948 = vmatmul.mubr.bf16.gmra.mrb[28].mxu1 %v4474_v57 }
 0x187   : > { %3414 = vmatprep.mubr.msk.bf16.mxu1 %vm827_vm0, %v4476_v58 }
 0x18e   : > { %956 = vmatmul.mubr.bf16.gmra.mrb[32].mxu1 %v4481_v59 }
 0x18f   : > { %3426 = vmatprep.mubr.msk.bf16.mxu1 %vm827_vm0, %v4390_v37 }
 0x221   : > { %v893_v61 = vpop.f32.mrb[0].mxu1 }
 0x222   : > { %v4494_v62 = vadd.f32 %v4491_v60, %v893_v61  ;;  %v895_v63 = vpop.f32.mrb[1].mxu1 }
 0x223   : > { %v896_v0 = vpop.f32.mrb[2].mxu1 }
 0x224   : > { %v4497_v1 = vadd.f32 %v4491_v60, %v896_v0  ;;  %v898_v2 = vpop.f32.mrb[3].mxu1  ;;  %v963_v3 = vmax.f32 %v4494_v62, 0.0 }
 0x226   : > { %v964_v4 = vmax.f32 %v4497_v1, 0.0 }
 0x228   : > { %v980_v5 = vpack.c.bf16 %v964_v4, %v963_v3 }
 0x229   : > { %v901_v6 = vpop.f32.mrb[4].mxu1 }
 0x22a   : > { %v4506_v7 = vadd.f32 %v4491_v60, %v901_v6  ;;  %v903_v8 = vpop.f32.mrb[5].mxu1  ;;  %3716 = vmatmul.mubr.msk.bf16.vlgmr.msra.gmra.mrb[36].mxu0 %vm998_vm3, %v980_v5 }
 0x22b   : > { %v904_v9 = vpop.f32.mrb[6].mxu1  ;;  %3719 = vmatprep.mubr.msk.bf16.mxu0 %vm4201_vm2, %v4200_v51 }
 0x22c   : > { %v4512_v10 = vadd.f32 %v4491_v60, %v904_v9  ;;  %v906_v11 = vpop.f32.mrb[7].mxu1  ;;  %v965_v12 = vmax.f32 %v4506_v7, 0.0 }
 0x22e   : > { %v966_v13 = vmax.f32 %v4512_v10, 0.0 }
 0x230   : > { %v981_v14 = vpack.c.bf16 %v966_v13, %v965_v12 }
 0x231   : > { %v909_v15 = vpop.f32.mrb[8].mxu1 }
 0x232   : > { %v4521_v16 = vadd.f32 %v4491_v60, %v909_v15  ;;  %v911_v17 = vpop.f32.mrb[9].mxu1  ;;  %3720 = vmatmul.mubr.msk.bf16.gmra.mrb[40].mxu0 %vm998_vm3, %v981_v14 }
 0x233   : > { %v912_v18 = vpop.f32.mrb[10].mxu1  ;;  %3723 = vmatprep.mubr.msk.bf16.mxu0 %vm4201_vm2, %v4200_v51 }
 0x234   : > { %v4527_v19 = vadd.f32 %v4491_v60, %v912_v18  ;;  %v914_v20 = vpop.f32.mrb[11].mxu1  ;;  %v967_v21 = vmax.f32 %v4521_v16, 0.0 }
 0x236   : > { %v968_v22 = vmax.f32 %v4527_v19, 0.0 }
 0x238   : > { %v982_v23 = vpack.c.bf16 %v968_v22, %v967_v21 }
 0x239   : > { %v917_v24 = vpop.f32.mrb[12].mxu1 }
 0x23a   : > { %v4536_v25 = vadd.f32 %v4491_v60, %v917_v24  ;;  %v919_v26 = vpop.f32.mrb[13].mxu1  ;;  %3724 = vmatmul.mubr.msk.bf16.gmra.mrb[44].mxu0 %vm998_vm3, %v982_v23 }
 0x23b   : > { %v920_v27 = vpop.f32.mrb[14].mxu1  ;;  %3727 = vmatprep.mubr.msk.bf16.mxu0 %vm4201_vm2, %v4200_v51 }
 0x23c   : > { %v4542_v28 = vadd.f32 %v4491_v60, %v920_v27  ;;  %v922_v29 = vpop.f32.mrb[15].mxu1  ;;  %v969_v30 = vmax.f32 %v4536_v25, 0.0 }
 0x23e   : > { %v970_v31 = vmax.f32 %v4542_v28, 0.0 }
 0x240   : > { %v983_v32 = vpack.c.bf16 %v970_v31, %v969_v30 }
 0x241   : > { %v925_v33 = vpop.f32.mrb[16].mxu1 }
 0x242   : > { %v4551_v34 = vadd.f32 %v4491_v60, %v925_v33  ;;  %v927_v35 = vpop.f32.mrb[17].mxu1  ;;  %3728 = vmatmul.mubr.msk.bf16.gmra.mrb[48].mxu0 %vm998_vm3, %v983_v32 }
 0x243   : > { %v928_v38 = vpop.f32.mrb[18].mxu1  ;;  %3731 = vmatprep.mubr.msk.bf16.mxu0 %vm4201_vm2, %v4200_v51 }
 0x244   : > { %v4557_v39 = vadd.f32 %v4491_v60, %v928_v38  ;;  %v930_v40 = vpop.f32.mrb[19].mxu1  ;;  %v971_v56 = vmax.f32 %v4551_v34, 0.0 }
 0x246   : > { %v972_v61 = vmax.f32 %v4557_v39, 0.0 }
 0x248   : > { %v984_v63 = vpack.c.bf16 %v972_v61, %v971_v56 }
 0x249   : > { %v933_v0 = vpop.f32.mrb[20].mxu1 }
 0x24a   : > { %v4566_v2 = vadd.f32 %v4491_v60, %v933_v0  ;;  %v935_v5 = vpop.f32.mrb[21].mxu1  ;;  %3732 = vmatmul.mubr.msk.bf16.gmra.mrb[52].mxu0 %vm998_vm3, %v984_v63 }
 0x24b   : > { %v936_v6 = vpop.f32.mrb[22].mxu1  ;;  %3735 = vmatprep.mubr.msk.bf16.mxu0 %vm4201_vm2, %v4200_v51 }
 0x24c   : > { %v4572_v8 = vadd.f32 %v4491_v60, %v936_v6  ;;  %v938_v9 = vpop.f32.mrb[23].mxu1  ;;  %v973_v11 = vmax.f32 %v4566_v2, 0.0 }
 0x24e   : > { %v974_v14 = vmax.f32 %v4572_v8, 0.0 }
 0x250   : > { %v985_v15 = vpack.c.bf16 %v974_v14, %v973_v11 }
 0x251   : > { %v941_v17 = vpop.f32.mrb[24].mxu1 }
 0x252   : > { %v4581_v18 = vadd.f32 %v4491_v60, %v941_v17  ;;  %v943_v20 = vpop.f32.mrb[25].mxu1  ;;  %3736 = vmatmul.mubr.msk.bf16.gmra.mrb[56].mxu0 %vm998_vm3, %v985_v15 }
 0x253   : > { %v944_v23 = vpop.f32.mrb[26].mxu1  ;;  %3739 = vmatprep.mubr.msk.bf16.mxu0 %vm4201_vm2, %v4200_v51 }
 0x254   : > { %v4587_v24 = vadd.f32 %v4491_v60, %v944_v23  ;;  %v946_v26 = vpop.f32.mrb[27].mxu1  ;;  %v6056_v27 = vmax.f32 %v4581_v18, 0.0 }
 0x256   : > { %v6055_v29 = vmax.f32 %v4587_v24, 0.0 }
 0x258   : > { %v986_v32 = vpack.c.bf16 %v6055_v29, %v6056_v27 }
 0x259   : > { %v949_v33 = vpop.f32.mrb[28].mxu1 }
 0x25a   : > { %v4596_v35 = vadd.f32 %v4491_v60, %v949_v33  ;;  %v951_v38 = vpop.f32.mrb[29].mxu1  ;;  %3740 = vmatmul.mubr.msk.bf16.gmra.mrb[60].mxu0 %vm998_vm3, %v986_v32 }
 0x25b   : > { %v952_v40 = vpop.f32.mrb[30].mxu1  ;;  %3743 = vmatprep.mubr.msk.bf16.mxu0 %vm4201_vm2, %v4200_v51 }
 0x25c   : > { %v4602_v63 = vadd.f32 %v4491_v60, %v952_v40  ;;  %v954_v0 = vpop.f32.mrb[31].mxu1  ;;  %v6054_v5 = vmax.f32 %v4596_v35, 0.0 }
 0x25e   : > { %v6053_v6 = vmax.f32 %v4602_v63, 0.0 }
 0x260   : > { %v987_v9 = vpack.c.bf16 %v6053_v6, %v6054_v5 }
 0x261   : > { %v957_v15 = vpop.f32.mrb[32].mxu1 }
 0x262   : > { %v958_v17 = vadd.f32 %v4491_v60, %v957_v15  ;;  %v959_v20 = vpop.f32.mrb[33].mxu1  ;;  %3744 = vmatmul.mubr.msk.bf16.gmra.mrb[64].mxu0 %vm998_vm3, %v987_v9  ;;  %v4093_v15 = vld [vmem:[%s6046_s4 + $0x8] sm:$0xff]  }
 0x263   : > { %v960_v23 = vpop.f32.mrb[34].mxu1  ;;  %3747 = vmatprep.mubr.msk.bf16.mxu0 %vm4201_vm2, %v4200_v51  ;;  %3752 = vmatpush3.bf16.msra.mxu0 %v4093_v15 }
 0x264   : > { %v4614_v26 = vmax.f32 %v958_v17, 0.0  ;;  %v961_v32 = vpop.f32.mrb[35].mxu1  ;;  %3789 = vmatprep.subr.bf16.mxu0 %v4200_v51 }
 0x266   : > { %v988_v33 = vpack.c.bf16 %v4614_v26, %v4614_v26 }
 0x26a   : > { %3748 = vmatmul.mubr.msk.bf16.gmra.mrb[68].mxu0 %vm998_vm3, %v988_v33 }
 0x26b   : > { %3753 = vmatprep.mubr.msk.bf16.mxu0 %vm4201_vm2, %v4200_v51 }
 0x2fd   : > { %v1060_v38 = vpop.f32.mrb[36].mxu0 }
 0x2fe   : > { %v3717_v60 = vpop.f32.mrb[37].mxu0 }
 0x2ff   : > { %v1063_v40 = vpop.f32.mrb[38].mxu0 }
 0x300   : > { %v1130_v0 = vpack.c.bf16 %v1063_v40, %v1060_v38  ;;  %v3718_v9 = vpop.f32.mrb[39].mxu0 }
 0x302   : > { %1149 = vmatpush1.bf16.msra.mxu1 %v1130_v0 }
 0x303   : > { %1150 = vmatprep.subr.bf16.mxu1 %v6061_v36 }
 0x305   : > { %v1068_v17 = vpop.f32.mrb[40].mxu0 }
 0x306   : > { %v3721_v20 = vpop.f32.mrb[41].mxu0 }
 0x307   : > { %v1071_v23 = vpop.f32.mrb[42].mxu0 }
 0x308   : > { %v1131_v32 = vpack.c.bf16 %v1071_v23, %v1068_v17  ;;  %v3722_v33 = vpop.f32.mrb[43].mxu0 }
 0x30a   : > { %1151 = vmatpush1.bf16.msra.mxu1 %v1131_v32 }
 0x30b   : > { %1152 = vmatprep.subr.bf16.mxu1 %v6061_v36 }
 0x30d   : > { %v1076_v38 = vpop.f32.mrb[44].mxu0 }
 0x30e   : > { %v3725_v60 = vpop.f32.mrb[45].mxu0 }
 0x30f   : > { %v1079_v40 = vpop.f32.mrb[46].mxu0 }
 0x310   : > { %v1132_v0 = vpack.c.bf16 %v1079_v40, %v1076_v38  ;;  %v3726_v9 = vpop.f32.mrb[47].mxu0 }
 0x312   : > { %1153 = vmatpush1.bf16.msra.mxu1 %v1132_v0 }
 0x313   : > { %1154 = vmatprep.subr.bf16.mxu1 %v6061_v36 }
 0x315   : > { %v1084_v6 = vpop.f32.mrb[48].mxu0 }
 0x316   : > { %v3729_v5 = vpop.f32.mrb[49].mxu0 }
 0x317   : > { %v1087_v20 = vpop.f32.mrb[50].mxu0 }
 0x318   : > { %v1133_v15 = vpack.c.bf16 %v1087_v20, %v1084_v6  ;;  %v3730_v29 = vpop.f32.mrb[51].mxu0 }
 0x31a   : > { %1155 = vmatpush1.bf16.msra.mxu1 %v1133_v15 }
 0x31b   : > { %1156 = vmatprep.subr.bf16.mxu1 %v6061_v36 }
 0x31d   : > { %v1092_v17 = vpop.f32.mrb[52].mxu0 }
 0x31e   : > { %v3733_v23 = vpop.f32.mrb[53].mxu0 }
 0x31f   : > { %v1095_v32 = vpop.f32.mrb[54].mxu0 }
 0x320   : > { %v1134_v33 = vpack.c.bf16 %v1095_v32, %v1092_v17  ;;  %v3734_v27 = vpop.f32.mrb[55].mxu0 }
 0x322   : > { %1157 = vmatpush1.bf16.msra.mxu1 %v1134_v33 }
 0x323   : > { %1158 = vmatprep.subr.bf16.mxu1 %v6061_v36 }
 0x325   : > { %v1100_v38 = vpop.f32.mrb[56].mxu0 }
 0x326   : > { %v3737_v60 = vpop.f32.mrb[57].mxu0 }
 0x327   : > { %v1103_v40 = vpop.f32.mrb[58].mxu0 }
 0x328   : > { %v1135_v0 = vpack.c.bf16 %v1103_v40, %v1100_v38  ;;  %v3738_v9 = vpop.f32.mrb[59].mxu0 }
 0x32a   : > { %1159 = vmatpush1.bf16.msra.mxu1 %v1135_v0 }
 0x32b   : > { %1160 = vmatprep.subr.bf16.mxu1 %v6061_v36 }
 0x32d   : > { %v1108_v29 = vpop.f32.mrb[60].mxu0 }
 0x32e   : > { %v3741_v5 = vpop.f32.mrb[61].mxu0 }
 0x32f   : > { %v1111_v6 = vpop.f32.mrb[62].mxu0 }
 0x330   : > { %v1136_v20 = vpack.c.bf16 %v1111_v6, %v1108_v29  ;;  %v3742_v15 = vpop.f32.mrb[63].mxu0  ;;  %v4665_v29 = vld [vmem:[%s6047_s5] ss:$0 sm:$0xff] }
 0x332   : > { %1161 = vmatpush1.bf16.msra.mxu1 %v1136_v20 }
 0x333   : > { %1162 = vmatprep.subr.bf16.mxu1 %v6061_v36 }
 0x335   : > { %v1116_v27 = vpop.f32.mrb[64].mxu0 }
 0x336   : > { %v3745_v17 = vpop.f32.mrb[65].mxu0 }
 0x337   : > { %v1119_v23 = vpop.f32.mrb[66].mxu0 }
 0x338   : > { %v1137_v32 = vpack.c.bf16 %v1119_v23, %v1116_v27  ;;  %v3746_v33 = vpop.f32.mrb[67].mxu0 }
 0x33a   : > { %1163 = vmatpush1.bf16.msra.mxu1 %v1137_v32 }
 0x33b   : > { %1164 = vmatprep.subr.bf16.mxu1 %v6061_v36 }
 0x33d   : > { %v1124_v38 = vpop.f32.mrb[68].mxu0 }
 0x33e   : > { %v1138_v60 = vpack.c.bf16 %v1124_v38, %v1124_v38  ;;  %v3749_v40 = vpop.f32.mrb[69].mxu0 }
 0x33f   : > { %v1127_v0 = vpop.f32.mrb[70].mxu0 }
 0x340   : > { %v1146_v9 = vsel %vm855_vm1, %v1138_v60, 0  ;;  %v3750_v5 = vpop.f32.mrb[71].mxu0 }
 0x341   : > { %1165 = vmatpush1.bf16.msra.mxu1 %v1146_v9 }
 0x342   : > { %1455 = vmatprep.subr.bf16.mxu1 %v6061_v36 }
 0x344   : > { %1181 = vmatmul.mubr.bf16.vlgmr.msra.gmra.mrb[36].mxu1 %v4409_v41 }
 0x345   : > { %3427 = vmatprep.mubr.msk.bf16.mxu1 %vm827_vm0, %v4412_v42 }
 0x34c   : > { %1189 = vmatmul.mubr.bf16.gmra.mrb[40].mxu1 %v4419_v43 }
 0x34d   : > { %3428 = vmatprep.mubr.msk.bf16.mxu1 %vm827_vm0, %v4422_v44 }
 0x354   : > { %1197 = vmatmul.mubr.bf16.gmra.mrb[44].mxu1 %v4428_v45 }
 0x355   : > { %3429 = vmatprep.mubr.msk.bf16.mxu1 %vm827_vm0, %v4431_v46 }
 0x35c   : > { %1205 = vmatmul.mubr.bf16.gmra.mrb[48].mxu1 %v4437_v47 }
 0x35d   : > { %3430 = vmatprep.mubr.msk.bf16.mxu1 %vm827_vm0, %v4440_v48 }
 0x364   : > { %1213 = vmatmul.mubr.bf16.gmra.mrb[52].mxu1 %v4446_v49 }
 0x365   : > { %3431 = vmatprep.mubr.msk.bf16.mxu1 %vm827_vm0, %v4449_v50 }
 0x36c   : > { %1221 = vmatmul.mubr.bf16.gmra.mrb[56].mxu1 %v4455_v52 }
 0x36d   : > { %3432 = vmatprep.mubr.msk.bf16.mxu1 %vm827_vm0, %v4458_v53 }
 0x374   : > { %1229 = vmatmul.mubr.bf16.gmra.mrb[60].mxu1 %v4464_v54 }
 0x375   : > { %3433 = vmatprep.mubr.msk.bf16.mxu1 %vm827_vm0, %v4467_v55 }
 0x37c   : > { %1237 = vmatmul.mubr.bf16.gmra.mrb[64].mxu1 %v4474_v57 }
 0x37d   : > { %3434 = vmatprep.mubr.msk.bf16.mxu1 %vm827_vm0, %v4476_v58 }
 0x384   : > { %1245 = vmatmul.mubr.bf16.gmra.mrb[68].mxu1 %v4481_v59 }
 0x385   : > { %3449 = vmatprep.mubr.msk.bf16.mxu1 %vm827_vm0, %v4390_v37 }
 0x417   : > { %v1182_v6 = vpop.f32.mrb[36].mxu1 }
 0x418   : > { %v1183_v20 = vadd.f32 %v4665_v29, %v1182_v6  ;;  %v1184_v15 = vpop.f32.mrb[37].mxu1 }
 0x419   : > { %v1185_v27 = vpop.f32.mrb[38].mxu1 }
 0x41a   : > { %v4670_v17 = vadd.f32 %v1183_v20, %v963_v3  ;;  %v1186_v23 = vadd.f32 %v4665_v29, %v1185_v27  ;;  %v1187_v32 = vpop.f32.mrb[39].mxu1 }
 0x41c   : > { %v4675_v33 = vadd.f32 %v1186_v23, %v964_v4  ;;  %v1269_v38 = vmax.f32 %v4670_v17, 0.0 }
 0x41e   : > { %v1270_v60 = vmax.f32 %v4675_v33, 0.0 }
 0x41f   : > { %v1190_v40 = vpop.f32.mrb[40].mxu1 }
 0x420   : > { %v1286_v0 = vpack.c.bf16 %v1270_v60, %v1269_v38  ;;  %v1191_v62 = vadd.f32 %v4665_v29, %v1190_v40  ;;  %v1192_v3 = vpop.f32.mrb[41].mxu1 }
 0x421   : > { %v1193_v9 = vpop.f32.mrb[42].mxu1 }
 0x422   : > { %v4686_v5 = vadd.f32 %v1191_v62, %v965_v12  ;;  %v1194_v1 = vadd.f32 %v4665_v29, %v1193_v9  ;;  %v1195_v4 = vpop.f32.mrb[43].mxu1  ;;  %3754 = vmatmul.mubr.msk.bf16.vlgmr.msra.gmra.mrb[72].mxu0 %vm998_vm3, %v1286_v0 }
 0x423   : > { %3757 = vmatprep.mubr.msk.bf16.mxu0 %vm4201_vm2, %v4200_v51 }
 0x424   : > { %v4694_v6 = vadd.f32 %v1194_v1, %v966_v13  ;;  %v1271_v20 = vmax.f32 %v4686_v5, 0.0 }
 0x426   : > { %v1272_v15 = vmax.f32 %v4694_v6, 0.0 }
 0x427   : > { %v1198_v27 = vpop.f32.mrb[44].mxu1 }
 0x428   : > { %v1287_v7 = vpack.c.bf16 %v1272_v15, %v1271_v20  ;;  %v1199_v12 = vadd.f32 %v4665_v29, %v1198_v27  ;;  %v1200_v23 = vpop.f32.mrb[45].mxu1 }
 0x429   : > { %v1201_v32 = vpop.f32.mrb[46].mxu1 }
 0x42a   : > { %v4705_v40 = vadd.f32 %v1199_v12, %v967_v21  ;;  %v1202_v10 = vadd.f32 %v4665_v29, %v1201_v32  ;;  %v1203_v13 = vpop.f32.mrb[47].mxu1  ;;  %3758 = vmatmul.mubr.msk.bf16.gmra.mrb[76].mxu0 %vm998_vm3, %v1287_v7 }
 0x42b   : > { %3761 = vmatprep.mubr.msk.bf16.mxu0 %vm4201_vm2, %v4200_v51 }
 0x42c   : > { %v4713_v0 = vadd.f32 %v1202_v10, %v968_v22  ;;  %v1273_v62 = vmax.f32 %v4705_v40, 0.0 }
 0x42e   : > { %v1274_v3 = vmax.f32 %v4713_v0, 0.0 }
 0x42f   : > { %v1206_v9 = vpop.f32.mrb[48].mxu1 }
 0x430   : > { %v1288_v16 = vpack.c.bf16 %v1274_v3, %v1273_v62  ;;  %v1207_v21 = vadd.f32 %v4665_v29, %v1206_v9  ;;  %v1208_v1 = vpop.f32.mrb[49].mxu1 }
 0x431   : > { %v1209_v4 = vpop.f32.mrb[50].mxu1 }
 0x432   : > { %v4724_v27 = vadd.f32 %v1207_v21, %v969_v30  ;;  %v1210_v19 = vadd.f32 %v4665_v29, %v1209_v4  ;;  %v1211_v22 = vpop.f32.mrb[51].mxu1  ;;  %3762 = vmatmul.mubr.msk.bf16.gmra.mrb[80].mxu0 %vm998_vm3, %v1288_v16 }
 0x433   : > { %3765 = vmatprep.mubr.msk.bf16.mxu0 %vm4201_vm2, %v4200_v51 }
 0x434   : > { %v4732_v7 = vadd.f32 %v1210_v19, %v970_v31  ;;  %v1275_v12 = vmax.f32 %v4724_v27, 0.0 }
 0x436   : > { %v1276_v23 = vmax.f32 %v4732_v7, 0.0 }
 0x437   : > { %v1214_v32 = vpop.f32.mrb[52].mxu1 }
 0x438   : > { %v1289_v25 = vpack.c.bf16 %v1276_v23, %v1275_v12  ;;  %v1215_v30 = vadd.f32 %v4665_v29, %v1214_v32  ;;  %v1216_v10 = vpop.f32.mrb[53].mxu1 }
 0x439   : > { %v1217_v13 = vpop.f32.mrb[54].mxu1 }
 0x43a   : > { %v4743_v9 = vadd.f32 %v1215_v30, %v971_v56  ;;  %v1218_v28 = vadd.f32 %v4665_v29, %v1217_v13  ;;  %v1219_v31 = vpop.f32.mrb[55].mxu1  ;;  %3766 = vmatmul.mubr.msk.bf16.gmra.mrb[84].mxu0 %vm998_vm3, %v1289_v25 }
 0x43b   : > { %3769 = vmatprep.mubr.msk.bf16.mxu0 %vm4201_vm2, %v4200_v51 }
 0x43c   : > { %v4751_v16 = vadd.f32 %v1218_v28, %v972_v61  ;;  %v1277_v21 = vmax.f32 %v4743_v9, 0.0 }
 0x43e   : > { %v1278_v1 = vmax.f32 %v4751_v16, 0.0 }
 0x43f   : > { %v1222_v4 = vpop.f32.mrb[56].mxu1 }
 0x440   : > { %v1290_v34 = vpack.c.bf16 %v1278_v1, %v1277_v21  ;;  %v1223_v56 = vadd.f32 %v4665_v29, %v1222_v4  ;;  %v1224_v19 = vpop.f32.mrb[57].mxu1  ;;  %v6077_v4 = vmax.f32 %v4581_v18, 0.0 }
 0x441   : > { %v1225_v22 = vpop.f32.mrb[58].mxu1 }
 0x442   : > { %v4762_v32 = vadd.f32 %v1223_v56, %v973_v11  ;;  %v1226_v39 = vadd.f32 %v4665_v29, %v1225_v22  ;;  %v1227_v61 = vpop.f32.mrb[59].mxu1  ;;  %3770 = vmatmul.mubr.msk.bf16.gmra.mrb[88].mxu0 %vm998_vm3, %v1290_v34  ;;  %v6078_v56 = vmax.f32 %v4587_v24, 0.0 }
 0x443   : > { %3773 = vmatprep.mubr.msk.bf16.mxu0 %vm4201_vm2, %v4200_v51 }
 0x444   : > { %v4770_v25 = vadd.f32 %v1226_v39, %v974_v14  ;;  %v1279_v30 = vmax.f32 %v4762_v32, 0.0 }
 0x446   : > { %v1280_v10 = vmax.f32 %v4770_v25, 0.0 }
 0x447   : > { %v1230_v13 = vpop.f32.mrb[60].mxu1 }
 0x448   : > { %v1291_v2 = vpack.c.bf16 %v1280_v10, %v1279_v30  ;;  %v1231_v11 = vadd.f32 %v4665_v29, %v1230_v13  ;;  %v1232_v28 = vpop.f32.mrb[61].mxu1 }
 0x449   : > { %v1233_v31 = vpop.f32.mrb[62].mxu1  ;;  %v6079_v28 = vmax.f32 %v4596_v35, 0.0 }
 0x44a   : > { %v4781_v34 = vadd.f32 %v1231_v11, %v6077_v4  ;;  %v1234_v8 = vadd.f32 %v4665_v29, %v1233_v31  ;;  %v1235_v14 = vpop.f32.mrb[63].mxu1  ;;  %3774 = vmatmul.mubr.msk.bf16.gmra.mrb[92].mxu0 %vm998_vm3, %v1291_v2 }
 0x44b   : > { %3777 = vmatprep.mubr.msk.bf16.mxu0 %vm4201_vm2, %v4200_v51 }
 0x44c   : > { %v4789_v19 = vadd.f32 %v1234_v8, %v6078_v56  ;;  %v6060_v22 = vmax.f32 %v4781_v34, 0.0  ;;  %v6080_v8 = vmax.f32 %v4602_v63, 0.0 }
 0x44e   : > { %v6059_v39 = vmax.f32 %v4789_v19, 0.0 }
 0x44f   : > { %v1238_v61 = vpop.f32.mrb[64].mxu1 }
 0x450   : > { %v1292_v18 = vpack.c.bf16 %v6059_v39, %v6060_v22  ;;  %v1239_v13 = vadd.f32 %v4665_v29, %v1238_v61  ;;  %v1240_v2 = vpop.f32.mrb[65].mxu1 }
 0x451   : > { %v1241_v11 = vpop.f32.mrb[66].mxu1 }
 0x452   : > { %v4800_v31 = vadd.f32 %v1239_v13, %v6079_v28  ;;  %v1242_v24 = vadd.f32 %v4665_v29, %v1241_v11  ;;  %v1243_v4 = vpop.f32.mrb[67].mxu1  ;;  %3778 = vmatmul.mubr.msk.bf16.gmra.mrb[96].mxu0 %vm998_vm3, %v1292_v18 }
 0x453   : > { %3781 = vmatprep.mubr.msk.bf16.mxu0 %vm4201_vm2, %v4200_v51 }
 0x454   : > { %v4808_v14 = vadd.f32 %v1242_v24, %v6080_v8  ;;  %v6058_v56 = vmax.f32 %v4800_v31, 0.0 }
 0x456   : > { %v6057_v61 = vmax.f32 %v4808_v14, 0.0 }
 0x457   : > { %v1246_v2 = vpop.f32.mrb[68].mxu1 }
 0x458   : > { %v1293_v35 = vpack.c.bf16 %v6057_v61, %v6058_v56  ;;  %v1247_v13 = vadd.f32 %v4665_v29, %v1246_v2  ;;  %v1248_v18 = vpop.f32.mrb[69].mxu1 }
 0x459   : > { %v1249_v11 = vpop.f32.mrb[70].mxu1 }
 0x45a   : > { %v1268_v28 = vadd.f32 %v1247_v13, %v4614_v26  ;;  %v1250_v4 = vpop.f32.mrb[71].mxu1  ;;  %3782 = vmatmul.mubr.msk.bf16.gmra.mrb[100].mxu0 %vm998_vm3, %v1293_v35  ;;  %v4094_v35 = vld [vmem:[%s6046_s4 + $0x10] sm:$0xff]  }
 0x45b   : > { %3785 = vmatprep.mubr.msk.bf16.mxu0 %vm4201_vm2, %v4200_v51  ;;  %3790 = vmatpush3.bf16.msra.mxu0 %v4094_v35 }
 0x45c   : > { %v4821_v63 = vmax.f32 %v1268_v28, 0.0  ;;  %3827 = vmatprep.subr.bf16.mxu0 %v4200_v51 }
 0x45e   : > { %v1294_v24 = vpack.c.bf16 %v4821_v63, %v4821_v63 }
 0x462   : > { %3786 = vmatmul.mubr.msk.bf16.gmra.mrb[104].mxu0 %vm998_vm3, %v1294_v24 }
 0x463   : > { %3791 = vmatprep.mubr.msk.bf16.mxu0 %vm4201_vm2, %v4200_v51 }
 0x4f5   : > { %v1367_v29 = vpop.f32.mrb[72].mxu0 }
 0x4f6   : > { %v3755_v8 = vpop.f32.mrb[73].mxu0 }
 0x4f7   : > { %v1370_v2 = vpop.f32.mrb[74].mxu0 }
 0x4f8   : > { %v1437_v26 = vpack.c.bf16 %v1370_v2, %v1367_v29  ;;  %v3756_v13 = vpop.f32.mrb[75].mxu0 }
 0x4fa   : > { %1456 = vmatpush1.bf16.msra.mxu1 %v1437_v26 }
 0x4fb   : > { %1457 = vmatprep.subr.bf16.mxu1 %v6061_v36 }
 0x4fd   : > { %v1375_v18 = vpop.f32.mrb[76].mxu0 }
 0x4fe   : > { %v3759_v11 = vpop.f32.mrb[77].mxu0 }
 0x4ff   : > { %v1378_v28 = vpop.f32.mrb[78].mxu0 }
 0x500   : > { %v1438_v4 = vpack.c.bf16 %v1378_v28, %v1375_v18  ;;  %v3760_v24 = vpop.f32.mrb[79].mxu0 }
 0x502   : > { %1458 = vmatpush1.bf16.msra.mxu1 %v1438_v4 }
 0x503   : > { %1459 = vmatprep.subr.bf16.mxu1 %v6061_v36 }
 0x505   : > { %v1383_v29 = vpop.f32.mrb[80].mxu0 }
 0x506   : > { %v3763_v8 = vpop.f32.mrb[81].mxu0 }
 0x507   : > { %v1386_v2 = vpop.f32.mrb[82].mxu0 }
 0x508   : > { %v1439_v26 = vpack.c.bf16 %v1386_v2, %v1383_v29  ;;  %v3764_v13 = vpop.f32.mrb[83].mxu0 }
 0x50a   : > { %1460 = vmatpush1.bf16.msra.mxu1 %v1439_v26 }
 0x50b   : > { %1461 = vmatprep.subr.bf16.mxu1 %v6061_v36 }
 0x50d   : > { %v1391_v61 = vpop.f32.mrb[84].mxu0 }
 0x50e   : > { %v3767_v56 = vpop.f32.mrb[85].mxu0 }
 0x50f   : > { %v1394_v11 = vpop.f32.mrb[86].mxu0 }
 0x510   : > { %v1440_v35 = vpack.c.bf16 %v1394_v11, %v1391_v61  ;;  %v3768_v39 = vpop.f32.mrb[87].mxu0 }
 0x512   : > { %1462 = vmatpush1.bf16.msra.mxu1 %v1440_v35 }
 0x513   : > { %1463 = vmatprep.subr.bf16.mxu1 %v6061_v36 }
 0x515   : > { %v1399_v18 = vpop.f32.mrb[88].mxu0 }
 0x516   : > { %v3771_v28 = vpop.f32.mrb[89].mxu0 }
 0x517   : > { %v1402_v4 = vpop.f32.mrb[90].mxu0 }
 0x518   : > { %v1441_v24 = vpack.c.bf16 %v1402_v4, %v1399_v18  ;;  %v3772_v22 = vpop.f32.mrb[91].mxu0 }
 0x51a   : > { %1464 = vmatpush1.bf16.msra.mxu1 %v1441_v24 }
 0x51b   : > { %1465 = vmatprep.subr.bf16.mxu1 %v6061_v36 }
 0x51d   : > { %v1407_v29 = vpop.f32.mrb[92].mxu0 }
 0x51e   : > { %v3775_v8 = vpop.f32.mrb[93].mxu0 }
 0x51f   : > { %v1410_v2 = vpop.f32.mrb[94].mxu0 }
 0x520   : > { %v1442_v26 = vpack.c.bf16 %v1410_v2, %v1407_v29  ;;  %v3776_v13 = vpop.f32.mrb[95].mxu0 }
 0x522   : > { %1466 = vmatpush1.bf16.msra.mxu1 %v1442_v26 }
 0x523   : > { %1467 = vmatprep.subr.bf16.mxu1 %v6061_v36 }
 0x525   : > { %v1415_v39 = vpop.f32.mrb[96].mxu0 }
 0x526   : > { %v3779_v56 = vpop.f32.mrb[97].mxu0 }
 0x527   : > { %v1418_v61 = vpop.f32.mrb[98].mxu0 }
 0x528   : > { %v1443_v11 = vpack.c.bf16 %v1418_v61, %v1415_v39  ;;  %v3780_v35 = vpop.f32.mrb[99].mxu0 }
 0x52a   : > { %1468 = vmatpush1.bf16.msra.mxu1 %v1443_v11 }
 0x52b   : > { %1469 = vmatprep.subr.bf16.mxu1 %v6061_v36 }
 0x52d   : > { %v1423_v22 = vpop.f32.mrb[100].mxu0 }
 0x52e   : > { %v3783_v18 = vpop.f32.mrb[101].mxu0 }
 0x52f   : > { %v1426_v28 = vpop.f32.mrb[102].mxu0 }
 0x530   : > { %v1444_v4 = vpack.c.bf16 %v1426_v28, %v1423_v22  ;;  %v3784_v24 = vpop.f32.mrb[103].mxu0 }
 0x532   : > { %1470 = vmatpush1.bf16.msra.mxu1 %v1444_v4 }
 0x533   : > { %1471 = vmatprep.subr.bf16.mxu1 %v6061_v36 }
 0x535   : > { %v1431_v29 = vpop.f32.mrb[104].mxu0 }
 0x536   : > { %v1445_v8 = vpack.c.bf16 %v1431_v29, %v1431_v29  ;;  %v3787_v2 = vpop.f32.mrb[105].mxu0 }
 0x537   : > { %v1434_v26 = vpop.f32.mrb[106].mxu0 }
 0x538   : > { %v1453_v13 = vsel %vm855_vm1, %v1445_v8, 0  ;;  %v3788_v56 = vpop.f32.mrb[107].mxu0 }
 0x539   : > { %1472 = vmatpush1.bf16.msra.mxu1 %v1453_v13 }
 0x53a   : > { %1762 = vmatprep.subr.bf16.mxu1 %v6061_v36 }
 0x53c   : > { %1488 = vmatmul.mubr.bf16.vlgmr.msra.gmra.mrb[72].mxu1 %v4409_v41  ;;  %v4872_v41 = vld [vmem:[%s6047_s5 + $0x1] ss:$0 sm:$0xff] }
 0x53d   : > { %3450 = vmatprep.mubr.msk.bf16.mxu1 %vm827_vm0, %v4412_v42 }
 0x544   : > { %1496 = vmatmul.mubr.bf16.gmra.mrb[76].mxu1 %v4419_v43 }
 0x545   : > { %3451 = vmatprep.mubr.msk.bf16.mxu1 %vm827_vm0, %v4422_v44 }
 0x54c   : > { %1504 = vmatmul.mubr.bf16.gmra.mrb[80].mxu1 %v4428_v45 }
 0x54d   : > { %3452 = vmatprep.mubr.msk.bf16.mxu1 %vm827_vm0, %v4431_v46 }
 0x554   : > { %1512 = vmatmul.mubr.bf16.gmra.mrb[84].mxu1 %v4437_v47 }
 0x555   : > { %3453 = vmatprep.mubr.msk.bf16.mxu1 %vm827_vm0, %v4440_v48 }
 0x55c   : > { %1520 = vmatmul.mubr.bf16.gmra.mrb[88].mxu1 %v4446_v49 }
 0x55d   : > { %3454 = vmatprep.mubr.msk.bf16.mxu1 %vm827_vm0, %v4449_v50 }
 0x564   : > { %1528 = vmatmul.mubr.bf16.gmra.mrb[92].mxu1 %v4455_v52 }
 0x565   : > { %3455 = vmatprep.mubr.msk.bf16.mxu1 %vm827_vm0, %v4458_v53 }
 0x56c   : > { %1536 = vmatmul.mubr.bf16.gmra.mrb[96].mxu1 %v4464_v54 }
 0x56d   : > { %3456 = vmatprep.mubr.msk.bf16.mxu1 %vm827_vm0, %v4467_v55 }
 0x574   : > { %1544 = vmatmul.mubr.bf16.gmra.mrb[100].mxu1 %v4474_v57 }
 0x575   : > { %3457 = vmatprep.mubr.msk.bf16.mxu1 %vm827_vm0, %v4476_v58 }
 0x57c   : > { %1552 = vmatmul.mubr.bf16.gmra.mrb[104].mxu1 %v4481_v59 }
 0x57d   : > { %3472 = vmatprep.mubr.msk.bf16.mxu1 %vm827_vm0, %v4390_v37 }
 0x60f   : > { %v1489_v42 = vpop.f32.mrb[72].mxu1 }
 0x610   : > { %v1490_v43 = vadd.f32 %v4872_v41, %v1489_v42  ;;  %v1491_v44 = vpop.f32.mrb[73].mxu1 }
 0x611   : > { %v1492_v45 = vpop.f32.mrb[74].mxu1 }
 0x612   : > { %v4877_v46 = vadd.f32 %v1490_v43, %v1269_v38  ;;  %v1493_v47 = vadd.f32 %v4872_v41, %v1492_v45  ;;  %v1494_v48 = vpop.f32.mrb[75].mxu1 }
 0x614   : > { %v4882_v37 = vadd.f32 %v1493_v47, %v1270_v60  ;;  %v1576_v49 = vmax.f32 %v4877_v46, 0.0 }
 0x616   : > { %v1577_v50 = vmax.f32 %v4882_v37, 0.0 }
 0x617   : > { %v1497_v52 = vpop.f32.mrb[76].mxu1 }
 0x618   : > { %v1593_v53 = vpack.c.bf16 %v1577_v50, %v1576_v49  ;;  %v1498_v54 = vadd.f32 %v4872_v41, %v1497_v52  ;;  %v1499_v55 = vpop.f32.mrb[77].mxu1 }
 0x619   : > { %v1500_v57 = vpop.f32.mrb[78].mxu1 }
 0x61a   : > { %v4893_v17 = vadd.f32 %v1498_v54, %v1271_v20  ;;  %v1501_v33 = vadd.f32 %v4872_v41, %v1500_v57  ;;  %v1502_v38 = vpop.f32.mrb[79].mxu1  ;;  %3792 = vmatmul.mubr.msk.bf16.vlgmr.msra.gmra.mrb[108].mxu0 %vm998_vm3, %v1593_v53 }
 0x61b   : > { %3795 = vmatprep.mubr.msk.bf16.mxu0 %vm4201_vm2, %v4200_v51 }
 0x61c   : > { %v4901_v60 = vadd.f32 %v1501_v33, %v1272_v15  ;;  %v1578_v39 = vmax.f32 %v4893_v17, 0.0 }
 0x61e   : > { %v1579_v61 = vmax.f32 %v4901_v60, 0.0 }
 0x61f   : > { %v1505_v11 = vpop.f32.mrb[80].mxu1 }
 0x620   : > { %v1594_v5 = vpack.c.bf16 %v1579_v61, %v1578_v39  ;;  %v1506_v20 = vadd.f32 %v4872_v41, %v1505_v11  ;;  %v1507_v35 = vpop.f32.mrb[81].mxu1 }
 0x621   : > { %v1508_v22 = vpop.f32.mrb[82].mxu1 }
 0x622   : > { %v4912_v18 = vadd.f32 %v1506_v20, %v1273_v62  ;;  %v1509_v6 = vadd.f32 %v4872_v41, %v1508_v22  ;;  %v1510_v15 = vpop.f32.mrb[83].mxu1  ;;  %3796 = vmatmul.mubr.msk.bf16.gmra.mrb[112].mxu0 %vm998_vm3, %v1594_v5 }
 0x623   : > { %3799 = vmatprep.mubr.msk.bf16.mxu0 %vm4201_vm2, %v4200_v51 }
 0x624   : > { %v4920_v28 = vadd.f32 %v1509_v6, %v1274_v3  ;;  %v1580_v4 = vmax.f32 %v4912_v18, 0.0  ;;  %v6081_v6 = vmax.f32 %v4781_v34, 0.0 }
 0x626   : > { %v1581_v24 = vmax.f32 %v4920_v28, 0.0 }
 0x627   : > { %v1513_v29 = vpop.f32.mrb[84].mxu1 }
 0x628   : > { %v1595_v40 = vpack.c.bf16 %v1581_v24, %v1580_v4  ;;  %v1514_v62 = vadd.f32 %v4872_v41, %v1513_v29  ;;  %v1515_v8 = vpop.f32.mrb[85].mxu1  ;;  %v6082_v29 = vmax.f32 %v4789_v19, 0.0 }
 0x629   : > { %v1516_v2 = vpop.f32.mrb[86].mxu1 }
 0x62a   : > { %v4931_v26 = vadd.f32 %v1514_v62, %v1275_v12  ;;  %v1517_v0 = vadd.f32 %v4872_v41, %v1516_v2  ;;  %v1518_v3 = vpop.f32.mrb[87].mxu1  ;;  %3800 = vmatmul.mubr.msk.bf16.gmra.mrb[116].mxu0 %vm998_vm3, %v1595_v40 }
 0x62b   : > { %3803 = vmatprep.mubr.msk.bf16.mxu0 %vm4201_vm2, %v4200_v51 }
 0x62c   : > { %v4939_v13 = vadd.f32 %v1517_v0, %v1276_v23  ;;  %v1582_v56 = vmax.f32 %v4931_v26, 0.0 }
 0x62e   : > { %v1583_v42 = vmax.f32 %v4939_v13, 0.0 }
 0x62f   : > { %v1521_v43 = vpop.f32.mrb[88].mxu1 }
 0x630   : > { %v1596_v27 = vpack.c.bf16 %v1583_v42, %v1582_v56  ;;  %v1522_v12 = vadd.f32 %v4872_v41, %v1521_v43  ;;  %v1523_v44 = vpop.f32.mrb[89].mxu1 }
 0x631   : > { %v1524_v45 = vpop.f32.mrb[90].mxu1 }
 0x632   : > { %v4950_v47 = vadd.f32 %v1522_v12, %v1277_v21  ;;  %v1525_v7 = vadd.f32 %v4872_v41, %v1524_v45  ;;  %v1526_v23 = vpop.f32.mrb[91].mxu1  ;;  %3804 = vmatmul.mubr.msk.bf16.gmra.mrb[120].mxu0 %vm998_vm3, %v1596_v27  ;;  %v6083_v27 = vmax.f32 %v4800_v31, 0.0  ;;  %v6084_v45 = vmax.f32 %v4808_v14, 0.0 }
 0x633   : > { %3807 = vmatprep.mubr.msk.bf16.mxu0 %vm4201_vm2, %v4200_v51 }
 0x634   : > { %v4958_v48 = vadd.f32 %v1525_v7, %v1278_v1  ;;  %v1584_v52 = vmax.f32 %v4950_v47, 0.0 }
 0x636   : > { %v1585_v53 = vmax.f32 %v4958_v48, 0.0 }
 0x637   : > { %v1529_v54 = vpop.f32.mrb[92].mxu1 }
 0x638   : > { %v1597_v9 = vpack.c.bf16 %v1585_v53, %v1584_v52  ;;  %v1530_v21 = vadd.f32 %v4872_v41, %v1529_v54  ;;  %v1531_v55 = vpop.f32.mrb[93].mxu1 }
 0x639   : > { %v1532_v57 = vpop.f32.mrb[94].mxu1 }
 0x63a   : > { %v4969_v33 = vadd.f32 %v1530_v21, %v1279_v30  ;;  %v1533_v16 = vadd.f32 %v4872_v41, %v1532_v57  ;;  %v1534_v1 = vpop.f32.mrb[95].mxu1  ;;  %3808 = vmatmul.mubr.msk.bf16.gmra.mrb[124].mxu0 %vm998_vm3, %v1597_v9 }
 0x63b   : > { %3811 = vmatprep.mubr.msk.bf16.mxu0 %vm4201_vm2, %v4200_v51 }
 0x63c   : > { %v4977_v38 = vadd.f32 %v1533_v16, %v1280_v10  ;;  %v1586_v11 = vmax.f32 %v4969_v33, 0.0 }
 0x63e   : > { %v1587_v5 = vmax.f32 %v4977_v38, 0.0 }
 0x63f   : > { %v1537_v20 = vpop.f32.mrb[96].mxu1 }
 0x640   : > { %v1598_v32 = vpack.c.bf16 %v1587_v5, %v1586_v11  ;;  %v1538_v30 = vadd.f32 %v4872_v41, %v1537_v20  ;;  %v1539_v35 = vpop.f32.mrb[97].mxu1 }
 0x641   : > { %v1540_v22 = vpop.f32.mrb[98].mxu1 }
 0x642   : > { %v4988_v15 = vadd.f32 %v1538_v30, %v6081_v6  ;;  %v1541_v25 = vadd.f32 %v4872_v41, %v1540_v22  ;;  %v1542_v10 = vpop.f32.mrb[99].mxu1  ;;  %3812 = vmatmul.mubr.msk.bf16.gmra.mrb[128].mxu0 %vm998_vm3, %v1598_v32  ;;  %v4095_v22 = vld [vmem:[%s6046_s4 + $0x18] sm:$0xff]  }
 0x643   : > { %3815 = vmatprep.mubr.msk.bf16.mxu0 %vm4201_vm2, %v4200_v51  ;;  %3828 = vmatpush3.bf16.msra.mxu0 %v4095_v22 }
 0x644   : > { %v4996_v40 = vadd.f32 %v1541_v25, %v6082_v29  ;;  %v1588_v62 = vmax.f32 %v4988_v15, 0.0  ;;  %3865 = vmatprep.subr.bf16.mxu0 %v4200_v51 }
 0x646   : > { %v1589_v8 = vmax.f32 %v4996_v40, 0.0 }
 0x647   : > { %v1545_v2 = vpop.f32.mrb[100].mxu1 }
 0x648   : > { %v1599_v34 = vpack.c.bf16 %v1589_v8, %v1588_v62  ;;  %v1546_v0 = vadd.f32 %v4872_v41, %v1545_v2  ;;  %v1547_v3 = vpop.f32.mrb[101].mxu1 }
 0x649   : > { %v1548_v43 = vpop.f32.mrb[102].mxu1 }
 0x64a   : > { %v5007_v12 = vadd.f32 %v1546_v0, %v6083_v27  ;;  %v1549_v19 = vadd.f32 %v4872_v41, %v1548_v43  ;;  %v1550_v44 = vpop.f32.mrb[103].mxu1  ;;  %3816 = vmatmul.mubr.msk.bf16.gmra.mrb[132].mxu0 %vm998_vm3, %v1599_v34 }
 0x64b   : > { %3819 = vmatprep.mubr.msk.bf16.mxu0 %vm4201_vm2, %v4200_v51 }
 0x64c   : > { %v5015_v7 = vadd.f32 %v1549_v19, %v6084_v45  ;;  %v1590_v23 = vmax.f32 %v5007_v12, 0.0 }
 0x64e   : > { %v1591_v54 = vmax.f32 %v5015_v7, 0.0 }
 0x64f   : > { %v1553_v9 = vpop.f32.mrb[104].mxu1 }
 0x650   : > { %v1600_v31 = vpack.c.bf16 %v1591_v54, %v1590_v23  ;;  %v1554_v21 = vadd.f32 %v4872_v41, %v1553_v9  ;;  %v1555_v55 = vpop.f32.mrb[105].mxu1 }
 0x651   : > { %v1556_v57 = vpop.f32.mrb[106].mxu1 }
 0x652   : > { %v1575_v16 = vadd.f32 %v1554_v21, %v4821_v63  ;;  %v1557_v1 = vpop.f32.mrb[107].mxu1  ;;  %3820 = vmatmul.mubr.msk.bf16.gmra.mrb[136].mxu0 %vm998_vm3, %v1600_v31 }
 0x653   : > { %3823 = vmatprep.mubr.msk.bf16.mxu0 %vm4201_vm2, %v4200_v51 }
 0x654   : > { %v5028_v14 = vmax.f32 %v1575_v16, 0.0 }
 0x656   : > { %v1601_v20 = vpack.c.bf16 %v5028_v14, %v5028_v14 }
 0x65a   : > { %3824 = vmatmul.mubr.msk.bf16.gmra.mrb[140].mxu0 %vm998_vm3, %v1601_v20 }
 0x65b   : > { %3829 = vmatprep.mubr.msk.bf16.mxu0 %vm4201_vm2, %v4200_v51 }
 0x6ed   : > { %v1674_v41 = vpop.f32.mrb[108].mxu0 }
 0x6ee   : > { %v3793_v32 = vpop.f32.mrb[109].mxu0 }
 0x6ef   : > { %v1677_v30 = vpop.f32.mrb[110].mxu0 }
 0x6f0   : > { %v1744_v63 = vpack.c.bf16 %v1677_v30, %v1674_v41  ;;  %v3794_v35 = vpop.f32.mrb[111].mxu0 }
 0x6f2   : > { %1763 = vmatpush1.bf16.msra.mxu1 %v1744_v63 }
 0x6f3   : > { %1764 = vmatprep.subr.bf16.mxu1 %v6061_v36 }
 0x6f5   : > { %v1682_v6 = vpop.f32.mrb[112].mxu0 }
 0x6f6   : > { %v3797_v25 = vpop.f32.mrb[113].mxu0 }
 0x6f7   : > { %v1685_v10 = vpop.f32.mrb[114].mxu0 }
 0x6f8   : > { %v1745_v29 = vpack.c.bf16 %v1685_v10, %v1682_v6  ;;  %v3798_v2 = vpop.f32.mrb[115].mxu0 }
 0x6fa   : > { %1765 = vmatpush1.bf16.msra.mxu1 %v1745_v29 }
 0x6fb   : > { %1766 = vmatprep.subr.bf16.mxu1 %v6061_v36 }
 0x6fd   : > { %v1690_v34 = vpop.f32.mrb[116].mxu0 }
 0x6fe   : > { %v3801_v0 = vpop.f32.mrb[117].mxu0 }
 0x6ff   : > { %v1693_v3 = vpop.f32.mrb[118].mxu0 }
 0x700   : > { %v1746_v43 = vpack.c.bf16 %v1693_v3, %v1690_v34  ;;  %v3802_v27 = vpop.f32.mrb[119].mxu0 }
 0x702   : > { %1767 = vmatpush1.bf16.msra.mxu1 %v1746_v43 }
 0x703   : > { %1768 = vmatprep.subr.bf16.mxu1 %v6061_v36 }
 0x705   : > { %v1698_v19 = vpop.f32.mrb[120].mxu0 }
 0x706   : > { %v3805_v44 = vpop.f32.mrb[121].mxu0 }
 0x707   : > { %v1701_v45 = vpop.f32.mrb[122].mxu0 }
 0x708   : > { %v1747_v9 = vpack.c.bf16 %v1701_v45, %v1698_v19  ;;  %v3806_v31 = vpop.f32.mrb[123].mxu0 }
 0x709   : > { %v5050_v31 = vld [vmem:[%s4368_s12] ss:$8 sps:$4 sm:$0xff]  }
 0x70a   : > { %1769 = vmatpush1.bf16.msra.mxu1 %v1747_v9 }
 0x70b   : > { %1770 = vmatprep.subr.bf16.mxu1 %v6061_v36 }
 0x70d   : > { %v1706_v21 = vpop.f32.mrb[124].mxu0 }
 0x70e   : > { %v3809_v55 = vpop.f32.mrb[125].mxu0 }
 0x70f   : > { %v1709_v57 = vpop.f32.mrb[126].mxu0  ;;  %v5059_v55 = vld [vmem:[%s4368_s12 + $0x10] ss:$8 sps:$4 sm:$0xff]  }
 0x710   : > { %v1748_v16 = vpack.c.bf16 %v1709_v57, %v1706_v21  ;;  %v3810_v1 = vpop.f32.mrb[127].mxu0  ;;  %v5054_v21 = vld [vmem:[%s4368_s12 + $0x14] ss:$8 sps:$4 sm:$0xff]   ;;  %v5063_v57 = vld [vmem:[%s4368_s12 + $0x24] ss:$8 sps:$4 sm:$0xff]  }
 0x711   : > { %v5072_v1 = vld [vmem:[%s4368_s12 + $0x34] ss:$8 sps:$4 sm:$0xff]  }
 0x712   : > { %1771 = vmatpush1.bf16.msra.mxu1 %v1748_v16  ;;  %v5068_v16 = vld [vmem:[%s4368_s12 + $0x20] ss:$8 sps:$4 sm:$0xff]  }
 0x713   : > { %1772 = vmatprep.subr.bf16.mxu1 %v6061_v36 }
 0x715   : > { %v1714_v20 = vpop.f32.mrb[128].mxu0 }
 0x716   : > { %v3813_v41 = vpop.f32.mrb[129].mxu0 }
 0x717   : > { %v1717_v32 = vpop.f32.mrb[130].mxu0  ;;  %v5081_v41 = vld [vmem:[%s4368_s12 + $0x44] ss:$8 sps:$4 sm:$0xff]  }
 0x718   : > { %v1749_v30 = vpack.c.bf16 %v1717_v32, %v1714_v20  ;;  %v3814_v63 = vpop.f32.mrb[131].mxu0  ;;  %v5077_v20 = vld [vmem:[%s4368_s12 + $0x30] ss:$8 sps:$4 sm:$0xff]   ;;  %v5086_v32 = vld [vmem:[%s4368_s12 + $0x40] ss:$8 sps:$4 sm:$0xff]  }
 0x719   : > { %v5095_v63 = vld [vmem:[%s4368_s12 + $0x50] ss:$8 sps:$4 sm:$0xff]  }
 0x71a   : > { %1773 = vmatpush1.bf16.msra.mxu1 %v1749_v30  ;;  %v5090_v30 = vld [vmem:[%s4368_s12 + $0x54] ss:$8 sps:$4 sm:$0xff]  }
 0x71b   : > { %1774 = vmatprep.subr.bf16.mxu1 %v6061_v36 }
 0x71d   : > { %v1722_v35 = vpop.f32.mrb[132].mxu0 }
 0x71e   : > { %v3817_v22 = vpop.f32.mrb[133].mxu0 }
 0x71f   : > { %v1725_v6 = vpop.f32.mrb[134].mxu0  ;;  %v5104_v22 = vld [vmem:[%s4368_s12 + $0x60] ss:$8 sps:$4 sm:$0xff]  }
 0x720   : > { %v1750_v25 = vpack.c.bf16 %v1725_v6, %v1722_v35  ;;  %v3818_v10 = vpop.f32.mrb[135].mxu0  ;;  %v5099_v35 = vld [vmem:[%s4368_s12 + $0x64] ss:$8 sps:$4 sm:$0xff]   ;;  %v5108_v6 = vld [vmem:[%s4368_s12 + $0x74] ss:$8 sps:$4 sm:$0xff]  }
 0x721   : > { %v5120_v10 = vld [vmem:[%s4368_s12 + $0x4] ss:$8 sps:$4 sm:$0xff]  }
 0x722   : > { %1775 = vmatpush1.bf16.msra.mxu1 %v1750_v25  ;;  %v5113_v25 = vld [vmem:[%s4368_s12 + $0x70] ss:$8 sps:$4 sm:$0xff]  }
 0x723   : > { %1776 = vmatprep.subr.bf16.mxu1 %v6061_v36 }
 0x725   : > { %v1730_v29 = vpop.f32.mrb[136].mxu0 }
 0x726   : > { %v3821_v2 = vpop.f32.mrb[137].mxu0 }
 0x727   : > { %v1733_v34 = vpop.f32.mrb[138].mxu0 }
 0x728   : > { %v1751_v0 = vpack.c.bf16 %v1733_v34, %v1730_v29  ;;  %v3822_v3 = vpop.f32.mrb[139].mxu0  ;;  %v5127_v29 = vld [vmem:[%s6047_s5 + $0x2] ss:$0 sm:$0xff] }
 0x72a   : > { %1777 = vmatpush1.bf16.msra.mxu1 %v1751_v0 }
 0x72b   : > { %1778 = vmatprep.subr.bf16.mxu1 %v6061_v36 }
 0x72d   : > { %v1738_v43 = vpop.f32.mrb[140].mxu0 }
 0x72e   : > { %v1752_v27 = vpack.c.bf16 %v1738_v43, %v1738_v43  ;;  %v3825_v19 = vpop.f32.mrb[141].mxu0 }
 0x72f   : > { %v1741_v44 = vpop.f32.mrb[142].mxu0 }
 0x730   : > { %v1760_v45 = vsel %vm855_vm1, %v1752_v27, 0  ;;  %v3826_v9 = vpop.f32.mrb[143].mxu0 }
 0x731   : > { %1779 = vmatpush1.bf16.msra.mxu1 %v1760_v45 }
 0x732   : > { %2069 = vmatprep.subr.bf16.mxu1 %v6061_v36 }
 0x734   : > { %1795 = vmatmul.mubr.bf16.vlgmr.msra.gmra.mrb[108].mxu1 %v5050_v31 }
 0x735   : > { %3473 = vmatprep.mubr.msk.bf16.mxu1 %vm827_vm0, %v5054_v21 }
 0x73c   : > { %1803 = vmatmul.mubr.bf16.gmra.mrb[112].mxu1 %v5059_v55 }
 0x73d   : > { %3474 = vmatprep.mubr.msk.bf16.mxu1 %vm827_vm0, %v5063_v57 }
 0x744   : > { %1811 = vmatmul.mubr.bf16.gmra.mrb[116].mxu1 %v5068_v16 }
 0x745   : > { %3475 = vmatprep.mubr.msk.bf16.mxu1 %vm827_vm0, %v5072_v1 }
 0x74c   : > { %1819 = vmatmul.mubr.bf16.gmra.mrb[120].mxu1 %v5077_v20 }
 0x74d   : > { %3476 = vmatprep.mubr.msk.bf16.mxu1 %vm827_vm0, %v5081_v41 }
 0x754   : > { %1827 = vmatmul.mubr.bf16.gmra.mrb[124].mxu1 %v5086_v32 }
 0x755   : > { %3477 = vmatprep.mubr.msk.bf16.mxu1 %vm827_vm0, %v5090_v30 }
 0x75c   : > { %1835 = vmatmul.mubr.bf16.gmra.mrb[128].mxu1 %v5095_v63 }
 0x75d   : > { %3478 = vmatprep.mubr.msk.bf16.mxu1 %vm827_vm0, %v5099_v35 }
 0x764   : > { %1843 = vmatmul.mubr.bf16.gmra.mrb[132].mxu1 %v5104_v22 }
 0x765   : > { %3479 = vmatprep.mubr.msk.bf16.mxu1 %vm827_vm0, %v5108_v6 }
 0x76c   : > { %1851 = vmatmul.mubr.bf16.gmra.mrb[136].mxu1 %v5113_v25 }
 0x76d   : > { %3480 = vmatprep.mubr.msk.bf16.mxu1 %vm827_vm0, %v4476_v58 }
 0x774   : > { %1859 = vmatmul.mubr.bf16.gmra.mrb[140].mxu1 %v4481_v59 }
 0x775   : > { %3495 = vmatprep.mubr.msk.bf16.mxu1 %vm827_vm0, %v5120_v10 }
 0x807   : > { %v1796_v2 = vpop.f32.mrb[108].mxu1 }
 0x808   : > { %v1797_v34 = vadd.f32 %v5127_v29, %v1796_v2  ;;  %v1798_v0 = vpop.f32.mrb[109].mxu1 }
 0x809   : > { %v1799_v3 = vpop.f32.mrb[110].mxu1 }
 0x80a   : > { %v5132_v43 = vadd.f32 %v1797_v34, %v1576_v49  ;;  %v1800_v27 = vadd.f32 %v5127_v29, %v1799_v3  ;;  %v1801_v19 = vpop.f32.mrb[111].mxu1 }
 0x80c   : > { %v5137_v44 = vadd.f32 %v1800_v27, %v1577_v50  ;;  %v1883_v45 = vmax.f32 %v5132_v43, 0.0 }
 0x80e   : > { %v1884_v9 = vmax.f32 %v5137_v44, 0.0 }
 0x80f   : > { %v1804_v36 = vpop.f32.mrb[112].mxu1 }
 0x810   : > { %v1900_v2 = vpack.c.bf16 %v1884_v9, %v1883_v45  ;;  %v1805_v46 = vadd.f32 %v5127_v29, %v1804_v36  ;;  %v1806_v49 = vpop.f32.mrb[113].mxu1 }
 0x811   : > { %v1807_v34 = vpop.f32.mrb[114].mxu1 }
 0x812   : > { %v5148_v0 = vadd.f32 %v1805_v46, %v1578_v39  ;;  %v1808_v37 = vadd.f32 %v5127_v29, %v1807_v34  ;;  %v1809_v50 = vpop.f32.mrb[115].mxu1  ;;  %3830 = vmatmul.mubr.msk.bf16.vlgmr.msra.gmra.mrb[144].mxu0 %vm998_vm3, %v1900_v2 }
 0x813   : > { %3833 = vmatprep.mubr.msk.bf16.mxu0 %vm4201_vm2, %v4200_v51 }
 0x814   : > { %v5156_v3 = vadd.f32 %v1808_v37, %v1579_v61  ;;  %v1885_v36 = vmax.f32 %v5148_v0, 0.0 }
 0x816   : > { %v1886_v27 = vmax.f32 %v5156_v3, 0.0 }
 0x817   : > { %v1812_v19 = vpop.f32.mrb[116].mxu1 }
 0x818   : > { %v1901_v17 = vpack.c.bf16 %v1886_v27, %v1885_v36  ;;  %v1813_v39 = vadd.f32 %v5127_v29, %v1812_v19  ;;  %v1814_v2 = vpop.f32.mrb[117].mxu1 }
 0x819   : > { %v1815_v46 = vpop.f32.mrb[118].mxu1 }
 0x81a   : > { %v5167_v49 = vadd.f32 %v1813_v39, %v1580_v4  ;;  %v1816_v60 = vadd.f32 %v5127_v29, %v1815_v46  ;;  %v1817_v61 = vpop.f32.mrb[119].mxu1  ;;  %3834 = vmatmul.mubr.msk.bf16.gmra.mrb[148].mxu0 %vm998_vm3, %v1901_v17 }
 0x81b   : > { %3837 = vmatprep.mubr.msk.bf16.mxu0 %vm4201_vm2, %v4200_v51 }
 0x81c   : > { %v5175_v34 = vadd.f32 %v1816_v60, %v1581_v24  ;;  %v1887_v37 = vmax.f32 %v5167_v49, 0.0 }
 0x81e   : > { %v1888_v50 = vmax.f32 %v5175_v34, 0.0 }
 0x81f   : > { %v1820_v19 = vpop.f32.mrb[120].mxu1 }
 0x820   : > { %v1902_v18 = vpack.c.bf16 %v1888_v50, %v1887_v37  ;;  %v1821_v4 = vadd.f32 %v5127_v29, %v1820_v19  ;;  %v1822_v17 = vpop.f32.mrb[121].mxu1 }
 0x821   : > { %v1823_v39 = vpop.f32.mrb[122].mxu1 }
 0x822   : > { %v5186_v2 = vadd.f32 %v1821_v4, %v1582_v56  ;;  %v1824_v28 = vadd.f32 %v5127_v29, %v1823_v39  ;;  %v1825_v24 = vpop.f32.mrb[123].mxu1  ;;  %3838 = vmatmul.mubr.msk.bf16.gmra.mrb[152].mxu0 %vm998_vm3, %v1902_v18 }
 0x823   : > { %3841 = vmatprep.mubr.msk.bf16.mxu0 %vm4201_vm2, %v4200_v51 }
 0x824   : > { %v5194_v46 = vadd.f32 %v1824_v28, %v1583_v42  ;;  %v1889_v60 = vmax.f32 %v5186_v2, 0.0 }
 0x826   : > { %v1890_v61 = vmax.f32 %v5194_v46, 0.0 }
 0x827   : > { %v1828_v19 = vpop.f32.mrb[124].mxu1 }
 0x828   : > { %v1903_v26 = vpack.c.bf16 %v1890_v61, %v1889_v60  ;;  %v1829_v56 = vadd.f32 %v5127_v29, %v1828_v19  ;;  %v1830_v18 = vpop.f32.mrb[125].mxu1 }
 0x829   : > { %v1831_v4 = vpop.f32.mrb[126].mxu1 }
 0x82a   : > { %v5205_v17 = vadd.f32 %v1829_v56, %v1584_v52  ;;  %v1832_v13 = vadd.f32 %v5127_v29, %v1831_v4  ;;  %v1833_v42 = vpop.f32.mrb[127].mxu1  ;;  %3842 = vmatmul.mubr.msk.bf16.gmra.mrb[156].mxu0 %vm998_vm3, %v1903_v26 }
 0x82b   : > { %3845 = vmatprep.mubr.msk.bf16.mxu0 %vm4201_vm2, %v4200_v51 }
 0x82c   : > { %v5213_v39 = vadd.f32 %v1832_v13, %v1585_v53  ;;  %v1891_v28 = vmax.f32 %v5205_v17, 0.0 }
 0x82e   : > { %v1892_v24 = vmax.f32 %v5213_v39, 0.0 }
 0x82f   : > { %v1836_v19 = vpop.f32.mrb[128].mxu1 }
 0x830   : > { %v1904_v47 = vpack.c.bf16 %v1892_v24, %v1891_v28  ;;  %v1837_v52 = vadd.f32 %v5127_v29, %v1836_v19  ;;  %v1838_v26 = vpop.f32.mrb[129].mxu1 }
 0x831   : > { %v1839_v56 = vpop.f32.mrb[130].mxu1 }
 0x832   : > { %v5224_v18 = vadd.f32 %v1837_v52, %v1586_v11  ;;  %v1840_v48 = vadd.f32 %v5127_v29, %v1839_v56  ;;  %v1841_v53 = vpop.f32.mrb[131].mxu1  ;;  %3846 = vmatmul.mubr.msk.bf16.gmra.mrb[160].mxu0 %vm998_vm3, %v1904_v47 }
 0x833   : > { %3849 = vmatprep.mubr.msk.bf16.mxu0 %vm4201_vm2, %v4200_v51 }
 0x834   : > { %v5232_v4 = vadd.f32 %v1840_v48, %v1587_v5  ;;  %v1893_v13 = vmax.f32 %v5224_v18, 0.0 }
 0x836   : > { %v1894_v42 = vmax.f32 %v5232_v4, 0.0 }
 0x837   : > { %v1844_v19 = vpop.f32.mrb[132].mxu1 }
 0x838   : > { %v1905_v33 = vpack.c.bf16 %v1894_v42, %v1893_v13  ;;  %v1845_v11 = vadd.f32 %v5127_v29, %v1844_v19  ;;  %v1846_v47 = vpop.f32.mrb[133].mxu1 }
 0x839   : > { %v1847_v52 = vpop.f32.mrb[134].mxu1 }
 0x83a   : > { %v5243_v26 = vadd.f32 %v1845_v11, %v1588_v62  ;;  %v1848_v38 = vadd.f32 %v5127_v29, %v1847_v52  ;;  %v1849_v5 = vpop.f32.mrb[135].mxu1  ;;  %3850 = vmatmul.mubr.msk.bf16.gmra.mrb[164].mxu0 %vm998_vm3, %v1905_v33 }
 0x83b   : > { %3853 = vmatprep.mubr.msk.bf16.mxu0 %vm4201_vm2, %v4200_v51 }
 0x83c   : > { %v5251_v56 = vadd.f32 %v1848_v38, %v1589_v8  ;;  %v6066_v48 = vmax.f32 %v5243_v26, 0.0 }
 0x83e   : > { %v6065_v53 = vmax.f32 %v5251_v56, 0.0 }
 0x83f   : > { %v1852_v19 = vpop.f32.mrb[136].mxu1 }
 0x840   : > { %v1906_v15 = vpack.c.bf16 %v6065_v53, %v6066_v48  ;;  %v1853_v62 = vadd.f32 %v5127_v29, %v1852_v19  ;;  %v1854_v33 = vpop.f32.mrb[137].mxu1 }
 0x841   : > { %v1855_v11 = vpop.f32.mrb[138].mxu1 }
 0x842   : > { %v5262_v47 = vadd.f32 %v1853_v62, %v1590_v23  ;;  %v1856_v40 = vadd.f32 %v5127_v29, %v1855_v11  ;;  %v1857_v8 = vpop.f32.mrb[139].mxu1  ;;  %3854 = vmatmul.mubr.msk.bf16.gmra.mrb[168].mxu0 %vm998_vm3, %v1906_v15 }
 0x843   : > { %3857 = vmatprep.mubr.msk.bf16.mxu0 %vm4201_vm2, %v4200_v51 }
 0x844   : > { %v5270_v52 = vadd.f32 %v1856_v40, %v1591_v54  ;;  %v6064_v38 = vmax.f32 %v5262_v47, 0.0 }
 0x846   : > { %v6063_v5 = vmax.f32 %v5270_v52, 0.0 }
 0x847   : > { %v1860_v19 = vpop.f32.mrb[140].mxu1 }
 0x848   : > { %v1907_v12 = vpack.c.bf16 %v6063_v5, %v6064_v38  ;;  %v1861_v23 = vadd.f32 %v5127_v29, %v1860_v19  ;;  %v1862_v15 = vpop.f32.mrb[141].mxu1 }
 0x849   : > { %v1863_v62 = vpop.f32.mrb[142].mxu1 }
 0x84a   : > { %v1882_v33 = vadd.f32 %v1861_v23, %v5028_v14  ;;  %v1864_v11 = vpop.f32.mrb[143].mxu1  ;;  %3858 = vmatmul.mubr.msk.bf16.gmra.mrb[172].mxu0 %vm998_vm3, %v1907_v12  ;;  %v6085_v12 = vmov 0   ;;  %v4096_v23 = vld [vmem:[%s6046_s4 + $0x20] sm:$0xff]  }
 0x84b   : > { %3861 = vmatprep.mubr.msk.bf16.mxu0 %vm4201_vm2, %v4200_v51  ;;  %3866 = vmatpush3.bf16.msra.mxu0 %v4096_v23 }
 0x84c   : > { %v5283_v7 = vmax.f32 %v1882_v33, 0.0  ;;  %3903 = vmatprep.subr.bf16.mxu0 %v4200_v51 }
 0x84e   : > { %v1908_v54 = vpack.c.bf16 %v5283_v7, %v5283_v7 }
 0x852   : > { %3862 = vmatmul.mubr.msk.bf16.gmra.mrb[176].mxu0 %vm998_vm3, %v1908_v54 }
 0x853   : > { %3867 = vmatprep.mubr.msk.bf16.mxu0 %vm4201_vm2, %v4200_v51 }
 0x8e5   : > { %v1981_v29 = vpop.f32.mrb[144].mxu0 }
 0x8e6   : > { %v3831_v40 = vpop.f32.mrb[145].mxu0 }
 0x8e7   : > { %v1984_v8 = vpop.f32.mrb[146].mxu0 }
 0x8e8   : > { %v2051_v14 = vpack.c.bf16 %v1984_v8, %v1981_v29  ;;  %v3832_v19 = vpop.f32.mrb[147].mxu0 }
 0x8ea   : > { %2070 = vmatpush1.bf16.msra.mxu1 %v2051_v14 }
 0x8eb   : > { %2071 = vmatprep.subr.bf16.mxu1 %v6085_v12 }
 0x8ed   : > { %v1989_v15 = vpop.f32.mrb[148].mxu0 }
 0x8ee   : > { %v3835_v62 = vpop.f32.mrb[149].mxu0 }
 0x8ef   : > { %v1992_v33 = vpop.f32.mrb[150].mxu0 }
 0x8f0   : > { %v2052_v11 = vpack.c.bf16 %v1992_v33, %v1989_v15  ;;  %v3836_v54 = vpop.f32.mrb[151].mxu0 }
 0x8f2   : > { %2072 = vmatpush1.bf16.msra.mxu1 %v2052_v11 }
 0x8f3   : > { %2073 = vmatprep.subr.bf16.mxu1 %v6085_v12 }
 0x8f5   : > { %v1997_v29 = vpop.f32.mrb[152].mxu0 }
 0x8f6   : > { %v3839_v40 = vpop.f32.mrb[153].mxu0 }
 0x8f7   : > { %v2000_v8 = vpop.f32.mrb[154].mxu0 }
 0x8f8   : > { %v2053_v14 = vpack.c.bf16 %v2000_v8, %v1997_v29  ;;  %v3840_v19 = vpop.f32.mrb[155].mxu0 }
 0x8fa   : > { %2074 = vmatpush1.bf16.msra.mxu1 %v2053_v14 }
 0x8fb   : > { %2075 = vmatprep.subr.bf16.mxu1 %v6085_v12 }
 0x8fd   : > { %v2005_v5 = vpop.f32.mrb[156].mxu0 }
 0x8fe   : > { %v3843_v38 = vpop.f32.mrb[157].mxu0 }
 0x8ff   : > { %v2008_v62 = vpop.f32.mrb[158].mxu0 }
 0x900   : > { %v2054_v23 = vpack.c.bf16 %v2008_v62, %v2005_v5  ;;  %v3844_v53 = vpop.f32.mrb[159].mxu0 }
 0x902   : > { %2076 = vmatpush1.bf16.msra.mxu1 %v2054_v23 }
 0x903   : > { %2077 = vmatprep.subr.bf16.mxu1 %v6085_v12 }
 0x905   : > { %v2013_v15 = vpop.f32.mrb[160].mxu0 }
 0x906   : > { %v3847_v33 = vpop.f32.mrb[161].mxu0 }
 0x907   : > { %v2016_v11 = vpop.f32.mrb[162].mxu0 }
 0x908   : > { %v2055_v54 = vpack.c.bf16 %v2016_v11, %v2013_v15  ;;  %v3848_v48 = vpop.f32.mrb[163].mxu0 }
 0x90a   : > { %2078 = vmatpush1.bf16.msra.mxu1 %v2055_v54 }
 0x90b   : > { %2079 = vmatprep.subr.bf16.mxu1 %v6085_v12 }
 0x90d   : > { %v2021_v29 = vpop.f32.mrb[164].mxu0 }
 0x90e   : > { %v3851_v40 = vpop.f32.mrb[165].mxu0 }
 0x90f   : > { %v2024_v8 = vpop.f32.mrb[166].mxu0 }
 0x910   : > { %v2056_v14 = vpack.c.bf16 %v2024_v8, %v2021_v29  ;;  %v3852_v19 = vpop.f32.mrb[167].mxu0 }
 0x912   : > { %2080 = vmatpush1.bf16.msra.mxu1 %v2056_v14 }
 0x913   : > { %2081 = vmatprep.subr.bf16.mxu1 %v6085_v12 }
 0x915   : > { %v2029_v53 = vpop.f32.mrb[168].mxu0 }
 0x916   : > { %v3855_v38 = vpop.f32.mrb[169].mxu0 }
 0x917   : > { %v2032_v5 = vpop.f32.mrb[170].mxu0 }
 0x918   : > { %v2057_v62 = vpack.c.bf16 %v2032_v5, %v2029_v53  ;;  %v3856_v23 = vpop.f32.mrb[171].mxu0  ;;  %v5334_v53 = vld [vmem:[%s6047_s5 + $0x3] ss:$0 sm:$0xff] }
 0x91a   : > { %2082 = vmatpush1.bf16.msra.mxu1 %v2057_v62 }
 0x91b   : > { %2083 = vmatprep.subr.bf16.mxu1 %v6085_v12 }
 0x91d   : > { %v2037_v48 = vpop.f32.mrb[172].mxu0 }
 0x91e   : > { %v3859_v15 = vpop.f32.mrb[173].mxu0 }
 0x91f   : > { %v2040_v33 = vpop.f32.mrb[174].mxu0 }
 0x920   : > { %v2058_v11 = vpack.c.bf16 %v2040_v33, %v2037_v48  ;;  %v3860_v54 = vpop.f32.mrb[175].mxu0 }
 0x922   : > { %2084 = vmatpush1.bf16.msra.mxu1 %v2058_v11 }
 0x923   : > { %2085 = vmatprep.subr.bf16.mxu1 %v6085_v12 }
 0x925   : > { %v2045_v29 = vpop.f32.mrb[176].mxu0 }
 0x926   : > { %v2059_v40 = vpack.c.bf16 %v2045_v29, %v2045_v29  ;;  %v3863_v8 = vpop.f32.mrb[177].mxu0 }
 0x927   : > { %v2048_v14 = vpop.f32.mrb[178].mxu0 }
 0x928   : > { %v2067_v19 = vsel %vm855_vm1, %v2059_v40, 0  ;;  %v3864_v38 = vpop.f32.mrb[179].mxu0 }
 0x929   : > { %2086 = vmatpush1.bf16.msra.mxu1 %v2067_v19 }
 0x92a   : > { %2376 = vmatprep.subr.bf16.mxu1 %v6085_v12 }
 0x92c   : > { %2102 = vmatmul.mubr.bf16.vlgmr.msra.gmra.mrb[144].mxu1 %v5050_v31 }
 0x92d   : > { %3496 = vmatprep.mubr.msk.bf16.mxu1 %vm827_vm0, %v5054_v21 }
 0x934   : > { %2110 = vmatmul.mubr.bf16.gmra.mrb[148].mxu1 %v5059_v55 }
 0x935   : > { %3497 = vmatprep.mubr.msk.bf16.mxu1 %vm827_vm0, %v5063_v57 }
 0x93c   : > { %2118 = vmatmul.mubr.bf16.gmra.mrb[152].mxu1 %v5068_v16 }
 0x93d   : > { %3498 = vmatprep.mubr.msk.bf16.mxu1 %vm827_vm0, %v5072_v1 }
 0x944   : > { %2126 = vmatmul.mubr.bf16.gmra.mrb[156].mxu1 %v5077_v20 }
 0x945   : > { %3499 = vmatprep.mubr.msk.bf16.mxu1 %vm827_vm0, %v5081_v41 }
 0x94c   : > { %2134 = vmatmul.mubr.bf16.gmra.mrb[160].mxu1 %v5086_v32 }
 0x94d   : > { %3500 = vmatprep.mubr.msk.bf16.mxu1 %vm827_vm0, %v5090_v30 }
 0x954   : > { %2142 = vmatmul.mubr.bf16.gmra.mrb[164].mxu1 %v5095_v63 }
 0x955   : > { %3501 = vmatprep.mubr.msk.bf16.mxu1 %vm827_vm0, %v5099_v35 }
 0x95c   : > { %2150 = vmatmul.mubr.bf16.gmra.mrb[168].mxu1 %v5104_v22 }
 0x95d   : > { %3502 = vmatprep.mubr.msk.bf16.mxu1 %vm827_vm0, %v5108_v6 }
 0x964   : > { %2158 = vmatmul.mubr.bf16.gmra.mrb[172].mxu1 %v5113_v25 }
 0x965   : > { %3503 = vmatprep.mubr.msk.bf16.mxu1 %vm827_vm0, %v4476_v58 }
 0x96c   : > { %2166 = vmatmul.mubr.bf16.gmra.mrb[176].mxu1 %v4481_v59 }
 0x96d   : > { %3518 = vmatprep.mubr.msk.bf16.mxu1 %vm827_vm0, %v5120_v10 }
 0x9ff   : > { %v2103_v5 = vpop.f32.mrb[144].mxu1 }
 0xa00   : > { %v2104_v62 = vadd.f32 %v5334_v53, %v2103_v5  ;;  %v2105_v23 = vpop.f32.mrb[145].mxu1 }
 0xa01   : > { %v2106_v48 = vpop.f32.mrb[146].mxu1 }
 0xa02   : > { %v5339_v15 = vadd.f32 %v2104_v62, %v1883_v45  ;;  %v2107_v33 = vadd.f32 %v5334_v53, %v2106_v48  ;;  %v2108_v11 = vpop.f32.mrb[147].mxu1 }
 0xa04   : > { %v5344_v54 = vadd.f32 %v2107_v33, %v1884_v9  ;;  %v2190_v29 = vmax.f32 %v5339_v15, 0.0 }
 0xa06   : > { %v2191_v40 = vmax.f32 %v5344_v54, 0.0 }
 0xa07   : > { %v2111_v8 = vpop.f32.mrb[148].mxu1 }
 0xa08   : > { %v2207_v14 = vpack.c.bf16 %v2191_v40, %v2190_v29  ;;  %v2112_v43 = vadd.f32 %v5334_v53, %v2111_v8  ;;  %v2113_v45 = vpop.f32.mrb[149].mxu1 }
 0xa09   : > { %v2114_v19 = vpop.f32.mrb[150].mxu1 }
 0xa0a   : > { %v5355_v38 = vadd.f32 %v2112_v43, %v1885_v36  ;;  %v2115_v44 = vadd.f32 %v5334_v53, %v2114_v19  ;;  %v2116_v9 = vpop.f32.mrb[151].mxu1  ;;  %3868 = vmatmul.mubr.msk.bf16.vlgmr.msra.gmra.mrb[180].mxu0 %vm998_vm3, %v2207_v14 }
 0xa0b   : > { %3871 = vmatprep.mubr.msk.bf16.mxu0 %vm4201_vm2, %v4200_v51 }
 0xa0c   : > { %v5363_v5 = vadd.f32 %v2115_v44, %v1886_v27  ;;  %v2192_v62 = vmax.f32 %v5355_v38, 0.0 }
 0xa0e   : > { %v2193_v23 = vmax.f32 %v5363_v5, 0.0 }
 0xa0f   : > { %v2119_v48 = vpop.f32.mrb[152].mxu1 }
 0xa10   : > { %v2208_v0 = vpack.c.bf16 %v2193_v23, %v2192_v62  ;;  %v2120_v36 = vadd.f32 %v5334_v53, %v2119_v48  ;;  %v2121_v33 = vpop.f32.mrb[153].mxu1 }
 0xa11   : > { %v2122_v11 = vpop.f32.mrb[154].mxu1 }
 0xa12   : > { %v5374_v8 = vadd.f32 %v2120_v36, %v1887_v37  ;;  %v2123_v3 = vadd.f32 %v5334_v53, %v2122_v11  ;;  %v2124_v27 = vpop.f32.mrb[155].mxu1  ;;  %3872 = vmatmul.mubr.msk.bf16.gmra.mrb[184].mxu0 %vm998_vm3, %v2208_v0 }
 0xa13   : > { %3875 = vmatprep.mubr.msk.bf16.mxu0 %vm4201_vm2, %v4200_v51 }
 0xa14   : > { %v5382_v14 = vadd.f32 %v2123_v3, %v1888_v50  ;;  %v2194_v43 = vmax.f32 %v5374_v8, 0.0 }
 0xa16   : > { %v2195_v45 = vmax.f32 %v5382_v14, 0.0 }
 0xa17   : > { %v2127_v19 = vpop.f32.mrb[156].mxu1 }
 0xa18   : > { %v2209_v49 = vpack.c.bf16 %v2195_v45, %v2194_v43  ;;  %v2128_v37 = vadd.f32 %v5334_v53, %v2127_v19  ;;  %v2129_v44 = vpop.f32.mrb[157].mxu1 }
 0xa19   : > { %v2130_v9 = vpop.f32.mrb[158].mxu1 }
 0xa1a   : > { %v5393_v48 = vadd.f32 %v2128_v37, %v1889_v60  ;;  %v2131_v34 = vadd.f32 %v5334_v53, %v2130_v9  ;;  %v2132_v50 = vpop.f32.mrb[159].mxu1  ;;  %3876 = vmatmul.mubr.msk.bf16.gmra.mrb[188].mxu0 %vm998_vm3, %v2209_v49 }
 0xa1b   : > { %3879 = vmatprep.mubr.msk.bf16.mxu0 %vm4201_vm2, %v4200_v51 }
 0xa1c   : > { %v5401_v0 = vadd.f32 %v2131_v34, %v1890_v61  ;;  %v2196_v36 = vmax.f32 %v5393_v48, 0.0 }
 0xa1e   : > { %v2197_v33 = vmax.f32 %v5401_v0, 0.0 }
 0xa1f   : > { %v2135_v11 = vpop.f32.mrb[160].mxu1 }
 0xa20   : > { %v2210_v2 = vpack.c.bf16 %v2197_v33, %v2196_v36  ;;  %v2136_v60 = vadd.f32 %v5334_v53, %v2135_v11  ;;  %v2137_v3 = vpop.f32.mrb[161].mxu1 }
 0xa21   : > { %v2138_v27 = vpop.f32.mrb[162].mxu1 }
 0xa22   : > { %v5412_v19 = vadd.f32 %v2136_v60, %v1891_v28  ;;  %v2139_v46 = vadd.f32 %v5334_v53, %v2138_v27  ;;  %v2140_v61 = vpop.f32.mrb[163].mxu1  ;;  %3880 = vmatmul.mubr.msk.bf16.gmra.mrb[192].mxu0 %vm998_vm3, %v2210_v2 }
 0xa23   : > { %3883 = vmatprep.mubr.msk.bf16.mxu0 %vm4201_vm2, %v4200_v51 }
 0xa24   : > { %v5420_v49 = vadd.f32 %v2139_v46, %v1892_v24  ;;  %v2198_v37 = vmax.f32 %v5412_v19, 0.0 }
 0xa26   : > { %v2199_v44 = vmax.f32 %v5420_v49, 0.0 }
 0xa27   : > { %v2143_v9 = vpop.f32.mrb[164].mxu1 }
 0xa28   : > { %v2211_v17 = vpack.c.bf16 %v2199_v44, %v2198_v37  ;;  %v2144_v28 = vadd.f32 %v5334_v53, %v2143_v9  ;;  %v2145_v34 = vpop.f32.mrb[165].mxu1  ;;  %v6086_v9 = vmax.f32 %v5243_v26, 0.0 }
 0xa29   : > { %v2146_v50 = vpop.f32.mrb[166].mxu1 }
 0xa2a   : > { %v5431_v11 = vadd.f32 %v2144_v28, %v1893_v13  ;;  %v2147_v39 = vadd.f32 %v5334_v53, %v2146_v50  ;;  %v2148_v24 = vpop.f32.mrb[167].mxu1  ;;  %3884 = vmatmul.mubr.msk.bf16.gmra.mrb[196].mxu0 %vm998_vm3, %v2211_v17  ;;  %v6087_v28 = vmax.f32 %v5251_v56, 0.0 }
 0xa2b   : > { %3887 = vmatprep.mubr.msk.bf16.mxu0 %vm4201_vm2, %v4200_v51 }
 0xa2c   : > { %v5439_v2 = vadd.f32 %v2147_v39, %v1894_v42  ;;  %v2200_v60 = vmax.f32 %v5431_v11, 0.0 }
 0xa2e   : > { %v2201_v3 = vmax.f32 %v5439_v2, 0.0 }
 0xa2f   : > { %v2151_v27 = vpop.f32.mrb[168].mxu1 }
 0xa30   : > { %v2212_v18 = vpack.c.bf16 %v2201_v3, %v2200_v60  ;;  %v2152_v13 = vadd.f32 %v5334_v53, %v2151_v27  ;;  %v2153_v46 = vpop.f32.mrb[169].mxu1 }
 0xa31   : > { %v2154_v61 = vpop.f32.mrb[170].mxu1  ;;  %v6088_v46 = vmax.f32 %v5262_v47, 0.0 }
 0xa32   : > { %v5450_v17 = vadd.f32 %v2152_v13, %v6086_v9  ;;  %v2155_v4 = vadd.f32 %v5334_v53, %v2154_v61  ;;  %v2156_v42 = vpop.f32.mrb[171].mxu1  ;;  %3888 = vmatmul.mubr.msk.bf16.gmra.mrb[200].mxu0 %vm998_vm3, %v2212_v18 }
 0xa33   : > { %3891 = vmatprep.mubr.msk.bf16.mxu0 %vm4201_vm2, %v4200_v51 }
 0xa34   : > { %v5458_v34 = vadd.f32 %v2155_v4, %v6087_v28  ;;  %v6070_v50 = vmax.f32 %v5450_v17, 0.0  ;;  %v6089_v4 = vmax.f32 %v5270_v52, 0.0 }
 0xa36   : > { %v6069_v39 = vmax.f32 %v5458_v34, 0.0 }
 0xa37   : > { %v2159_v24 = vpop.f32.mrb[172].mxu1 }
 0xa38   : > { %v2213_v26 = vpack.c.bf16 %v6069_v39, %v6070_v50  ;;  %v2160_v27 = vadd.f32 %v5334_v53, %v2159_v24  ;;  %v2161_v18 = vpop.f32.mrb[173].mxu1 }
 0xa39   : > { %v2162_v13 = vpop.f32.mrb[174].mxu1 }
 0xa3a   : > { %v5469_v61 = vadd.f32 %v2160_v27, %v6088_v46  ;;  %v2163_v56 = vadd.f32 %v5334_v53, %v2162_v13  ;;  %v2164_v9 = vpop.f32.mrb[175].mxu1  ;;  %3892 = vmatmul.mubr.msk.bf16.gmra.mrb[204].mxu0 %vm998_vm3, %v2213_v26 }
 0xa3b   : > { %3895 = vmatprep.mubr.msk.bf16.mxu0 %vm4201_vm2, %v4200_v51 }
 0xa3c   : > { %v5477_v42 = vadd.f32 %v2163_v56, %v6089_v4  ;;  %v6068_v28 = vmax.f32 %v5469_v61, 0.0 }
 0xa3e   : > { %v6067_v24 = vmax.f32 %v5477_v42, 0.0 }
 0xa3f   : > { %v2167_v18 = vpop.f32.mrb[176].mxu1 }
 0xa40   : > { %v2214_v47 = vpack.c.bf16 %v6067_v24, %v6068_v28  ;;  %v2168_v27 = vadd.f32 %v5334_v53, %v2167_v18  ;;  %v2169_v26 = vpop.f32.mrb[177].mxu1 }
 0xa41   : > { %v2170_v13 = vpop.f32.mrb[178].mxu1 }
 0xa42   : > { %v2189_v46 = vadd.f32 %v2168_v27, %v5283_v7  ;;  %v2171_v9 = vpop.f32.mrb[179].mxu1  ;;  %3896 = vmatmul.mubr.msk.bf16.gmra.mrb[208].mxu0 %vm998_vm3, %v2214_v47  ;;  %v4097_v47 = vld [vmem:[%s6046_s4 + $0x28] sm:$0xff]  }
 0xa43   : > { %3899 = vmatprep.mubr.msk.bf16.mxu0 %vm4201_vm2, %v4200_v51  ;;  %3904 = vmatpush3.bf16.msra.mxu0 %v4097_v47 }
 0xa44   : > { %v5490_v52 = vmax.f32 %v2189_v46, 0.0  ;;  %3941 = vmatprep.subr.bf16.mxu0 %v4200_v51 }
 0xa46   : > { %v2215_v56 = vpack.c.bf16 %v5490_v52, %v5490_v52 }
 0xa4a   : > { %3900 = vmatmul.mubr.msk.bf16.gmra.mrb[212].mxu0 %vm998_vm3, %v2215_v56 }
 0xa4b   : > { %3905 = vmatprep.mubr.msk.bf16.mxu0 %vm4201_vm2, %v4200_v51 }
 0xadd   : > { %v2288_v53 = vpop.f32.mrb[180].mxu0 }
 0xade   : > { %v3869_v4 = vpop.f32.mrb[181].mxu0 }
 0xadf   : > { %v2291_v18 = vpop.f32.mrb[182].mxu0 }
 0xae0   : > { %v2358_v7 = vpack.c.bf16 %v2291_v18, %v2288_v53  ;;  %v3870_v27 = vpop.f32.mrb[183].mxu0 }
 0xae2   : > { %2377 = vmatpush1.bf16.msra.mxu1 %v2358_v7 }
 0xae3   : > { %2378 = vmatprep.subr.bf16.mxu1 %v6085_v12 }
 0xae5   : > { %v2296_v26 = vpop.f32.mrb[184].mxu0 }
 0xae6   : > { %v3873_v13 = vpop.f32.mrb[185].mxu0 }
 0xae7   : > { %v2299_v46 = vpop.f32.mrb[186].mxu0 }
 0xae8   : > { %v2359_v9 = vpack.c.bf16 %v2299_v46, %v2296_v26  ;;  %v3874_v56 = vpop.f32.mrb[187].mxu0 }
 0xaea   : > { %2379 = vmatpush1.bf16.msra.mxu1 %v2359_v9 }
 0xaeb   : > { %2380 = vmatprep.subr.bf16.mxu1 %v6085_v12 }
 0xaed   : > { %v2304_v53 = vpop.f32.mrb[188].mxu0 }
 0xaee   : > { %v3877_v4 = vpop.f32.mrb[189].mxu0 }
 0xaef   : > { %v2307_v18 = vpop.f32.mrb[190].mxu0 }
 0xaf0   : > { %v2360_v7 = vpack.c.bf16 %v2307_v18, %v2304_v53  ;;  %v3878_v27 = vpop.f32.mrb[191].mxu0 }
 0xaf2   : > { %2381 = vmatpush1.bf16.msra.mxu1 %v2360_v7 }
 0xaf3   : > { %2382 = vmatprep.subr.bf16.mxu1 %v6085_v12 }
 0xaf5   : > { %v2312_v24 = vpop.f32.mrb[192].mxu0 }
 0xaf6   : > { %v3881_v28 = vpop.f32.mrb[193].mxu0 }
 0xaf7   : > { %v2315_v13 = vpop.f32.mrb[194].mxu0 }
 0xaf8   : > { %v2361_v47 = vpack.c.bf16 %v2315_v13, %v2312_v24  ;;  %v3882_v39 = vpop.f32.mrb[195].mxu0 }
 0xafa   : > { %2383 = vmatpush1.bf16.msra.mxu1 %v2361_v47 }
 0xafb   : > { %2384 = vmatprep.subr.bf16.mxu1 %v6085_v12 }
 0xafd   : > { %v2320_v26 = vpop.f32.mrb[196].mxu0 }
 0xafe   : > { %v3885_v46 = vpop.f32.mrb[197].mxu0 }
 0xaff   : > { %v2323_v9 = vpop.f32.mrb[198].mxu0 }
 0xb00   : > { %v2362_v56 = vpack.c.bf16 %v2323_v9, %v2320_v26  ;;  %v3886_v50 = vpop.f32.mrb[199].mxu0 }
 0xb02   : > { %2385 = vmatpush1.bf16.msra.mxu1 %v2362_v56 }
 0xb03   : > { %2386 = vmatprep.subr.bf16.mxu1 %v6085_v12 }
 0xb05   : > { %v2328_v53 = vpop.f32.mrb[200].mxu0 }
 0xb06   : > { %v3889_v4 = vpop.f32.mrb[201].mxu0 }
 0xb07   : > { %v2331_v18 = vpop.f32.mrb[202].mxu0 }
 0xb08   : > { %v2363_v7 = vpack.c.bf16 %v2331_v18, %v2328_v53  ;;  %v3890_v27 = vpop.f32.mrb[203].mxu0 }
 0xb0a   : > { %2387 = vmatpush1.bf16.msra.mxu1 %v2363_v7 }
 0xb0b   : > { %2388 = vmatprep.subr.bf16.mxu1 %v6085_v12 }
 0xb0d   : > { %v2336_v39 = vpop.f32.mrb[204].mxu0 }
 0xb0e   : > { %v3893_v28 = vpop.f32.mrb[205].mxu0 }
 0xb0f   : > { %v2339_v24 = vpop.f32.mrb[206].mxu0 }
 0xb10   : > { %v2364_v13 = vpack.c.bf16 %v2339_v24, %v2336_v39  ;;  %v3894_v47 = vpop.f32.mrb[207].mxu0 }
 0xb12   : > { %2389 = vmatpush1.bf16.msra.mxu1 %v2364_v13 }
 0xb13   : > { %2390 = vmatprep.subr.bf16.mxu1 %v6085_v12 }
 0xb15   : > { %v2344_v50 = vpop.f32.mrb[208].mxu0 }
 0xb16   : > { %v3897_v26 = vpop.f32.mrb[209].mxu0 }
 0xb17   : > { %v2347_v46 = vpop.f32.mrb[210].mxu0 }
 0xb18   : > { %v2365_v9 = vpack.c.bf16 %v2347_v46, %v2344_v50  ;;  %v3898_v56 = vpop.f32.mrb[211].mxu0 }
 0xb1a   : > { %2391 = vmatpush1.bf16.msra.mxu1 %v2365_v9 }
 0xb1b   : > { %2392 = vmatprep.subr.bf16.mxu1 %v6085_v12 }
 0xb1d   : > { %v2352_v53 = vpop.f32.mrb[212].mxu0 }
 0xb1e   : > { %v2366_v4 = vpack.c.bf16 %v2352_v53, %v2352_v53  ;;  %v3901_v18 = vpop.f32.mrb[213].mxu0 }
 0xb1f   : > { %v2355_v7 = vpop.f32.mrb[214].mxu0 }
 0xb20   : > { %v2374_v27 = vsel %vm855_vm1, %v2366_v4, 0  ;;  %v3902_v28 = vpop.f32.mrb[215].mxu0 }
 0xb21   : > { %2393 = vmatpush1.bf16.msra.mxu1 %v2374_v27 }
 0xb22   : > { %2683 = vmatprep.subr.bf16.mxu1 %v6085_v12 }
 0xb24   : > { %2409 = vmatmul.mubr.bf16.vlgmr.msra.gmra.mrb[180].mxu1 %v5050_v31  ;;  %v5541_v31 = vld [vmem:[%s6047_s5 + $0x4] ss:$0 sm:$0xff] }
 0xb25   : > { %3519 = vmatprep.mubr.msk.bf16.mxu1 %vm827_vm0, %v5054_v21 }
 0xb2c   : > { %2417 = vmatmul.mubr.bf16.gmra.mrb[184].mxu1 %v5059_v55 }
 0xb2d   : > { %3520 = vmatprep.mubr.msk.bf16.mxu1 %vm827_vm0, %v5063_v57 }
 0xb34   : > { %2425 = vmatmul.mubr.bf16.gmra.mrb[188].mxu1 %v5068_v16 }
 0xb35   : > { %3521 = vmatprep.mubr.msk.bf16.mxu1 %vm827_vm0, %v5072_v1 }
 0xb3c   : > { %2433 = vmatmul.mubr.bf16.gmra.mrb[192].mxu1 %v5077_v20 }
 0xb3d   : > { %3522 = vmatprep.mubr.msk.bf16.mxu1 %vm827_vm0, %v5081_v41 }
 0xb44   : > { %2441 = vmatmul.mubr.bf16.gmra.mrb[196].mxu1 %v5086_v32 }
 0xb45   : > { %3523 = vmatprep.mubr.msk.bf16.mxu1 %vm827_vm0, %v5090_v30 }
 0xb4c   : > { %2449 = vmatmul.mubr.bf16.gmra.mrb[200].mxu1 %v5095_v63 }
 0xb4d   : > { %3524 = vmatprep.mubr.msk.bf16.mxu1 %vm827_vm0, %v5099_v35 }
 0xb54   : > { %2457 = vmatmul.mubr.bf16.gmra.mrb[204].mxu1 %v5104_v22 }
 0xb55   : > { %3525 = vmatprep.mubr.msk.bf16.mxu1 %vm827_vm0, %v5108_v6 }
 0xb5c   : > { %2465 = vmatmul.mubr.bf16.gmra.mrb[208].mxu1 %v5113_v25 }
 0xb5d   : > { %3526 = vmatprep.mubr.msk.bf16.mxu1 %vm827_vm0, %v4476_v58 }
 0xb64   : > { %2473 = vmatmul.mubr.bf16.gmra.mrb[212].mxu1 %v4481_v59 }
 0xb65   : > { %3541 = vmatprep.mubr.msk.bf16.mxu1 %vm827_vm0, %v5120_v10 }
 0xbf7   : > { %v2410_v21 = vpop.f32.mrb[180].mxu1 }
 0xbf8   : > { %v2411_v55 = vadd.f32 %v5541_v31, %v2410_v21  ;;  %v2412_v57 = vpop.f32.mrb[181].mxu1 }
 0xbf9   : > { %v2413_v16 = vpop.f32.mrb[182].mxu1 }
 0xbfa   : > { %v5546_v1 = vadd.f32 %v2411_v55, %v2190_v29  ;;  %v2414_v20 = vadd.f32 %v5541_v31, %v2413_v16  ;;  %v2415_v41 = vpop.f32.mrb[183].mxu1 }
 0xbfc   : > { %v5551_v32 = vadd.f32 %v2414_v20, %v2191_v40  ;;  %v2497_v30 = vmax.f32 %v5546_v1, 0.0 }
 0xbfe   : > { %v2498_v63 = vmax.f32 %v5551_v32, 0.0 }
 0xbff   : > { %v2418_v35 = vpop.f32.mrb[184].mxu1 }
 0xc00   : > { %v2514_v22 = vpack.c.bf16 %v2498_v63, %v2497_v30  ;;  %v2419_v6 = vadd.f32 %v5541_v31, %v2418_v35  ;;  %v2420_v25 = vpop.f32.mrb[185].mxu1 }
 0xc01   : > { %v2421_v10 = vpop.f32.mrb[186].mxu1 }
 0xc02   : > { %v5562_v15 = vadd.f32 %v2419_v6, %v2192_v62  ;;  %v2422_v54 = vadd.f32 %v5541_v31, %v2421_v10  ;;  %v2423_v29 = vpop.f32.mrb[187].mxu1  ;;  %3906 = vmatmul.mubr.msk.bf16.vlgmr.msra.gmra.mrb[216].mxu0 %vm998_vm3, %v2514_v22 }
 0xc03   : > { %3909 = vmatprep.mubr.msk.bf16.mxu0 %vm4201_vm2, %v4200_v51 }
 0xc04   : > { %v5570_v40 = vadd.f32 %v2422_v54, %v2193_v23  ;;  %v2499_v39 = vmax.f32 %v5562_v15, 0.0 }
 0xc06   : > { %v2500_v24 = vmax.f32 %v5570_v40, 0.0 }
 0xc07   : > { %v2426_v13 = vpop.f32.mrb[188].mxu1 }
 0xc08   : > { %v2515_v38 = vpack.c.bf16 %v2500_v24, %v2499_v39  ;;  %v2427_v62 = vadd.f32 %v5541_v31, %v2426_v13  ;;  %v2428_v47 = vpop.f32.mrb[189].mxu1 }
 0xc09   : > { %v2429_v50 = vpop.f32.mrb[190].mxu1 }
 0xc0a   : > { %v5581_v26 = vadd.f32 %v2427_v62, %v2194_v43  ;;  %v2430_v5 = vadd.f32 %v5541_v31, %v2429_v50  ;;  %v2431_v23 = vpop.f32.mrb[191].mxu1  ;;  %3910 = vmatmul.mubr.msk.bf16.gmra.mrb[220].mxu0 %vm998_vm3, %v2515_v38 }
 0xc0b   : > { %3913 = vmatprep.mubr.msk.bf16.mxu0 %vm4201_vm2, %v4200_v51 }
 0xc0c   : > { %v5589_v46 = vadd.f32 %v2430_v5, %v2195_v45  ;;  %v2501_v9 = vmax.f32 %v5581_v26, 0.0  ;;  %v6090_v5 = vmax.f32 %v5450_v17, 0.0 }
 0xc0e   : > { %v2502_v56 = vmax.f32 %v5589_v46, 0.0 }
 0xc0f   : > { %v2434_v53 = vpop.f32.mrb[192].mxu1 }
 0xc10   : > { %v2516_v8 = vpack.c.bf16 %v2502_v56, %v2501_v9  ;;  %v2435_v43 = vadd.f32 %v5541_v31, %v2434_v53  ;;  %v2436_v4 = vpop.f32.mrb[193].mxu1  ;;  %v6091_v53 = vmax.f32 %v5458_v34, 0.0 }
 0xc11   : > { %v2437_v18 = vpop.f32.mrb[194].mxu1 }
 0xc12   : > { %v5600_v7 = vadd.f32 %v2435_v43, %v2196_v36  ;;  %v2438_v14 = vadd.f32 %v5541_v31, %v2437_v18  ;;  %v2439_v45 = vpop.f32.mrb[195].mxu1  ;;  %3914 = vmatmul.mubr.msk.bf16.gmra.mrb[224].mxu0 %vm998_vm3, %v2516_v8 }
 0xc13   : > { %3917 = vmatprep.mubr.msk.bf16.mxu0 %vm4201_vm2, %v4200_v51 }
 0xc14   : > { %v5608_v27 = vadd.f32 %v2438_v14, %v2197_v33  ;;  %v2503_v28 = vmax.f32 %v5600_v7, 0.0 }
 0xc16   : > { %v2504_v21 = vmax.f32 %v5608_v27, 0.0 }
 0xc17   : > { %v2442_v55 = vpop.f32.mrb[196].mxu1 }
 0xc18   : > { %v2517_v48 = vpack.c.bf16 %v2504_v21, %v2503_v28  ;;  %v2443_v36 = vadd.f32 %v5541_v31, %v2442_v55  ;;  %v2444_v57 = vpop.f32.mrb[197].mxu1 }
 0xc19   : > { %v2445_v16 = vpop.f32.mrb[198].mxu1 }
 0xc1a   : > { %v5619_v20 = vadd.f32 %v2443_v36, %v2198_v37  ;;  %v2446_v0 = vadd.f32 %v5541_v31, %v2445_v16  ;;  %v2447_v33 = vpop.f32.mrb[199].mxu1  ;;  %3918 = vmatmul.mubr.msk.bf16.gmra.mrb[228].mxu0 %vm998_vm3, %v2517_v48  ;;  %v6092_v48 = vmax.f32 %v5469_v61, 0.0  ;;  %v6093_v16 = vmax.f32 %v5477_v42, 0.0 }
 0xc1b   : > { %3921 = vmatprep.mubr.msk.bf16.mxu0 %vm4201_vm2, %v4200_v51 }
 0xc1c   : > { %v5627_v41 = vadd.f32 %v2446_v0, %v2199_v44  ;;  %v2505_v35 = vmax.f32 %v5619_v20, 0.0 }
 0xc1e   : > { %v2506_v22 = vmax.f32 %v5627_v41, 0.0 }
 0xc1f   : > { %v2450_v6 = vpop.f32.mrb[200].mxu1 }
 0xc20   : > { %v2518_v19 = vpack.c.bf16 %v2506_v22, %v2505_v35  ;;  %v2451_v37 = vadd.f32 %v5541_v31, %v2450_v6  ;;  %v2452_v25 = vpop.f32.mrb[201].mxu1 }
 0xc21   : > { %v2453_v10 = vpop.f32.mrb[202].mxu1 }
 0xc22   : > { %v5638_v54 = vadd.f32 %v2451_v37, %v2200_v60  ;;  %v2454_v49 = vadd.f32 %v5541_v31, %v2453_v10  ;;  %v2455_v44 = vpop.f32.mrb[203].mxu1  ;;  %3922 = vmatmul.mubr.msk.bf16.gmra.mrb[232].mxu0 %vm998_vm3, %v2518_v19 }
 0xc23   : > { %3925 = vmatprep.mubr.msk.bf16.mxu0 %vm4201_vm2, %v4200_v51 }
 0xc24   : > { %v5646_v29 = vadd.f32 %v2454_v49, %v2201_v3  ;;  %v2507_v13 = vmax.f32 %v5638_v54, 0.0 }
 0xc26   : > { %v2508_v38 = vmax.f32 %v5646_v29, 0.0 }
 0xc27   : > { %v2458_v62 = vpop.f32.mrb[204].mxu1 }
 0xc28   : > { %v2519_v11 = vpack.c.bf16 %v2508_v38, %v2507_v13  ;;  %v2459_v60 = vadd.f32 %v5541_v31, %v2458_v62  ;;  %v2460_v47 = vpop.f32.mrb[205].mxu1 }
 0xc29   : > { %v2461_v50 = vpop.f32.mrb[206].mxu1 }
 0xc2a   : > { %v5657_v23 = vadd.f32 %v2459_v60, %v6090_v5  ;;  %v2462_v2 = vadd.f32 %v5541_v31, %v2461_v50  ;;  %v2463_v3 = vpop.f32.mrb[207].mxu1  ;;  %3926 = vmatmul.mubr.msk.bf16.gmra.mrb[236].mxu0 %vm998_vm3, %v2519_v11  ;;  %v4098_v50 = vld [vmem:[%s6048_s6] sm:$0xff]  }
 0xc2b   : > { %3929 = vmatprep.mubr.msk.bf16.mxu0 %vm4201_vm2, %v4200_v51  ;;  %3942 = vmatpush3.bf16.msra.mxu0 %v4098_v50 }
 0xc2c   : > { %v5665_v8 = vadd.f32 %v2462_v2, %v6091_v53  ;;  %v6074_v43 = vmax.f32 %v5657_v23, 0.0 }
 0xc2e   : > { %v6073_v4 = vmax.f32 %v5665_v8, 0.0  ;;  %v6095_v29 = vmax.f32 %v5665_v8, 0.0 }
 0xc2f   : > { %v2466_v18 = vpop.f32.mrb[208].mxu1 }
 0xc30   : > { %v2520_v17 = vpack.c.bf16 %v6073_v4, %v6074_v43  ;;  %v2467_v14 = vadd.f32 %v5541_v31, %v2466_v18  ;;  %v2468_v45 = vpop.f32.mrb[209].mxu1 }
 0xc31   : > { %v2469_v55 = vpop.f32.mrb[210].mxu1 }
 0xc32   : > { %v5676_v36 = vadd.f32 %v2467_v14, %v6092_v48  ;;  %v2470_v34 = vadd.f32 %v5541_v31, %v2469_v55  ;;  %v2471_v57 = vpop.f32.mrb[211].mxu1  ;;  %3930 = vmatmul.mubr.msk.bf16.gmra.mrb[240].mxu0 %vm998_vm3, %v2520_v17 }
 0xc33   : > { %3933 = vmatprep.mubr.msk.bf16.mxu0 %vm4201_vm2, %v4200_v51 }
 0xc34   : > { %v5684_v0 = vadd.f32 %v2470_v34, %v6093_v16  ;;  %v6072_v33 = vmax.f32 %v5676_v36, 0.0 }
 0xc36   : > { %v6071_v6 = vmax.f32 %v5684_v0, 0.0  ;;  %v6097_v8 = vmax.f32 %v5684_v0, 0.0 }
 0xc37   : > { %v2474_v19 = vpop.f32.mrb[212].mxu1 }
 0xc38   : > { %v2521_v61 = vpack.c.bf16 %v6071_v6, %v6072_v33  ;;  %v2475_v37 = vadd.f32 %v5541_v31, %v2474_v19  ;;  %v2476_v25 = vpop.f32.mrb[213].mxu1 }
 0xc39   : > { %v2477_v10 = vpop.f32.mrb[214].mxu1 }
 0xc3a   : > { %v2496_v49 = vadd.f32 %v2475_v37, %v5490_v52  ;;  %v2478_v44 = vpop.f32.mrb[215].mxu1  ;;  %3934 = vmatmul.mubr.msk.bf16.gmra.mrb[244].mxu0 %vm998_vm3, %v2521_v61 }
 0xc3b   : > { %3937 = vmatprep.mubr.msk.bf16.mxu0 %vm4201_vm2, %v4200_v51 }
 0xc3c   : > { %v5697_v42 = vmax.f32 %v2496_v49, 0.0 }
 0xc3e   : > { %v2522_v62 = vpack.c.bf16 %v5697_v42, %v5697_v42 }
 0xc42   : > { %3938 = vmatmul.mubr.msk.bf16.gmra.mrb[248].mxu0 %vm998_vm3, %v2522_v62 }
 0xc43   : > { %3943 = vmatprep.mubr.msk.bf16.mxu0 %vm4201_vm2, %v4200_v51 }
 0xcd5   : > { %v2595_v31 = vpop.f32.mrb[216].mxu0 }
 0xcd6   : > { %v3907_v11 = vpop.f32.mrb[217].mxu0 }
 0xcd7   : > { %v2598_v60 = vpop.f32.mrb[218].mxu0 }
 0xcd8   : > { %v2665_v52 = vpack.c.bf16 %v2598_v60, %v2595_v31  ;;  %v3908_v47 = vpop.f32.mrb[219].mxu0 }
 0xcda   : > { %2684 = vmatpush1.bf16.msra.mxu1 %v2665_v52 }
 0xcdb   : > { %2685 = vmatprep.subr.bf16.mxu1 %v6085_v12 }
 0xcdd   : > { %v2603_v5 = vpop.f32.mrb[220].mxu0 }
 0xcde   : > { %v3911_v2 = vpop.f32.mrb[221].mxu0 }
 0xcdf   : > { %v2606_v3 = vpop.f32.mrb[222].mxu0 }
 0xce0   : > { %v2666_v53 = vpack.c.bf16 %v2606_v3, %v2603_v5  ;;  %v3912_v18 = vpop.f32.mrb[223].mxu0 }
 0xce2   : > { %2686 = vmatpush1.bf16.msra.mxu1 %v2666_v53 }
 0xce3   : > { %2687 = vmatprep.subr.bf16.mxu1 %v6085_v12 }
 0xce5   : > { %v2611_v17 = vpop.f32.mrb[224].mxu0 }
 0xce6   : > { %v3915_v14 = vpop.f32.mrb[225].mxu0 }
 0xce7   : > { %v2614_v45 = vpop.f32.mrb[226].mxu0 }
 0xce8   : > { %v2667_v55 = vpack.c.bf16 %v2614_v45, %v2611_v17  ;;  %v3916_v48 = vpop.f32.mrb[227].mxu0 }
 0xcea   : > { %2688 = vmatpush1.bf16.msra.mxu1 %v2667_v55 }
 0xceb   : > { %2689 = vmatprep.subr.bf16.mxu1 %v6085_v12 }
 0xced   : > { %v2619_v34 = vpop.f32.mrb[228].mxu0 }
 0xcee   : > { %v3919_v57 = vpop.f32.mrb[229].mxu0 }
 0xcef   : > { %v2622_v16 = vpop.f32.mrb[230].mxu0 }
 0xcf0   : > { %v2668_v19 = vpack.c.bf16 %v2622_v16, %v2619_v34  ;;  %v3920_v61 = vpop.f32.mrb[231].mxu0 }
 0xcf1   : > { %v5718_v61 = vld [vmem:[%s4368_s12] ss:$8 sps:$4 sm:$0xff]  }
 0xcf2   : > { %2690 = vmatpush1.bf16.msra.mxu1 %v2668_v19 }
 0xcf3   : > { %2691 = vmatprep.subr.bf16.mxu1 %v6085_v12 }
 0xcf5   : > { %v2627_v37 = vpop.f32.mrb[232].mxu0 }
 0xcf6   : > { %v3923_v25 = vpop.f32.mrb[233].mxu0 }
 0xcf7   : > { %v2630_v10 = vpop.f32.mrb[234].mxu0  ;;  %v5727_v25 = vld [vmem:[%s4368_s12 + $0x10] ss:$8 sps:$4 sm:$0xff]  }
 0xcf8   : > { %v2669_v49 = vpack.c.bf16 %v2630_v10, %v2627_v37  ;;  %v3924_v44 = vpop.f32.mrb[235].mxu0  ;;  %v5722_v37 = vld [vmem:[%s4368_s12 + $0x14] ss:$8 sps:$4 sm:$0xff]   ;;  %v5731_v10 = vld [vmem:[%s4368_s12 + $0x24] ss:$8 sps:$4 sm:$0xff]  }
 0xcf9   : > { %v5740_v44 = vld [vmem:[%s4368_s12 + $0x34] ss:$8 sps:$4 sm:$0xff]  }
 0xcfa   : > { %2692 = vmatpush1.bf16.msra.mxu1 %v2669_v49  ;;  %v5736_v49 = vld [vmem:[%s4368_s12 + $0x20] ss:$8 sps:$4 sm:$0xff]  }
 0xcfb   : > { %2693 = vmatprep.subr.bf16.mxu1 %v6085_v12 }
 0xcfd   : > { %v2635_v62 = vpop.f32.mrb[236].mxu0 }
 0xcfe   : > { %v3927_v31 = vpop.f32.mrb[237].mxu0 }
 0xcff   : > { %v2638_v11 = vpop.f32.mrb[238].mxu0  ;;  %v5749_v31 = vld [vmem:[%s4368_s12 + $0x44] ss:$8 sps:$4 sm:$0xff]  }
 0xd00   : > { %v2670_v60 = vpack.c.bf16 %v2638_v11, %v2635_v62  ;;  %v3928_v52 = vpop.f32.mrb[239].mxu0  ;;  %v5745_v62 = vld [vmem:[%s4368_s12 + $0x30] ss:$8 sps:$4 sm:$0xff]   ;;  %v5754_v11 = vld [vmem:[%s4368_s12 + $0x40] ss:$8 sps:$4 sm:$0xff]  }
 0xd01   : > { %v5763_v52 = vld [vmem:[%s4368_s12 + $0x50] ss:$8 sps:$4 sm:$0xff]  }
 0xd02   : > { %2694 = vmatpush1.bf16.msra.mxu1 %v2670_v60  ;;  %v5758_v60 = vld [vmem:[%s4368_s12 + $0x54] ss:$8 sps:$4 sm:$0xff]  }
 0xd03   : > { %2695 = vmatprep.subr.bf16.mxu1 %v6085_v12 }
 0xd05   : > { %v2643_v47 = vpop.f32.mrb[240].mxu0 }
 0xd06   : > { %v3931_v50 = vpop.f32.mrb[241].mxu0 }
 0xd07   : > { %v2646_v5 = vpop.f32.mrb[242].mxu0  ;;  %v5772_v50 = vld [vmem:[%s4368_s12 + $0x60] ss:$8 sps:$4 sm:$0xff]  }
 0xd08   : > { %v2671_v2 = vpack.c.bf16 %v2646_v5, %v2643_v47  ;;  %v3932_v3 = vpop.f32.mrb[243].mxu0  ;;  %v5767_v47 = vld [vmem:[%s4368_s12 + $0x64] ss:$8 sps:$4 sm:$0xff]   ;;  %v5776_v5 = vld [vmem:[%s4368_s12 + $0x74] ss:$8 sps:$4 sm:$0xff]  }
 0xd09   : > { %v4134_v3 = vld [vmem:[%s4368_s12 + $0x4] ss:$8 sps:$4 sm:$0xff]  }
 0xd0a   : > { %2696 = vmatpush1.bf16.msra.mxu1 %v2671_v2  ;;  %v5781_v2 = vld [vmem:[%s4368_s12 + $0x70] ss:$8 sps:$4 sm:$0xff]   ;;  %s367_s12 = sand.u32 1, %s4189_s16  }
 0xd0b   : > { %2697 = vmatprep.subr.bf16.mxu1 %v6085_v12  ;;  %s368_s21 = scalar_lea.vmem [#allocation3], %s367_s12  ;;  %s3268_s22 = scalar_lea.sflag [#allocation4], %s367_s12 }
 0xd0c   : > { %s3280_s28 = sshll.u32 %s368_s21, 4  ;;  %s6001_s28 = int_to_ptr.vmem [resolvable:$true] %s3280_s28 }
 0xd0d   : > { %v2651_v53 = vpop.f32.mrb[244].mxu0  ;;  %s4135_s13 = scalar_lea.vmem %s6001_s28, 16  ;;  %p4142_p0 = scmp.lt.s32.totalorder %s6001_s28, %s4140_s14 }
 0xd0e   : > { %v3935_v18 = vpop.f32.mrb[245].mxu0  ;;  %p4136_p11 = scmp.ne.s32.totalorder %s6001_s28, %s4135_s13  ;;  %p4143_p1 = scmp.lt.s32.totalorder %s4141_s19, %s4135_s13 }
 0xd0f   : > { %v2654_v17 = vpop.f32.mrb[246].mxu0 }
 0xd10   : > { %v2672_v14 = vpack.c.bf16 %v2654_v17, %v2651_v53  ;;  %v3936_v45 = vpop.f32.mrb[247].mxu0  ;;  %v5792_v53 = vld [vmem:[%s6047_s5 + $0x5] ss:$0 sm:$0xff]  ;;  %p4137_p12 = pnand %p4136_p11, %p4299_p5  ;;  %p4144_p2 = por %p4143_p1, %p4142_p0 }
 0xd12   : > { %2698 = vmatpush1.bf16.msra.mxu1 %v2672_v14  ;;  %p4138_p13 = pneg %p4137_p12 }
 0xd13   : > { %2699 = vmatprep.subr.bf16.mxu1 %v6085_v12 }
 0xd14   : > { %p4145_p3 = pnand %p4144_p2, %p4138_p13 }
 0xd15   : > { %v2659_v55 = vpop.f32.mrb[248].mxu0 }
 0xd16   : > { %v2673_v48 = vpack.c.bf16 %v2659_v55, %v2659_v55  ;;  %v3939_v34 = vpop.f32.mrb[249].mxu0 }
 0xd17   : > { %v2662_v57 = vpop.f32.mrb[250].mxu0 }
 0xd18   : > { %v2681_v16 = vsel %vm855_vm1, %v2673_v48, 0  ;;  %v3940_v19 = vpop.f32.mrb[251].mxu0 }
 0xd19   : > { %2700 = vmatpush1.bf16.msra.mxu1 %v2681_v16 }
 0xd1a   : > { %2988 = vmatprep.subr.bf16.mxu1 %v6085_v12 }
 0xd1c   : > { %2716 = vmatmul.mubr.bf16.vlgmr.msra.gmra.mrb[216].mxu1 %v5718_v61 }
 0xd1d   : > { %3542 = vmatprep.mubr.msk.bf16.mxu1 %vm827_vm0, %v5722_v37 }
 0xd24   : > { %2724 = vmatmul.mubr.bf16.gmra.mrb[220].mxu1 %v5727_v25 }
 0xd25   : > { %3543 = vmatprep.mubr.msk.bf16.mxu1 %vm827_vm0, %v5731_v10 }
 0xd2c   : > { %2732 = vmatmul.mubr.bf16.gmra.mrb[224].mxu1 %v5736_v49 }
 0xd2d   : > { %3544 = vmatprep.mubr.msk.bf16.mxu1 %vm827_vm0, %v5740_v44 }
 0xd34   : > { %2740 = vmatmul.mubr.bf16.gmra.mrb[228].mxu1 %v5745_v62 }
 0xd35   : > { %3545 = vmatprep.mubr.msk.bf16.mxu1 %vm827_vm0, %v5749_v31 }
 0xd3c   : > { %2748 = vmatmul.mubr.bf16.gmra.mrb[232].mxu1 %v5754_v11 }
 0xd3d   : > { %3546 = vmatprep.mubr.msk.bf16.mxu1 %vm827_vm0, %v5758_v60 }
 0xd44   : > { %2756 = vmatmul.mubr.bf16.gmra.mrb[236].mxu1 %v5763_v52 }
 0xd45   : > { %3547 = vmatprep.mubr.msk.bf16.mxu1 %vm827_vm0, %v5767_v47 }
 0xd4c   : > { %2764 = vmatmul.mubr.bf16.gmra.mrb[240].mxu1 %v5772_v50 }
 0xd4d   : > { %3548 = vmatprep.mubr.msk.bf16.mxu1 %vm827_vm0, %v5776_v5 }
 0xd54   : > { %2772 = vmatmul.mubr.bf16.gmra.mrb[244].mxu1 %v5781_v2 }
 0xd55   : > { %3549 = vmatprep.mubr.msk.bf16.mxu1 %vm827_vm0, %v4476_v58 }
 0xd5c   : > { %2780 = vmatmul.mubr.bf16.gmra.mrb[248].mxu1 %v4481_v59 }
 0xd5d   : > { %3561 = vmatprep.mubr.msk.bf16.mxu1 %vm827_vm0, %v4134_v3 }
 0xdef   : > { %v2717_v18 = vpop.f32.mrb[216].mxu1 }
 0xdf0   : > { %v2718_v17 = vadd.f32 %v5792_v53, %v2717_v18  ;;  %v2719_v14 = vpop.f32.mrb[217].mxu1 }
 0xdf1   : > { %v2720_v45 = vpop.f32.mrb[218].mxu1 }
 0xdf2   : > { %v2787_v55 = vadd.f32 %v2718_v17, %v2497_v30  ;;  %v2721_v48 = vadd.f32 %v5792_v53, %v2720_v45  ;;  %v2722_v34 = vpop.f32.mrb[219].mxu1 }
 0xdf4   : > { %v2788_v57 = vadd.f32 %v2721_v48, %v2498_v63  ;;  %v2804_v16 = vmax.f32 %v2787_v55, 0.0 }
 0xdf6   : > { %v2805_v19 = vmax.f32 %v2788_v57, 0.0 }
 0xdf7   : > { %v2725_v3 = vpop.f32.mrb[220].mxu1 }
 0xdf8   : > { %v2821_v6 = vpack.c.bf16 %v2805_v19, %v2804_v16  ;;  %v2726_v33 = vadd.f32 %v5792_v53, %v2725_v3  ;;  %v2727_v4 = vpop.f32.mrb[221].mxu1 }
 0xdf9   : > { %v2728_v43 = vpop.f32.mrb[222].mxu1 }
 0xdfa   : > { %v2789_v18 = vadd.f32 %v2726_v33, %v2499_v39  ;;  %v2729_v1 = vadd.f32 %v5792_v53, %v2728_v43  ;;  %v2730_v30 = vpop.f32.mrb[223].mxu1  ;;  %3944 = vmatmul.mubr.msk.bf16.vlgmr.msra.gmra.mrb[252].mxu0 %vm998_vm3, %v2821_v6 }
 0xdfb   : > { %3947 = vmatprep.mubr.msk.bf16.mxu0 %vm4201_vm2, %v4200_v51 }
 0xdfc   : > { %v2790_v32 = vadd.f32 %v2729_v1, %v2500_v24  ;;  %v2806_v63 = vmax.f32 %v2789_v18, 0.0 }
 0xdfe   : > { %v2807_v17 = vmax.f32 %v2790_v32, 0.0 }
 0xdff   : > { %v2733_v14 = vpop.f32.mrb[224].mxu1 }
 0xe00   : > { %v2822_v45 = vpack.c.bf16 %v2807_v17, %v2806_v63  ;;  %v2734_v4 = vadd.f32 %v5792_v53, %v2733_v14  ;;  %v2735_v55 = vpop.f32.mrb[225].mxu1 }
 0xe01   : > { %v2736_v15 = vpop.f32.mrb[226].mxu1 }
 0xe02   : > { %v2791_v39 = vadd.f32 %v2734_v4, %v2501_v9  ;;  %v2737_v43 = vadd.f32 %v5792_v53, %v2736_v15  ;;  %v2738_v33 = vpop.f32.mrb[227].mxu1  ;;  %3948 = vmatmul.mubr.msk.bf16.gmra.mrb[0].mxu0 %vm998_vm3, %v2822_v45 }
 0xe03   : > { %3951 = vmatprep.mubr.msk.bf16.mxu0 %vm4201_vm2, %v4200_v51 }
 0xe04   : > { %v2792_v40 = vadd.f32 %v2737_v43, %v2502_v56  ;;  %v2808_v24 = vmax.f32 %v2791_v39, 0.0 }
 0xe06   : > { %v2809_v6 = vmax.f32 %v2792_v40, 0.0 }
 0xe07   : > { %v2741_v48 = vpop.f32.mrb[228].mxu1 }
 0xe08   : > { %v2823_v34 = vpack.c.bf16 %v2809_v6, %v2808_v24  ;;  %v2742_v57 = vadd.f32 %v5792_v53, %v2741_v48  ;;  %v2743_v16 = vpop.f32.mrb[229].mxu1 }
 0xe09   : > { %v2744_v26 = vpop.f32.mrb[230].mxu1 }
 0xe0a   : > { %v2793_v9 = vadd.f32 %v2742_v57, %v2503_v28  ;;  %v2745_v19 = vadd.f32 %v5792_v53, %v2744_v26  ;;  %v2746_v3 = vpop.f32.mrb[231].mxu1  ;;  %3952 = vmatmul.mubr.msk.bf16.gmra.mrb[4].mxu0 %vm998_vm3, %v2823_v34 }
 0xe0b   : > { %3955 = vmatprep.mubr.msk.bf16.mxu0 %vm4201_vm2, %v4200_v51 }
 0xe0c   : > { %v2794_v46 = vadd.f32 %v2745_v19, %v2504_v21  ;;  %v2810_v56 = vmax.f32 %v2793_v9, 0.0 }
 0xe0e   : > { %v2811_v18 = vmax.f32 %v2794_v46, 0.0 }
 0xe0f   : > { %v2749_v1 = vpop.f32.mrb[232].mxu1 }
 0xe10   : > { %v2824_v30 = vpack.c.bf16 %v2811_v18, %v2810_v56  ;;  %v2750_v32 = vadd.f32 %v5792_v53, %v2749_v1  ;;  %v2751_v63 = vpop.f32.mrb[233].mxu1  ;;  %v6096_v1 = vmax.f32 %v5676_v36, 0.0 }
 0xe11   : > { %v2752_v7 = vpop.f32.mrb[234].mxu1 }
 0xe12   : > { %v2795_v28 = vadd.f32 %v2750_v32, %v2505_v35  ;;  %v2753_v17 = vadd.f32 %v5792_v53, %v2752_v7  ;;  %v2754_v14 = vpop.f32.mrb[235].mxu1  ;;  %3956 = vmatmul.mubr.msk.bf16.gmra.mrb[8].mxu0 %vm998_vm3, %v2824_v30 }
 0xe13   : > { %3959 = vmatprep.mubr.msk.bf16.mxu0 %vm4201_vm2, %v4200_v51 }
 0xe14   : > { %v2796_v27 = vadd.f32 %v2753_v17, %v2506_v22  ;;  %v2812_v21 = vmax.f32 %v2795_v28, 0.0 }
 0xe16   : > { %v2813_v45 = vmax.f32 %v2796_v27, 0.0 }
 0xe17   : > { %v2757_v4 = vpop.f32.mrb[236].mxu1 }
 0xe18   : > { %v2825_v55 = vpack.c.bf16 %v2813_v45, %v2812_v21  ;;  %v2758_v15 = vadd.f32 %v5792_v53, %v2757_v4  ;;  %v2759_v39 = vpop.f32.mrb[237].mxu1 }
 0xe19   : > { %v2760_v20 = vpop.f32.mrb[238].mxu1 }
 0xe1a   : > { %v2797_v35 = vadd.f32 %v2758_v15, %v2507_v13  ;;  %v2761_v43 = vadd.f32 %v5792_v53, %v2760_v20  ;;  %v2762_v33 = vpop.f32.mrb[239].mxu1  ;;  %3960 = vmatmul.mubr.msk.bf16.gmra.mrb[12].mxu0 %vm998_vm3, %v2825_v55  ;;  %v6094_v13 = vmax.f32 %v5657_v23, 0.0 }
 0xe1b   : > { %3963 = vmatprep.mubr.msk.bf16.mxu0 %vm4201_vm2, %v4200_v51 }
 0xe1c   : > { %v2798_v41 = vadd.f32 %v2761_v43, %v2508_v38  ;;  %v2814_v22 = vmax.f32 %v2797_v35, 0.0 }
 0xe1e   : > { %v2815_v40 = vmax.f32 %v2798_v41, 0.0 }
 0xe1f   : > { %v2765_v24 = vpop.f32.mrb[240].mxu1 }
 0xe20   : > { %v2826_v6 = vpack.c.bf16 %v2815_v40, %v2814_v22  ;;  %v2766_v48 = vadd.f32 %v5792_v53, %v2765_v24  ;;  %v2767_v34 = vpop.f32.mrb[241].mxu1 }
 0xe21   : > { %v2768_v54 = vpop.f32.mrb[242].mxu1 }
 0xe22   : > { %v2799_v57 = vadd.f32 %v2766_v48, %v6094_v13  ;;  %v2769_v16 = vadd.f32 %v5792_v53, %v2768_v54  ;;  %v2770_v26 = vpop.f32.mrb[243].mxu1  ;;  %3964 = vmatmul.mubr.msk.bf16.gmra.mrb[16].mxu0 %vm998_vm3, %v2826_v6 }
 0xe23   : > { %3967 = vmatprep.mubr.msk.bf16.mxu0 %vm4201_vm2, %v4200_v51 }
 0xe24   : > { %v2800_v38 = vadd.f32 %v2769_v16, %v6095_v29  ;;  %v2816_v9 = vmax.f32 %v2799_v57, 0.0 }
 0xe26   : > { %v2817_v19 = vmax.f32 %v2800_v38, 0.0 }
 0xe27   : > { %v2773_v3 = vpop.f32.mrb[244].mxu1 }
 0xe28   : > { %v2827_v46 = vpack.c.bf16 %v2817_v19, %v2816_v9  ;;  %v2774_v56 = vadd.f32 %v5792_v53, %v2773_v3  ;;  %v2775_v18 = vpop.f32.mrb[245].mxu1 }
 0xe29   : > { %v2776_v23 = vpop.f32.mrb[246].mxu1 }
 0xe2a   : > { %v2801_v30 = vadd.f32 %v2774_v56, %v6096_v1  ;;  %v2777_v32 = vadd.f32 %v5792_v53, %v2776_v23  ;;  %v2778_v63 = vpop.f32.mrb[247].mxu1  ;;  %3968 = vmatmul.mubr.msk.bf16.gmra.mrb[20].mxu0 %vm998_vm3, %v2827_v46 }
 0xe2b   : > { %3971 = vmatprep.mubr.msk.bf16.mxu0 %vm4201_vm2, %v4200_v51 }
 0xe2c   : > { %v2802_v7 = vadd.f32 %v2777_v32, %v6097_v8  ;;  %v2818_v28 = vmax.f32 %v2801_v30, 0.0 }
 0xe2e   : > { %v2819_v17 = vmax.f32 %v2802_v7, 0.0 }
 0xe2f   : > { %v2781_v14 = vpop.f32.mrb[248].mxu1 }
 0xe30   : > { %v2828_v27 = vpack.c.bf16 %v2819_v17, %v2818_v28  ;;  %v2782_v21 = vadd.f32 %v5792_v53, %v2781_v14  ;;  %v2783_v45 = vpop.f32.mrb[249].mxu1 }
 0xe31   : > { %v2784_v36 = vpop.f32.mrb[250].mxu1 }
 0xe32   : > { %v2803_v4 = vadd.f32 %v2782_v21, %v5697_v42  ;;  %v2785_v55 = vpop.f32.mrb[251].mxu1  ;;  %3972 = vmatmul.mubr.msk.bf16.gmra.mrb[24].mxu0 %vm998_vm3, %v2828_v27 }
 0xe33   : > { %3975 = vmatprep.mubr.msk.bf16.mxu0 %vm4201_vm2, %v4200_v51 }
 0xe34   : > { %v2820_v15 = vmax.f32 %v2803_v4, 0.0 }
 0xe36   : > { %v2829_v39 = vpack.c.bf16 %v2820_v15, %v2820_v15 }
 0xe3a   : > { %3976 = vmatmul.mubr.msk.bf16.gmra.mrb[28].mxu0 %vm998_vm3, %v2829_v39 }
 0xecd   : > { %v2900_v0 = vpop.f32.mrb[252].mxu0 }
 0xece   : > { %v3945_v20 = vpop.f32.mrb[253].mxu0 }
 0xecf   : > { %v2903_v35 = vpop.f32.mrb[254].mxu0 }
 0xed0   : > { %v2970_v43 = vpack.c.bf16 %v2903_v35, %v2900_v0  ;;  %v3946_v33 = vpop.f32.mrb[255].mxu0 }
 0xed2   : > { %2989 = vmatpush1.bf16.msra.mxu1 %v2970_v43 }
 0xed3   : > { %2990 = vmatprep.subr.bf16.mxu1 %v6085_v12 }
 0xed5   : > { %v2908_v53 = vpop.f32.mrb[0].mxu0 }
 0xed6   : > { %v3949_v42 = vpop.f32.mrb[1].mxu0 }
 0xed7   : > { %v2911_v41 = vpop.f32.mrb[2].mxu0 }
 0xed8   : > { %v2971_v22 = vpack.c.bf16 %v2911_v41, %v2908_v53  ;;  %v3950_v40 = vpop.f32.mrb[3].mxu0 }
 0xeda   : > { %2991 = vmatpush1.bf16.msra.mxu1 %v2971_v22 }
 0xedb   : > { %2992 = vmatprep.subr.bf16.mxu1 %v6085_v12 }
 0xedd   : > { %v2916_v51 = vpop.f32.mrb[4].mxu0 }
 0xede   : > { %v3953_v24 = vpop.f32.mrb[5].mxu0 }
 0xedf   : > { %v2919_v6 = vpop.f32.mrb[6].mxu0 }
 0xee0   : > { %v2972_v48 = vpack.c.bf16 %v2919_v6, %v2916_v51  ;;  %v3954_v34 = vpop.f32.mrb[7].mxu0 }
 0xee2   : > { %2993 = vmatpush1.bf16.msra.mxu1 %v2972_v48 }
 0xee3   : > { %2994 = vmatprep.subr.bf16.mxu1 %v6085_v12 }
 0xee5   : > { %v2924_v54 = vpop.f32.mrb[8].mxu0 }
 0xee6   : > { %v3957_v13 = vpop.f32.mrb[9].mxu0 }
 0xee7   : > { %v2927_v57 = vpop.f32.mrb[10].mxu0 }
 0xee8   : > { %v2973_v16 = vpack.c.bf16 %v2927_v57, %v2924_v54  ;;  %v3958_v26 = vpop.f32.mrb[11].mxu0 }
 0xeea   : > { %2995 = vmatpush1.bf16.msra.mxu1 %v2973_v16 }
 0xeeb   : > { %2996 = vmatprep.subr.bf16.mxu1 %v6085_v12 }
 0xeed   : > { %v2932_v29 = vpop.f32.mrb[12].mxu0 }
 0xeee   : > { %v3961_v38 = vpop.f32.mrb[13].mxu0 }
 0xeef   : > { %v2935_v9 = vpop.f32.mrb[14].mxu0 }
 0xef0   : > { %v2974_v19 = vpack.c.bf16 %v2935_v9, %v2932_v29  ;;  %v3962_v3 = vpop.f32.mrb[15].mxu0 }
 0xef2   : > { %2997 = vmatpush1.bf16.msra.mxu1 %v2974_v19 }
 0xef3   : > { %2998 = vmatprep.subr.bf16.mxu1 %v6085_v12 }
 0xef5   : > { %v2940_v46 = vpop.f32.mrb[16].mxu0 }
 0xef6   : > { %v3965_v56 = vpop.f32.mrb[17].mxu0 }
 0xef7   : > { %v2943_v18 = vpop.f32.mrb[18].mxu0 }
 0xef8   : > { %v2975_v23 = vpack.c.bf16 %v2943_v18, %v2940_v46  ;;  %v3966_v1 = vpop.f32.mrb[19].mxu0 }
 0xefa   : > { %2999 = vmatpush1.bf16.msra.mxu1 %v2975_v23 }
 0xefb   : > { %3000 = vmatprep.subr.bf16.mxu1 %v6085_v12 }
 0xefd   : > { %v2948_v30 = vpop.f32.mrb[20].mxu0 }
 0xefe   : > { %v3969_v32 = vpop.f32.mrb[21].mxu0 }
 0xeff   : > { %v2951_v63 = vpop.f32.mrb[22].mxu0 }
 0xf00   : > { %v2976_v8 = vpack.c.bf16 %v2951_v63, %v2948_v30  ;;  %v3970_v7 = vpop.f32.mrb[23].mxu0 }
 0xf02   : > { %3001 = vmatpush1.bf16.msra.mxu1 %v2976_v8 }
 0xf03   : > { %3002 = vmatprep.subr.bf16.mxu1 %v6085_v12 }
 0xf05   : > { %v2956_v28 = vpop.f32.mrb[24].mxu0 }
 0xf06   : > { %v3973_v17 = vpop.f32.mrb[25].mxu0 }
 0xf07   : > { %v2959_v14 = vpop.f32.mrb[26].mxu0 }
 0xf08   : > { %v2977_v27 = vpack.c.bf16 %v2959_v14, %v2956_v28  ;;  %v3974_v21 = vpop.f32.mrb[27].mxu0 }
 0xf0a   : > { %3003 = vmatpush1.bf16.msra.mxu1 %v2977_v27  ;;  %v3093_v27 = vld [vmem:[%s6050_s8 + $0x8] sm:$0xff] }
 0xf0b   : > { %3004 = vmatprep.subr.bf16.mxu1 %v6085_v12  ;;  %v5903_v12 = vld [vmem:[#allocation2] ss:$0 sm:$0xff] }
 0xf0d   : > { %v2964_v45 = vpop.f32.mrb[28].mxu0 }
 0xf0e   : > { %v2978_v36 = vpack.c.bf16 %v2964_v45, %v2964_v45  ;;  %v3977_v4 = vpop.f32.mrb[29].mxu0  ;;  %v3092_v45 = vld [vmem:[%s6050_s8] sm:$0xff] }
 0xf0f   : > { %v2967_v55 = vpop.f32.mrb[30].mxu0 }
 0xf10   : > { %v2986_v15 = vsel %vm855_vm1, %v2978_v36, 0  ;;  %v3978_v39 = vpop.f32.mrb[31].mxu0  ;;  %v3094_v36 = vld [vmem:[%s6050_s8 + $0x10] sm:$0xff]  ;;  %v3095_v55 = vld [vmem:[%s6050_s8 + $0x18] sm:$0xff] }
 0xf11   : > { %3005 = vmatpush1.bf16.msra.mxu1 %v2986_v15 }
 0xf14   : > { %3021 = vmatmul.mubr.bf16.vlgmr.msra.gmra.mrb[252].mxu1 %v5718_v61 }
 0xf15   : > { %3562 = vmatprep.mubr.msk.bf16.mxu1 %vm827_vm0, %v5722_v37 }
 0xf1c   : > { %3029 = vmatmul.mubr.bf16.gmra.mrb[0].mxu1 %v5727_v25 }
 0xf1d   : > { %3563 = vmatprep.mubr.msk.bf16.mxu1 %vm827_vm0, %v5731_v10 }
 0xf24   : > { %3037 = vmatmul.mubr.bf16.gmra.mrb[4].mxu1 %v5736_v49 }
 0xf25   : > { %3564 = vmatprep.mubr.msk.bf16.mxu1 %vm827_vm0, %v5740_v44 }
 0xf2c   : > { %3045 = vmatmul.mubr.bf16.gmra.mrb[8].mxu1 %v5745_v62 }
 0xf2d   : > { %3565 = vmatprep.mubr.msk.bf16.mxu1 %vm827_vm0, %v5749_v31 }
 0xf34   : > { %3053 = vmatmul.mubr.bf16.gmra.mrb[12].mxu1 %v5754_v11 }
 0xf35   : > { %3566 = vmatprep.mubr.msk.bf16.mxu1 %vm827_vm0, %v5758_v60 }
 0xf3c   : > { %3061 = vmatmul.mubr.bf16.gmra.mrb[16].mxu1 %v5763_v52 }
 0xf3d   : > { %3567 = vmatprep.mubr.msk.bf16.mxu1 %vm827_vm0, %v5767_v47 }
 0xf44   : > { %3069 = vmatmul.mubr.bf16.gmra.mrb[20].mxu1 %v5772_v50 }
 0xf45   : > { %3568 = vmatprep.mubr.msk.bf16.mxu1 %vm827_vm0, %v5776_v5 }
 0xf4c   : > { %3077 = vmatmul.mubr.bf16.gmra.mrb[24].mxu1 %v5781_v2 }
 0xf4d   : > { %3569 = vmatprep.mubr.msk.bf16.mxu1 %vm827_vm0, %v4476_v58 }
 0xf54   : > { %3085 = vmatmul.mubr.bf16.gmra.mrb[28].mxu1 %v4481_v59 }
 0xfe7   : > { %v3022_v61 = vpop.f32.mrb[252].mxu1 }
 0xfe8   : > { %v3023_v37 = vadd.f32 %v5903_v12, %v3022_v61  ;;  %v3024_v25 = vpop.f32.mrb[253].mxu1  ;;  %v3096_v61 = vld [vmem:[%s6050_s8 + $0x20] sm:$0xff] }
 0xfe9   : > { %v3025_v10 = vpop.f32.mrb[254].mxu1 }
 0xfea   : > { %3111 = vperm.xlu0 %4022, %v3023_v37   ;;  %v3027_v49 = vpop.f32.mrb[255].mxu1  ;;  %v3026_v44 = vadd.f32 %v5903_v12, %v3025_v10 }
 0xfee   : > { %3116 = vperm.xlu0 %4022, %v3026_v44  }
 0xfef   : > { %v3030_v62 = vpop.f32.mrb[0].mxu1 }
 0xff0   : > { %v3031_v31 = vadd.f32 %v5903_v12, %v3030_v62  ;;  %v3032_v11 = vpop.f32.mrb[1].mxu1 }
 0xff1   : > { %v3033_v60 = vpop.f32.mrb[2].mxu1  ;;  %v3097_v11 = vld [vmem:[%s6050_s8 + $0x28] sm:$0xff] }
 0xff2   : > { %3121 = vperm.xlu1 %4023, %v3031_v31   ;;  %v3035_v58 = vpop.f32.mrb[3].mxu1  ;;  %v3034_v59 = vadd.f32 %v5903_v12, %v3033_v60 }
 0xff6   : > { %3126 = vperm.xlu1 %4023, %v3034_v59  }
 0xff7   : > { %v3038_v52 = vpop.f32.mrb[4].mxu1 }
 0xff8   : > { %v3039_v47 = vadd.f32 %v5903_v12, %v3038_v52  ;;  %v3040_v50 = vpop.f32.mrb[5].mxu1  ;;  %v3098_v52 = vld [vmem:[%s6050_s8 + $0x30] sm:$0xff] }
 0xff9   : > { %v3041_v5 = vpop.f32.mrb[6].mxu1 }
 0xffa   : > { %v3042_v2 = vadd.f32 %v5903_v12, %v3041_v5  ;;  %3131 = vperm.xlu0 %4022, %v3039_v47   ;;  %v3043_v0 = vpop.f32.mrb[7].mxu1 }
 0xffc   : > { %3136 = vperm.xlu1 %4023, %v3042_v2  }
 0xfff   : > { %v3046_v20 = vpop.f32.mrb[8].mxu1 }
0x1000   : > { %v3047_v35 = vadd.f32 %v5903_v12, %v3046_v20  ;;  %v3048_v43 = vpop.f32.mrb[9].mxu1 }
0x1001   : > { %v3049_v33 = vpop.f32.mrb[10].mxu1 }
0x1002   : > { %v3050_v53 = vadd.f32 %v5903_v12, %v3049_v33  ;;  %3141 = vperm.xlu0 %4022, %v3047_v35   ;;  %v3051_v42 = vpop.f32.mrb[11].mxu1  ;;  %v3099_v35 = vld [vmem:[%s6050_s8 + $0x38] sm:$0xff] }
0x1004   : > { %3146 = vperm.xlu1 %4023, %v3050_v53   ;;  %v3100_v53 = vld [vmem:[%s6050_s8 + $0x40] sm:$0xff] }
0x1007   : > { %v3054_v41 = vpop.f32.mrb[12].mxu1 }
0x1008   : > { %v3055_v22 = vadd.f32 %v5903_v12, %v3054_v41  ;;  %v3056_v40 = vpop.f32.mrb[13].mxu1 }
0x1009   : > { %v3057_v51 = vpop.f32.mrb[14].mxu1 }
0x100a   : > { %v3058_v24 = vadd.f32 %v5903_v12, %v3057_v51  ;;  %3151 = vperm.xlu0 %4022, %v3055_v22   ;;  %v3059_v6 = vpop.f32.mrb[15].mxu1 }
0x100b   : > { %v3101_v6 = vld [vmem:[%s6050_s8 + $0x48] sm:$0xff] }
0x100c   : > { %3156 = vperm.xlu1 %4023, %v3058_v24  }
0x100f   : > { %v3062_v48 = vpop.f32.mrb[16].mxu1 }
0x1010   : > { %v3063_v34 = vadd.f32 %v5903_v12, %v3062_v48  ;;  %v3064_v54 = vpop.f32.mrb[17].mxu1 }
0x1011   : > { %v3065_v13 = vpop.f32.mrb[18].mxu1  ;;  %v3102_v54 = vld [vmem:[%s6050_s8 + $0x50] sm:$0xff] }
0x1012   : > { %v3066_v57 = vadd.f32 %v5903_v12, %v3065_v13  ;;  %3161 = vperm.xlu0 %4022, %v3063_v34   ;;  %v3067_v16 = vpop.f32.mrb[19].mxu1 }
0x1014   : > { %3166 = vperm.xlu1 %4023, %v3066_v57  }
0x1017   : > { %v3070_v26 = vpop.f32.mrb[20].mxu1 }
0x1018   : > { %v3071_v29 = vadd.f32 %v5903_v12, %v3070_v26  ;;  %v3072_v38 = vpop.f32.mrb[21].mxu1 }
0x1019   : > { %v3073_v9 = vpop.f32.mrb[22].mxu1 }
0x101a   : > { %v3074_v19 = vadd.f32 %v5903_v12, %v3073_v9  ;;  %3171 = vperm.xlu0 %4022, %v3071_v29   ;;  %v3075_v3 = vpop.f32.mrb[23].mxu1  ;;  %v3103_v9 = vld [vmem:[%s6050_s8 + $0x58] sm:$0xff] }
0x101c   : > { %3176 = vperm.xlu1 %4023, %v3074_v19  }
0x101f   : > { %v3078_v46 = vpop.f32.mrb[24].mxu1 }
0x1020   : > { %v3079_v56 = vadd.f32 %v5903_v12, %v3078_v46  ;;  %v3080_v18 = vpop.f32.mrb[25].mxu1  ;;  %v3104_v46 = vld [vmem:[%s6050_s8 + $0x60] sm:$0xff] }
0x1021   : > { %v3081_v23 = vpop.f32.mrb[26].mxu1 }
0x1022   : > { %v3082_v1 = vadd.f32 %v5903_v12, %v3081_v23  ;;  %3181 = vperm.xlu0 %4022, %v3079_v56   ;;  %v3083_v30 = vpop.f32.mrb[27].mxu1 }
0x1024   : > { %3186 = vperm.xlu1 %4023, %v3082_v1  }
0x1027   : > { %v3086_v32 = vpop.f32.mrb[28].mxu1 }
0x1028   : > { %v3087_v63 = vadd.f32 %v5903_v12, %v3086_v32  ;;  %v3088_v8 = vpop.f32.mrb[29].mxu1 }
0x1029   : > { %v3089_v7 = vpop.f32.mrb[30].mxu1 }
0x102a   : > { %3191 = vperm.xlu0 %4022, %v3087_v63   ;;  %v3090_v28 = vpop.f32.mrb[31].mxu1  ;;  %v3105_v63 = vld [vmem:[%s6050_s8 + $0x68] sm:$0xff] }
0x1069   : > { %v3112_v17 = vpop.permute.xlu0 %3111 }
0x106a   : > { %v3194_v39 = vmul.f32 %v3112_v17, %v3092_v45 }
0x106c   : > { %v3212_v49 = vsel %vm3211_vm4, %v3194_v39, 0.0 }
0x106d   : > { %v3117_v21 = vpop.permute.xlu0 %3116 }
0x106e   : > { %v3195_v4 = vmul.f32 %v3117_v21, %v3093_v27  ;;  %v3106_v27 = vld [vmem:[%s6050_s8 + $0x70] sm:$0xff] }
0x1070   : > { %v3213_v25 = vsel %vm3211_vm4, %v3195_v4, 0.0 }
0x1071   : > { %v3122_v14 = vpop.permute.xlu1 %3121  ;;  %v3214_v31 = vadd.f32 %v3213_v25, %v3212_v49  ;;  %v3108_v25 = vld [vmem:[%s6050_s8 + $0x80] sm:$0xf] }
0x1072   : > { %v3196_v12 = vmul.f32 %v3122_v14, %v3094_v36  ;;  %v3107_v36 = vld [vmem:[%s6050_s8 + $0x78] sm:$0xff] }
0x1074   : > { %v3215_v44 = vsel %vm3211_vm4, %v3196_v12, 0.0 }
0x1075   : > { %v3127_v15 = vpop.permute.xlu1 %3126  ;;  %v3216_v59 = vadd.f32 %v3215_v44, %v3214_v31 }
0x1076   : > { %v3197_v10 = vmul.f32 %v3127_v15, %v3095_v55 }
0x1078   : > { %v3217_v58 = vsel %vm3211_vm4, %v3197_v10, 0.0 }
0x1079   : > { %v3132_v37 = vpop.permute.xlu0 %3131  ;;  %v3218_v2 = vadd.f32 %v3217_v58, %v3216_v59 }
0x107a   : > { %v3198_v62 = vmul.f32 %v3132_v37, %v3096_v61 }
0x107b   : > { %v3137_v60 = vpop.permute.xlu1 %3136 }
0x107c   : > { %v3219_v50 = vsel %vm3211_vm4, %v3198_v62, 0.0  ;;  %v3199_v5 = vmul.f32 %v3137_v60, %v3097_v11 }
0x107d   : > { %v3220_v20 = vadd.f32 %v3219_v50, %v3218_v2  ;;  %v3252_v50 = vld [vmem:[%s6051_s9] sm:$0x1] }
0x107e   : > { %v3221_v33 = vsel %vm3211_vm4, %v3199_v5, 0.0 }
0x107f   : > { %v3222_v40 = vadd.f32 %v3221_v33, %v3220_v20 }
0x1081   : > { %v3142_v47 = vpop.permute.xlu0 %3141 }
0x1082   : > { %v3200_v0 = vmul.f32 %v3142_v47, %v3098_v52 }
0x1083   : > { %v3147_v43 = vpop.permute.xlu1 %3146 }
0x1084   : > { %v3223_v41 = vsel %vm3211_vm4, %v3200_v0, 0.0  ;;  %v3201_v22 = vmul.f32 %v3147_v43, %v3099_v35 }
0x1085   : > { %v3224_v24 = vadd.f32 %v3223_v41, %v3222_v40 }
0x1086   : > { %v3225_v34 = vsel %vm3211_vm4, %v3201_v22, 0.0 }
0x1087   : > { %v3226_v26 = vadd.f32 %v3225_v34, %v3224_v24 }
0x1089   : > { %v3152_v42 = vpop.permute.xlu0 %3151 }
0x108a   : > { %v3202_v51 = vmul.f32 %v3152_v42, %v3100_v53 }
0x108b   : > { %v3157_v48 = vpop.permute.xlu1 %3156 }
0x108c   : > { %v3227_v57 = vsel %vm3211_vm4, %v3202_v51, 0.0  ;;  %v3203_v16 = vmul.f32 %v3157_v48, %v3101_v6 }
0x108d   : > { %v3228_v38 = vadd.f32 %v3227_v57, %v3226_v26 }
0x108e   : > { %v3229_v3 = vsel %vm3211_vm4, %v3203_v16, 0.0 }
0x108f   : > { %v3230_v23 = vadd.f32 %v3229_v3, %v3228_v38 }
0x1091   : > { %v3162_v13 = vpop.permute.xlu0 %3161 }
0x1092   : > { %v3204_v29 = vmul.f32 %v3162_v13, %v3102_v54 }
0x1093   : > { %v3167_v19 = vpop.permute.xlu1 %3166 }
0x1094   : > { %v3231_v56 = vsel %vm3211_vm4, %v3204_v29, 0.0  ;;  %v3205_v18 = vmul.f32 %v3167_v19, %v3103_v9 }
0x1095   : > { %v3232_v32 = vadd.f32 %v3231_v56, %v3230_v23 }
0x1096   : > { %v3233_v7 = vsel %vm3211_vm4, %v3205_v18, 0.0 }
0x1097   : > { %v3234_v14 = vadd.f32 %v3233_v7, %v3232_v32 }
0x1099   : > { %v3172_v1 = vpop.permute.xlu0 %3171 }
0x109a   : > { %v3206_v30 = vmul.f32 %v3172_v1, %v3104_v46 }
0x109b   : > { %v3177_v8 = vpop.permute.xlu1 %3176 }
0x109c   : > { %v3235_v28 = vsel %vm3211_vm4, %v3206_v30, 0.0  ;;  %v3207_v17 = vmul.f32 %v3177_v8, %v3105_v63 }
0x109d   : > { %v3236_v21 = vadd.f32 %v3235_v28, %v3234_v14 }
0x109e   : > { %v3237_v4 = vsel %vm3211_vm4, %v3207_v17, 0.0 }
0x109f   : > { %v3238_v61 = vadd.f32 %v3237_v4, %v3236_v21 }
0x10a1   : > { %v3182_v45 = vpop.permute.xlu0 %3181 }
0x10a2   : > { %v3208_v55 = vmul.f32 %v3182_v45, %v3106_v27 }
0x10a3   : > { %v3187_v15 = vpop.permute.xlu1 %3186 }
0x10a4   : > { %v3239_v39 = vsel %vm3211_vm4, %v3208_v55, 0.0  ;;  %v3209_v12 = vmul.f32 %v3187_v15, %v3107_v36 }
0x10a5   : > { %v3240_v37 = vadd.f32 %v3239_v39, %v3238_v61 }
0x10a6   : > { %v3241_v10 = vsel %vm3211_vm4, %v3209_v12, 0.0 }
0x10a7   : > { %v3242_v62 = vadd.f32 %v3241_v10, %v3240_v37 }
0x10a9   : > { %v3192_v49 = vpop.permute.xlu0 %3191 }
0x10aa   : > { %v3210_v44 = vmul.f32 %v3192_v49, %v3108_v25 }
0x10ac   : > { %v3244_v31 = vsel %vm3243_vm5, %v3210_v44, 0.0 }
0x10ad   : > { %v3245_v11 = vadd.f32 %v3244_v31, %v3242_v62 }
0x10af   : > { %v3246_v60 = vrot.slane %v3245_v11, 4 }
0x10b1   : > { %v3247_v58 = vadd.f32 %v3246_v60, %v3245_v11 }
0x10b3   : > { %v3248_v59 = vrot.slane %v3247_v58, 2 }
0x10b5   : > { %v3249_v52 = vadd.f32 %v3248_v59, %v3247_v58 }
0x10b7   : > { %v3250_v47 = vrot.slane %v3249_v52, 1 }
0x10b9   : > { %v3251_v5 = vadd.f32 %v3250_v47, %v3249_v52 }
0x10bb   : > { %v3253_v2 = vadd.f32 %v3252_v50, %v3251_v5 }
0x10bd   : > { %v3255_v0 = vsel %vm3254_vm6, %v3253_v2, -inf }
0x10be   : > { %3256 = vmax.xlane.f32.xlu1 %v3255_v0 }
0x114b   : > { %v3257_v20 = vpop.xlane.xlu1 %3256 }
0x114c   : > { %v3258_v35 = vsub.f32 %v3253_v2, %v3257_v20 }
0x114e   : > { %v3259_v43 = vmul.f32 1.442695, %v3258_v35 }
0x1150   : > { %4099 = vpow2.f32 %v3259_v43 }
0x115a   : > { %v4100_v33 = vpop.eup %4099 }
0x115b   : > { %v3261_v53 = vsel %vm3254_vm6, %v4100_v33, 0.0 }
0x115c   : > { %3262 = vadd.xlane.f32.xlu0 %v3261_v53 }
0x11e9   : > { %v3263_v42 = vpop.xlane.xlu0 %3262 }
0x11ea   : > { %4101 = vrcp.f32 %v3263_v42 }
0x11f4   : > { %v4102_v41 = vpop.eup %4101 }
0x11f5   : > { %v3265_v22 = vmul.f32 %v4102_v41, %v4100_v33 }
0x11f7   : > { %3266 = vst.msk [vmem:[%s368_s21] sm:$0x1] %vm3254_vm6, %v3265_v22 }
0x11f8   : > { %4148 = shalt.err (!%p4145_p3)
}
0x11f9   : > { %s4149_s26 = scalar_lea.hbm %s5999_s29, 16  ;;  %s4153_s21 = scalar_lea.hbm %s6052_s10, 32 }
0x11fa   : > { %p4150_p4 = scmp.ne.s32.totalorder %s5999_s29, %s4149_s26  ;;  %p4154_p9 = scmp.lt.u32.totalorder %s5999_s29, %s6052_s10 }
0x11fb   : > { %p4155_p10 = scmp.lt.u32.totalorder %s4153_s21, %s4149_s26  ;;  %p4157_p12 = scmp.lt.u32.totalorder %s4149_s26, %s5999_s29 }
0x11fc   : > { %p4151_p7 = pnand %p4150_p4, %p4299_p5 }
0x11fd   : > { %p4156_p11 = por %p4155_p10, %p4154_p9 }
0x11fe   : > { %p4152_p8 = pneg %p4151_p7 }
0x11ff   : > { %p4158_p13 = por %p4157_p12, %p4156_p11 }
0x1201   : > { %p4159_p0 = pnand %p4158_p13, %p4152_p8 }
0x1203   : > { %4162 = shalt.err (!%p4159_p0)
}
0x1204   : > { %3980 = dma.vmem_to_hbm [thread:$0]  (%p4299_p5), %s6001_s28, 16, %s5999_s29, %s3268_s22  }
0x1205 PF: > { %p3986_p1 = scmp.ge.s32.totalorder %s4197_s18, 2  ;;  %s3292_s13 = sand.u32 1, %s4185_s15  }
0x1206   : > { %s3293_s7 = scalar_lea.sflag [#allocation4], %s3292_s13 }
0x1207   : > { %p3983_p2 = pnand %p3986_p1, %p4303_p6 }
0x1209   : > { %4180 = dma.done.wait (!%p3983_p2), %s3293_s7, 16  }
0x120a   : > { %4182 = vsyncadd (!%p3983_p2), %s3293_s7, 4294967280  ;;  %p22_p3 = scmp.ge.s32.totalorder %s4286_s20, 4   ;;  %s6098_s15 = smov %s4189_s16 }
0x120b   : > { %s6099_s16 = smov %s4193_s17  ;;  %s6100_s17 = smov %s4297_s23 }
0x120c   : > { %s6101_s18 = smov %s4286_s20  ;;  %24 = sbr.rel (!%p22_p3) target bundleno = 6 (0x6), region = 108 }
0x1213   :  { %3297 = vsyncpa [#allocation4], 1 }
0x1214   :  { %3299 = vsyncpa [#allocation4 + $0x1], 1 }

</bundles_post_ra>
